<compile_context>
chip_gen: v5e
topology: v5e:2x2
jax: 0.10.0
libtpu: 0.0.40
codegen_flags: <defaults>
</compile_context>

<pallas_src>
import jax
import jax.numpy as jnp
from jax.experimental import pallas as pl
from jax.experimental.pallas import tpu as pltpu


# ----------------------------------------------------------------------------
# Fused kernel: encoder stand-in + cls_o hot path.
#
# grid = (H2 // tk,): one tk-wide column chunk of the 2048-d hidden layer per
# grid step.  Each step is fully independent ("parallel"):
#   feat    = relu(mean_pool(x) @ Wp + bp)                (trivial, recomputed)
#   h1_c    = relu(feat @ W1[:, c*tk:(c+1)*tk] + b1_c)
#   partial = h1_c @ W2[c*tk:(c+1)*tk, :]                 -> (B, 64) partial acc
# Partials are combined (+ b2, @ W3, + b3) in a tiny JAX epilogue.
# ----------------------------------------------------------------------------
def _fused_kernel(x_ref, wp_ref, bp_ref, w1_ref, b1_ref, w2_ref, part_ref):
    # Encoder stand-in: global average pool over the flattened (T*H*W) axis,
    # then projection to the 1024-d feature.
    # TODO(synk): for real-size clips (N ~ 3.2M elements) tile the pooling over
    # the T*H*W axis instead of loading the clip as a single VMEM block.
    pooled = jnp.mean(x_ref[...], axis=-1)                                 # (B, Cin)
    feat = jnp.dot(pooled, wp_ref[...],
                   preferred_element_type=jnp.float32) + bp_ref[...]       # (B, 1024)
    feat = jnp.maximum(feat, 0.0)

    # Chunk of the 2048-wide hidden layer; W1/W2 streamed from HBM as bf16,
    # accumulated in f32 on the MXU.
    h1 = jnp.dot(feat.astype(w1_ref.dtype), w1_ref[...],
                 preferred_element_type=jnp.float32) + b1_ref[...]         # (B, tk)
    h1 = jnp.maximum(h1, 0.0)                                              # ReLU
    part = jnp.dot(h1.astype(w2_ref.dtype), w2_ref[...],
                   preferred_element_type=jnp.float32)                     # (B, 64)
    part_ref[...] = part[None, :, :]


def of_cls_model(x_ncthw, params, *, tk=1024):
    B, Cin, T, H, W = x_ncthw.shape
    N = T * H * W
    x_bcn = x_ncthw.reshape(B, Cin, N).astype(jnp.float32)

    wp, bp = params["w_proj"], params["b_proj"]
    w1, b1 = params["w1"], params["b1"]
    w2, b2 = params["w2"], params["b2"]
    w3, b3 = params["w3"], params["b3"]

    Dh = wp.shape[1]            # 1024
    H2 = w1.shape[1]            # 2048
    D3 = w2.shape[1]            # 64
    assert H2 % tk == 0
    n_chunks = H2 // tk         # 2 -> one chunk per TensorCore on v7x

    partials = pl.pallas_call(
        _fused_kernel,
        out_shape=jax.ShapeDtypeStruct((n_chunks, B, D3), jnp.float32),
        grid=(n_chunks,),
        in_specs=[
            pl.BlockSpec((B, Cin, N), lambda c: (0, 0, 0)),   # clip (resident)
            pl.BlockSpec((Cin, Dh), lambda c: (0, 0)),        # proj weight
            pl.BlockSpec((1, Dh), lambda c: (0, 0)),          # proj bias
            pl.BlockSpec((Dh, tk), lambda c: (0, c)),         # W1 column chunk (bf16)
            pl.BlockSpec((1, tk), lambda c: (0, c)),          # b1 chunk
            pl.BlockSpec((tk, D3), lambda c: (c, 0)),         # W2 row chunk (bf16)
        ],
        out_specs=pl.BlockSpec((1, B, D3), lambda c: (c, 0, 0)),
        compiler_params=pltpu.CompilerParams(
            dimension_semantics=("parallel",),
            vmem_limit_bytes=32 * 1024 * 1024,
        ),
    )(x_bcn, wp, bp, w1, b1, w2)

    # Tiny epilogue: combine per-chunk / per-core partials, add b2, apply the
    # last two (64-wide) Linear layers.
    h2 = jnp.sum(partials, axis=0) + b2                                   # (B, 64)
    return h2 @ w3 + b3                                                   # (B, num_class)


def init_params(key, num_class, hidden_dim=1024, in_channels=2):
    ks = jax.random.split(key, 8)
    s = 0.02
    f32 = jnp.float32
    return {
        # encoder stand-in projection (in_channels -> 1024)
        "w_proj": s * jax.random.normal(ks[0], (in_channels, hidden_dim), f32),
        "b_proj": s * jax.random.normal(ks[1], (1, hidden_dim), f32),
        # cls_o head; W1/W2 stored bf16 (weight stream is the HBM bottleneck),
        # biases and the tiny W3 stay f32.
        "w1": (s * jax.random.normal(ks[2], (hidden_dim, 2048), f32)).astype(jnp.bfloat16),
        "b1": s * jax.random.normal(ks[3], (1, 2048), f32),
        "w2": (s * jax.random.normal(ks[4], (2048, 64), f32)).astype(jnp.bfloat16),
        "b2": s * jax.random.normal(ks[5], (1, 64), f32),
        "w3": s * jax.random.normal(ks[6], (64, num_class), f32),
        "b3": s * jax.random.normal(ks[7], (1, num_class), f32),
    }


def _reference(x_ncthw, p):
    # Pure-JAX reference of the same forward pass (weights upcast to f32).
    B, Cin, T, H, W = x_ncthw.shape
    pooled = jnp.mean(x_ncthw.reshape(B, Cin, -1).astype(jnp.float32), axis=-1)
    feat = jnp.maximum(pooled @ p["w_proj"] + p["b_proj"], 0.0)
    h1 = jnp.maximum(feat @ p["w1"].astype(jnp.float32) + p["b1"], 0.0)
    h2 = h1 @ p["w2"].astype(jnp.float32) + p["b2"]
    return h2 @ p["w3"] + p["b3"]


if __name__ == "__main__":
    key = jax.random.PRNGKey(0)
    kx, kp = jax.random.split(key)

    num_class = 25                       # NVGesture config['setting']['num_class']
    B, Cin, T, H, W = 2, 2, 8, 16, 16    # optical-flow clip, in_channels=2 (NCTHW)

    x1 = jax.random.normal(kx, (B, Cin, T, H, W), jnp.float32)
    params = init_params(kp, num_class)

    fwd = jax.jit(of_cls_model)
    out = fwd(x1, params)
    out = jax.block_until_ready(out)

    ref = _reference(x1, params)
    assert out.shape == (B, num_class)
    # bf16 weight storage + bf16 MXU inputs with f32 accumulation -> loosen
    # tolerance slightly vs. a pure-f32 pipeline.
    assert jnp.allclose(out, ref, atol=2e-3, rtol=2e-2), "mismatch vs reference"

    print("KERNEL_OK")
</pallas_src>

<mosaic_0001>
module attributes {stable_mosaic.version = 11 : i64} {
  func.func @_fused_kernel(%arg0: i32, %arg1: memref<2x2x2048xf32, #tpu.memory_space<vmem>>, %arg2: memref<2x1024xf32, #tpu.memory_space<vmem>>, %arg3: memref<1x1024xf32, #tpu.memory_space<vmem>>, %arg4: memref<1024x1024xbf16, #tpu.memory_space<vmem>>, %arg5: memref<1x1024xf32, #tpu.memory_space<vmem>>, %arg6: memref<1024x64xbf16, #tpu.memory_space<vmem>>, %arg7: memref<1x2x64xf32, #tpu.memory_space<vmem>>) attributes {dimension_semantics = [#tpu.dimension_semantics<parallel>], iteration_bounds = array<i64: 2>, scalar_prefetch = 0 : i64, scratch_operands = 0 : i64, tpu.core_type = #tpu.core_type<tc>, window_params = [{pipeline_mode = #tpu.pipeline_mode<synchronous>, transform_indices = @transform_0, window_bounds = array<i64: 2, 2, 2048>}, {pipeline_mode = #tpu.pipeline_mode<synchronous>, transform_indices = @transform_1, window_bounds = array<i64: 2, 1024>}, {pipeline_mode = #tpu.pipeline_mode<synchronous>, transform_indices = @transform_2, window_bounds = array<i64: 1, 1024>}, {transform_indices = @transform_3, window_bounds = array<i64: 1024, 1024>}, {transform_indices = @transform_4, window_bounds = array<i64: 1, 1024>}, {transform_indices = @transform_5, window_bounds = array<i64: 1024, 64>}, {transform_indices = @transform_6, window_bounds = array<i64: 1, 2, 64>}]} {
    %c0 = arith.constant 0 : index
    %c0_0 = arith.constant 0 : index
    %c0_1 = arith.constant 0 : index
    %0 = vector.load %arg1[%c0, %c0_0, %c0_1] : memref<2x2x2048xf32, #tpu.memory_space<vmem>>, vector<2x2x2048xf32>
    %cst = arith.constant dense<0.000000e+00> : vector<2x2xf32>
    %1 = vector.multi_reduction <add>, %0, %cst [2] : vector<2x2x2048xf32> to vector<2x2xf32>
    %cst_2 = arith.constant 2.048000e+03 : f32
    %2 = vector.broadcast %cst_2 : f32 to vector<2x2xf32>
    %3 = arith.divf %1, %2 : vector<2x2xf32>
    %c0_3 = arith.constant 0 : index
    %c0_4 = arith.constant 0 : index
    %4 = vector.load %arg2[%c0_3, %c0_4] : memref<2x1024xf32, #tpu.memory_space<vmem>>, vector<2x1024xf32>
    %cst_5 = arith.constant dense<0.000000e+00> : vector<2x1024xf32>
    %5 = tpu.matmul %3, %4, %cst_5 {dimension_numbers = #tpu.dot_dimension_numbers<[1], [0], [0], [1], [0, 0, 1, 1], [], []>} : vector<2x2xf32>, vector<2x1024xf32>, vector<2x1024xf32> -> vector<2x1024xf32>
    %c0_6 = arith.constant 0 : index
    %c0_7 = arith.constant 0 : index
    %6 = vector.load %arg3[%c0_6, %c0_7] : memref<1x1024xf32, #tpu.memory_space<vmem>>, vector<1x1024xf32>
    %7 = vector.broadcast %6 : vector<1x1024xf32> to vector<2x1024xf32>
    %8 = arith.addf %5, %7 : vector<2x1024xf32>
    %cst_8 = arith.constant 0.000000e+00 : f32
    %9 = vector.broadcast %cst_8 : f32 to vector<2x1024xf32>
    %10 = arith.maximumf %8, %9 : vector<2x1024xf32>
    %11 = arith.truncf %10 : vector<2x1024xf32> to vector<2x1024xbf16>
    %c0_9 = arith.constant 0 : index
    %c0_10 = arith.constant 0 : index
    %12 = vector.load %arg4[%c0_9, %c0_10] : memref<1024x1024xbf16, #tpu.memory_space<vmem>>, vector<1024x1024xbf16>
    %cst_11 = arith.constant dense<0.000000e+00> : vector<2x1024xf32>
    %13 = tpu.matmul %11, %12, %cst_11 {dimension_numbers = #tpu.dot_dimension_numbers<[1], [0], [0], [1], [0, 0, 1, 1], [], []>} : vector<2x1024xbf16>, vector<1024x1024xbf16>, vector<2x1024xf32> -> vector<2x1024xf32>
    %c0_12 = arith.constant 0 : index
    %c0_13 = arith.constant 0 : index
    %14 = vector.load %arg5[%c0_12, %c0_13] : memref<1x1024xf32, #tpu.memory_space<vmem>>, vector<1x1024xf32>
    %15 = vector.broadcast %14 : vector<1x1024xf32> to vector<2x1024xf32>
    %16 = arith.addf %13, %15 : vector<2x1024xf32>
    %cst_14 = arith.constant 0.000000e+00 : f32
    %17 = vector.broadcast %cst_14 : f32 to vector<2x1024xf32>
    %18 = arith.maximumf %16, %17 : vector<2x1024xf32>
    %19 = arith.truncf %18 : vector<2x1024xf32> to vector<2x1024xbf16>
    %c0_15 = arith.constant 0 : index
    %c0_16 = arith.constant 0 : index
    %20 = vector.load %arg6[%c0_15, %c0_16] : memref<1024x64xbf16, #tpu.memory_space<vmem>>, vector<1024x64xbf16>
    %cst_17 = arith.constant dense<0.000000e+00> : vector<2x64xf32>
    %21 = tpu.matmul %19, %20, %cst_17 {dimension_numbers = #tpu.dot_dimension_numbers<[1], [0], [0], [1], [0, 0, 1, 1], [], []>} : vector<2x1024xbf16>, vector<1024x64xbf16>, vector<2x64xf32> -> vector<2x64xf32>
    %22 = vector.shape_cast %21 : vector<2x64xf32> to vector<1x2x64xf32>
    %c0_18 = arith.constant 0 : index
    %c0_19 = arith.constant 0 : index
    %c0_20 = arith.constant 0 : index
    %23 = vector.load %arg7[%c0_18, %c0_19, %c0_20] : memref<1x2x64xf32, #tpu.memory_space<vmem>>, vector<1x2x64xf32>
    tpu.vector_store %arg7[%c0_18, %c0_19, %c0_20], %22 {strides = array<i32>} : memref<1x2x64xf32, #tpu.memory_space<vmem>>, vector<1x2x64xf32>,
    return
  }
  func.func @transform_0(%arg0: i32) -> (i32, i32, i32) {
    %c0_i32 = arith.constant 0 : i32
    %c0_i32_0 = arith.constant 0 : i32
    %c0_i32_1 = arith.constant 0 : i32
    %c0_i32_2 = arith.constant 0 : i32
    return %c0_i32, %c0_i32_0, %c0_i32_1 : i32, i32, i32
  }
  func.func @transform_1(%arg0: i32) -> (i32, i32) {
    %c0_i32 = arith.constant 0 : i32
    %c0_i32_0 = arith.constant 0 : i32
    %c0_i32_1 = arith.constant 0 : i32
    return %c0_i32, %c0_i32_0 : i32, i32
  }
  func.func @transform_2(%arg0: i32) -> (i32, i32) {
    %c0_i32 = arith.constant 0 : i32
    %c0_i32_0 = arith.constant 0 : i32
    %c0_i32_1 = arith.constant 0 : i32
    return %c0_i32, %c0_i32_0 : i32, i32
  }
  func.func @transform_3(%arg0: i32) -> (i32, i32) {
    %c0_i32 = arith.constant 0 : i32
    %c0_i32_0 = arith.constant 0 : i32
    return %c0_i32, %arg0 : i32, i32
  }
  func.func @transform_4(%arg0: i32) -> (i32, i32) {
    %c0_i32 = arith.constant 0 : i32
    %c0_i32_0 = arith.constant 0 : i32
    return %c0_i32, %arg0 : i32, i32
  }
  func.func @transform_5(%arg0: i32) -> (i32, i32) {
    %c0_i32 = arith.constant 0 : i32
    %c0_i32_0 = arith.constant 0 : i32
    return %arg0, %c0_i32 : i32, i32
  }
  func.func @transform_6(%arg0: i32) -> (i32, i32, i32) {
    %c0_i32 = arith.constant 0 : i32
    %c0_i32_0 = arith.constant 0 : i32
    %c0_i32_1 = arith.constant 0 : i32
    return %arg0, %c0_i32, %c0_i32_0 : i32, i32, i32
  }
}

</mosaic_0001>

<bundles_post_ra>
// kernel: of_cls_model.1
= control target key start
LH: loop header
LB: loop body
LE: loop exit
PB: predicated region body
PF: predicated region fallthrough
CT: control target
= control target key end

     0   :  { %s10125_s0 = inlined_call_operand.vmem [shape: f32[2,2,2048], index: 0, kind: input, shape index: {}]   ;;  %s10126_s1 = inlined_call_operand.hbm [shape: f32[2,1024], index: 1, kind: input, shape index: {}]   ;;  %s10127_s2 = inlined_call_operand.hbm [shape: f32[1,1024], index: 2, kind: input, shape index: {}]   ;;  %s10128_s3 = inlined_call_operand.hbm [shape: bf16[1024,2048], index: 3, kind: input, shape index: {}]   ;;  %s10129_s4 = inlined_call_operand.hbm [shape: f32[1,2048], index: 4, kind: input, shape index: {}]   ;;  %s10130_s5 = inlined_call_operand.vmem [shape: bf16[2048,64], index: 5, kind: input, shape index: {}]   ;;  %s10131_s6 = inlined_call_operand.vmem [shape: f32[2,2,64], index: 6, kind: output, shape index: {}]  }
   0x1   :  { %10132 = sst [smem:[#allocation12_spill]] %s10126_s1 }
   0x2   :  { %10133 = sst [smem:[#allocation13_spill]] %s10127_s2 }
   0x3   :  { %10134 = sst [smem:[#allocation14_spill]] %s10128_s3 }
   0x4   :  { %11 = vsyncpa [#allocation3], 0 }
   0x5   :  { %12 = vsyncpa [#allocation5], 0  ;;  %s8627_s21 = smov 0   ;;  %s8629_s22 = smov 0  }
   0x6   :  { %s8631_s23 = smov 0   ;;  %s8633_s24 = smov 0  }
   0x7 LB: > { %s8646_s25 = sadd.s32 4294967295, %s8584_s24   ;;  %s8649_s26 = sadd.s32 1, %s8584_s24   ;;  %s8584_s24 = sphi %s8633_s24, %s10149_s24   ;;  %s8580_s23 = sphi %s8631_s23, %s10148_s23   ;;  %s8576_s22 = sphi %s8629_s22, %s10147_s22   ;;  %s8572_s21 = sphi %s8627_s21, %s10146_s21  }
   0x8   : > { %s85_s27 = ssub.s32 %s8584_s24, %s8649_s26  ;;  %s88_s28 = sadd.s32 1, %s8580_s23 }
   0x9   : > { %p86_p0 = scmp.eq.s32.totalorder %s85_s27, 0  ;;  %p95_p1 = scmp.ne.s32.totalorder %s8580_s23, %s8576_s22 }
   0xa   : > { %p96_p2 = scmp.eq.s32.totalorder %s8584_s24, 0  ;;  %p101_p3 = scmp.ne.s32.totalorder %s8576_s22, %s8572_s21 }
   0xb   : > { %s8659_s29 = scalar_select %p86_p0, %s8580_s23, %s88_s28  }
   0xc   : > { %p8661_p4 = por %p96_p2, %p95_p1  ;;  %p102_p5 = scmp.eq.s32.totalorder %s8646_s25, 0 }
   0xd   : > { %10135 = sst [smem:[#allocation11_spill]] %s8659_s29  ;;  %p5433_p6 = scmp.ge.s32.totalorder %s8584_s24, 1 }
   0xe   : > { %p190_p7 = scmp.lt.s32.totalorder %s8584_s24, 3  ;;  %p8670_p8 = por %p102_p5, %p101_p3 }
   0xf   : > { %s10139_s1 = sld [smem:[#allocation12_spill]]  ;;  %s8586_s12 = smov [#allocation2]  }
  0x10   : > { %p8674_p9 = pnand %p5433_p6, %p190_p7  ;;  %s207_s13 = sshll.u32 %s8586_s12, 4  ;;  %s208_s13 = int_to_ptr.vmem [resolvable:$true] %s207_s13 }
  0x11   : > { %p8377_p12 = scmp.lt.s32.totalorder %s8584_s24, 2  ;;  %s230_s15 = sand.u32 1, %s8584_s24  }
  0x12   : > { %p8361_p10 = pneg %p8674_p9  ;;  %s232_s16 = sand.u32 1, %s8580_s23  }
  0x13   : > { %p8694_p13 = pnand %p8377_p12, %p8661_p4  ;;  %s5437_s18 = sshll.u32 %s232_s16, 12 }
  0x14   : > { %p8685_p11 = pnand %p8361_p10, %p102_p5  ;;  %s7772_s19 = sshll.u32 %s8584_s24, 5 }
  0x15   : > { %s205_s11 = sshll.u32 %s10139_s1, 4  ;;  %s10142_s3 = sld [smem:[#allocation14_spill]]  ;;  %s206_s11 = int_to_ptr.hbm [resolvable:$true] %s205_s11 }
  0x16   : > { %8364 = dma.hbm_to_vmem [thread:$0]  (!%p8685_p11), %s206_s11, 256, %s208_s13, [#allocation3]  }
  0x17   : > { %s234_s9 = scalar_lea.vmem [#allocation6], %s5437_s18  ;;  %s10143_s2 = sld [smem:[#allocation13_spill]] }
  0x18   : > { %s242_s10 = sshll.u32 %s234_s9, 4  ;;  %s8709_s29 = scalar_lea.sflag [#allocation3], %s230_s15  ;;  %s243_s10 = int_to_ptr.vmem [resolvable:$true] %s242_s10 }
  0x19   : > { %p8456_p1 = pneg %p8694_p13 }
  0x1b   : > { %s239_s27 = scalar_lea.hbm %s10142_s3, %s7772_s19  ;;  %s8459_s20 = scalar_lea.hbm %s10142_s3, 8192 }
  0x1c   : > { %s240_s28 = sshll.u32 %s239_s27, 4  ;;  %s241_s28 = int_to_ptr.hbm [resolvable:$true] %s240_s28 }
  0x1d   : > { %s217_s1 = sshll.u32 %s10143_s2, 4  ;;  %s8452_s11 = sshra.s32 %s241_s28, 4  ;;  %s8453_s11 = int_to_ptr.hbm [resolvable:$true] %s8452_s11  ;;  %s218_s1 = int_to_ptr.hbm [resolvable:$true] %s217_s1 }
  0x1e   : > { %s8454_s13 = scalar_lea.hbm %s8453_s11, 4096  ;;  %p8460_p4 = scmp.lt.s32.totalorder %s8453_s11, %s10142_s3 }
  0x1f   : > { %p8455_p0 = scmp.ne.s32.totalorder %s8453_s11, %s8454_s13  ;;  %p8461_p6 = scmp.lt.s32.totalorder %s8459_s20, %s8454_s13 }
  0x21   : > { %p8457_p2 = pnand %p8456_p1, %p8455_p0  ;;  %p8462_p7 = por %p8461_p6, %p8460_p4 }
  0x23   : > { %p8458_p3 = pneg %p8457_p2 }
  0x25   : > { %p8463_p10 = pnand %p8462_p7, %p8458_p3 }
  0x27   : > { %8466 = shalt.err (!%p8463_p10)
}
  0x28   : > { %s8587_s15 = smov 1024   ;;  %s8588_s9 = smov 512  }
  0x29   : > { %s8589_s30 = smov 32   ;;  %s8590_s12 = smov [#allocation4]  }
  0x2a   : > { %8371 = dma.hbm_to_vmem [thread:$0]  (!%p8694_p13), %s241_s28, 65536, %s243_s10, %s8709_s29, %s8587_s15, %s8588_s9, %s8589_s30  }
  0x2b   : > { %s219_s18 = sshll.u32 %s8590_s12, 4  ;;  %s5440_s11 = sshll.u32 %s232_s16, 3  ;;  %s220_s18 = int_to_ptr.vmem [resolvable:$true] %s219_s18 }
  0x2c   : > { %8367 = dma.hbm_to_vmem [thread:$0]  (!%p8685_p11), %s218_s1, 128, %s220_s18, [#allocation5]  }
  0x2d   : > { %s5441_s13 = sshll.u32 %s8584_s24, 3  ;;  %s256_s19 = scalar_lea.vmem [#allocation7], %s5440_s11 }
  0x2e   : > { %s264_s20 = sshll.u32 %s256_s19, 4  ;;  %s260_s2 = scalar_lea.hbm %s10129_s4, %s5441_s13  ;;  %s265_s20 = int_to_ptr.vmem [resolvable:$true] %s264_s20 }
  0x2f   : > { %s262_s3 = sshll.u32 %s260_s2, 4  ;;  %s8519_s24 = scalar_lea.hbm %s10129_s4, 16  ;;  %s263_s3 = int_to_ptr.hbm [resolvable:$true] %s262_s3 }
  0x30   : > { %s8512_s28 = sshra.s32 %s263_s3, 4  ;;  %s8513_s28 = int_to_ptr.hbm [resolvable:$true] %s8512_s28 }
  0x31   : > { %s8514_s10 = scalar_lea.hbm %s8513_s28, 8  ;;  %p8520_p11 = scmp.lt.s32.totalorder %s8513_s28, %s10129_s4 }
  0x32   : > { %p8515_p12 = scmp.ne.s32.totalorder %s8513_s28, %s8514_s10  ;;  %p8521_p3 = scmp.lt.s32.totalorder %s8519_s24, %s8514_s10 }
  0x34   : > { %p8517_p0 = pnand %p8515_p12, %p8456_p1  ;;  %p8522_p4 = por %p8521_p3, %p8520_p11 }
  0x36   : > { %p8518_p2 = pneg %p8517_p0 }
  0x38   : > { %p8523_p6 = pnand %p8522_p4, %p8518_p2 }
  0x3a   : > { %8526 = shalt.err (!%p8523_p6)
}
  0x3b   : > { %8374 = dma.hbm_to_vmem [thread:$0]  (!%p8694_p13), %s263_s3, 128, %s265_s20, %s8709_s29  }
  0x3c   : > { %282 = sbr.rel (%p8674_p9) target bundleno = 1297 (0x511), region = 44 }
  0x41   : > { %8559 = dma.done.wait (%p102_p5), [#allocation3], 256  }
  0x42   : > { %8561 = vsyncadd (%p102_p5), [#allocation3], 4294967040 }
  0x43   : > { %8563 = dma.done.wait (%p102_p5), [#allocation5], 128  }
  0x44   : > { %8565 = vsyncadd (%p102_p5), [#allocation5], 4294967168  ;;  %s294_s2 = sand.u32 1, %s8646_s25   ;;  %s296_s3 = sand.u32 1, %s8576_s22  }
  0x45   : > { %s5445_s29 = sshll.u32 %s296_s3, 12  ;;  %s295_s8 = scalar_lea.sflag [#allocation3], %s294_s2 }
  0x46   : > { %s8759_s17 = scalar_lea.vmem [#allocation6], %s5445_s29 }
  0x47   : > { %8567 = dma.done.wait (%p8670_p8), %s295_s8, 65664  }
  0x48   : > { %8569 = vsyncadd (%p8670_p8), %s295_s8, 4294901632  ;;  %v359_v0 = vld [vmem:[%s10125_s0] sm:$0xff]  ;;  %v360_v1 = vld [vmem:[%s10125_s0 + $0x8] sm:$0xff]  ;;  %vm448_vm0 = vcmask 1041408   ;;  %vm550_vm2 = vcmask 1041409   ;;  %vm565_vm3 = vcmask 15360  }
  0x49   : > { %375 = vst [vmem:[#allocation1] ss:$4 sm:$0xff] %v359_v0  ;;  %v361_v2 = vld [vmem:[%s10125_s0 + $0x10] sm:$0xff]  ;;  %v362_v3 = vld [vmem:[%s10125_s0 + $0x18] sm:$0xff]  ;;  %v364_v20 = vld [vmem:[%s10125_s0 + $0x28] sm:$0xff]  ;;  %s9258_s16 = sshll.u32 %s296_s3, 3 }
  0x4a   : > { %377 = vst [vmem:[#allocation1 + $0x20] ss:$4 sm:$0xff] %v360_v1  ;;  %v363_v24 = vld [vmem:[%s10125_s0 + $0x20] sm:$0xff]  ;;  %v365_v44 = vld [vmem:[%s10125_s0 + $0x30] sm:$0xff]  ;;  %v366_v45 = vld [vmem:[%s10125_s0 + $0x38] sm:$0xff]  ;;  %s9285_s15 = scalar_lea.vmem [#allocation7], %s9258_s16 }
  0x4b   : > { %s5447_s2 = sshll.u32 %s8646_s25, 7  ;;  %p355_p8 = scmp.lt.s32.totalorder %s8646_s25, 1  ;;  %vm5314_vm4 = vcmask 517120  }
  0x4c   : > { %p9969_p5 = scmp.lt.s32.totalorder %s5447_s2, 255 }
  0x4d   : > { %s10153_s25 = smov (!%p355_p8, %s8646_s25), 1 }
  0x4e   : > { %s10151_s2 = smov (!%p9969_p5, %s5447_s2), 255 }
  0x4f   : > { %s5448_s29 = sshll.u32 %s10151_s2, 2 }
  0x50   : > { %v378_v4 = vld.sshfl [vmem:[#allocation1] sm:$0xff pattern:$0x73625140]  ;;  %v379_v5 = vld.sshfl [vmem:[#allocation1 + $0x8] sm:$0xff pattern:$0x73625140]  ;;  %s10007_s30 = scalar_lea.vmem %s10130_s5, %s5448_s29 }
  0x51   : > { %v380_v6 = vld.sshfl [vmem:[#allocation1 + $0x10] sm:$0xff pattern:$0x73625140]  ;;  %v381_v7 = vld.sshfl [vmem:[#allocation1 + $0x18] sm:$0xff pattern:$0x73625140] }
  0x52   : > { %v382_v8 = vld.sshfl [vmem:[#allocation1 + $0x20] sm:$0xff pattern:$0x73625140]  ;;  %v383_v9 = vld.sshfl [vmem:[#allocation1 + $0x28] sm:$0xff pattern:$0x73625140] }
  0x53   : > { %v384_v10 = vld.sshfl [vmem:[#allocation1 + $0x30] sm:$0xff pattern:$0x73625140]  ;;  %v385_v11 = vld.sshfl [vmem:[#allocation1 + $0x38] sm:$0xff pattern:$0x73625140] }
  0x54   : > { %386 = vst [vmem:[#allocation1] ss:$4 sm:$0xff] %v361_v2  ;;  %v449_v12 = vsel %vm448_vm0, %v378_v4, 0.0  ;;  %v450_v13 = vsel %vm448_vm0, %v379_v5, 0.0  ;;  %v452_v14 = vsel %vm448_vm0, %v380_v6, 0.0  ;;  %v454_v16 = vsel %vm448_vm0, %v381_v7, 0.0 }
  0x55   : > { %387 = vst [vmem:[#allocation1 + $0x20] ss:$4 sm:$0xff] %v362_v3  ;;  %v451_v15 = vadd.f32 %v450_v13, %v449_v12  ;;  %v456_v18 = vsel %vm448_vm0, %v382_v8, 0.0  ;;  %v458_v21 = vsel %vm448_vm0, %v383_v9, 0.0  ;;  %v460_v22 = vsel %vm448_vm0, %v384_v10, 0.0 }
  0x56   : > { %v462_v23 = vsel %vm448_vm0, %v385_v11, 0.0 }
  0x57   : > { %v453_v17 = vadd.f32 %v452_v14, %v451_v15 }
  0x59   : > { %v455_v19 = vadd.f32 %v454_v16, %v453_v17 }
  0x5b   : > { %v388_v25 = vld.sshfl [vmem:[#allocation1] sm:$0xff pattern:$0x73625140]  ;;  %v389_v26 = vld.sshfl [vmem:[#allocation1 + $0x8] sm:$0xff pattern:$0x73625140]  ;;  %v457_v27 = vadd.f32 %v456_v18, %v455_v19 }
  0x5c   : > { %v390_v28 = vld.sshfl [vmem:[#allocation1 + $0x10] sm:$0xff pattern:$0x73625140]  ;;  %v391_v29 = vld.sshfl [vmem:[#allocation1 + $0x18] sm:$0xff pattern:$0x73625140] }
  0x5d   : > { %v392_v30 = vld.sshfl [vmem:[#allocation1 + $0x20] sm:$0xff pattern:$0x73625140]  ;;  %v393_v31 = vld.sshfl [vmem:[#allocation1 + $0x28] sm:$0xff pattern:$0x73625140]  ;;  %v459_v32 = vadd.f32 %v458_v21, %v457_v27 }
  0x5e   : > { %v394_v33 = vld.sshfl [vmem:[#allocation1 + $0x30] sm:$0xff pattern:$0x73625140]  ;;  %v395_v34 = vld.sshfl [vmem:[#allocation1 + $0x38] sm:$0xff pattern:$0x73625140] }
  0x5f   : > { %397 = vst [vmem:[#allocation1 + $0x20] ss:$4 sm:$0xff] %v364_v20  ;;  %v461_v35 = vadd.f32 %v460_v22, %v459_v32  ;;  %v464_v36 = vsel %vm448_vm0, %v388_v25, 0.0  ;;  %v466_v38 = vsel %vm448_vm0, %v389_v26, 0.0  ;;  %v468_v40 = vsel %vm448_vm0, %v390_v28, 0.0 }
  0x60   : > { %396 = vst [vmem:[#allocation1] ss:$4 sm:$0xff] %v363_v24  ;;  %v470_v42 = vsel %vm448_vm0, %v391_v29, 0.0  ;;  %v472_v43 = vsel %vm448_vm0, %v392_v30, 0.0  ;;  %v474_v56 = vsel %vm448_vm0, %v393_v31, 0.0  ;;  %v476_v62 = vsel %vm448_vm0, %v394_v33, 0.0 }
  0x61   : > { %v463_v37 = vadd.f32 %v462_v23, %v461_v35  ;;  %v478_v2 = vsel %vm448_vm0, %v395_v34, 0.0 }
  0x63   : > { %v465_v39 = vadd.f32 %v464_v36, %v463_v37 }
  0x65   : > { %v467_v41 = vadd.f32 %v466_v38, %v465_v39  ;;  %v524_v38 = vld [vmem:[#allocation2] sm:$0xff]  ;;  %v8591_v39 = vmov 2048.0  }
  0x66   : > { %v402_v51 = vld.sshfl [vmem:[#allocation1 + $0x20] sm:$0xff pattern:$0x73625140]  ;;  %v403_v52 = vld.sshfl [vmem:[#allocation1 + $0x28] sm:$0xff pattern:$0x73625140]  ;;  %8418 = vrcp.f32 %v8591_v39 }
  0x67   : > { %v469_v46 = vadd.f32 %v468_v40, %v467_v41  ;;  %v398_v47 = vld.sshfl [vmem:[#allocation1] sm:$0xff pattern:$0x73625140]  ;;  %v399_v48 = vld.sshfl [vmem:[#allocation1 + $0x8] sm:$0xff pattern:$0x73625140] }
  0x68   : > { %v400_v49 = vld.sshfl [vmem:[#allocation1 + $0x10] sm:$0xff pattern:$0x73625140]  ;;  %v401_v50 = vld.sshfl [vmem:[#allocation1 + $0x18] sm:$0xff pattern:$0x73625140] }
  0x69   : > { %v471_v53 = vadd.f32 %v470_v42, %v469_v46  ;;  %v404_v54 = vld.sshfl [vmem:[#allocation1 + $0x30] sm:$0xff pattern:$0x73625140]  ;;  %v405_v55 = vld.sshfl [vmem:[#allocation1 + $0x38] sm:$0xff pattern:$0x73625140] }
  0x6a   : > { %406 = vst [vmem:[#allocation1] ss:$4 sm:$0xff] %v365_v44  ;;  %v482_v57 = vsel %vm448_vm0, %v398_v47, 0.0  ;;  %v483_v58 = vsel %vm448_vm0, %v399_v48, 0.0  ;;  %v485_v59 = vsel %vm448_vm0, %v400_v49, 0.0  ;;  %v487_v63 = vsel %vm448_vm0, %v401_v50, 0.0 }
  0x6b   : > { %v473_v60 = vadd.f32 %v472_v43, %v471_v53  ;;  %407 = vst [vmem:[#allocation1 + $0x20] ss:$4 sm:$0xff] %v366_v45  ;;  %v484_v61 = vadd.f32 %v483_v58, %v482_v57  ;;  %v489_v3 = vsel %vm448_vm0, %v402_v51, 0.0  ;;  %v491_v6 = vsel %vm448_vm0, %v403_v52, 0.0  ;;  %v525_v44 = vld [vmem:[#allocation2 + $0x8] sm:$0xff] }
  0x6c   : > { %v493_v9 = vsel %vm448_vm0, %v404_v54, 0.0  ;;  %v495_v12 = vsel %vm448_vm0, %v405_v55, 0.0  ;;  %v8419_v45 = vpop.eup %8418  ;;  %v546_v55 = vlaneseq }
  0x6d   : > { %v475_v0 = vadd.f32 %v474_v56, %v473_v60  ;;  %v486_v1 = vadd.f32 %v485_v59, %v484_v61  ;;  %v516_v46 = vmul.f32 2048.0, %v8419_v45  ;;  %vm520_vm1 = vweird.f32 %v8419_v45  ;;  %v5692_v60 = vld [vmem:[%s8759_s17 + $0x1c0] sm:$0xf] }
  0x6e   : > { %v547_v57 = vand.u32 127, %v546_v55  ;;  %v7833_v61 = vld [vmem:[%s8759_s17 + $0x1dc] sm:$0xf0] }
  0x6f   : > { %v477_v4 = vadd.f32 %v476_v62, %v475_v0  ;;  %v488_v5 = vadd.f32 %v487_v63, %v486_v1  ;;  %v517_v51 = vsub.f32 1.0, %v516_v46  ;;  %v5948_v63 = vld [vmem:[%s8759_s17 + $0x3c0] sm:$0xf] }
  0x70   : > { %v7897_v0 = vld [vmem:[%s8759_s17 + $0x3dc] sm:$0xf0] }
  0x71   : > { %v479_v7 = vadd.f32 %v478_v2, %v477_v4  ;;  %v490_v8 = vadd.f32 %v489_v3, %v488_v5  ;;  %v408_v10 = vld.sshfl [vmem:[#allocation1] sm:$0xff pattern:$0x73625140]  ;;  %v409_v13 = vld.sshfl [vmem:[#allocation1 + $0x8] sm:$0xff pattern:$0x73625140]  ;;  %v518_v52 = vmul.f32 %v8419_v45, %v517_v51 }
  0x72   : > { %v497_v15 = vsel %vm448_vm0, %v408_v10, 0.0  ;;  %v410_v16 = vld.sshfl [vmem:[#allocation1 + $0x10] sm:$0xff pattern:$0x73625140]  ;;  %v499_v18 = vsel %vm448_vm0, %v409_v13, 0.0 }
  0x73   : > { %480 = vadd.xlane.f32.xlu0 %v479_v7  ;;  %v492_v11 = vadd.f32 %v491_v6, %v490_v8  ;;  %v411_v19 = vld.sshfl [vmem:[#allocation1 + $0x18] sm:$0xff pattern:$0x73625140]  ;;  %v501_v21 = vsel %vm448_vm0, %v410_v16, 0.0  ;;  %v519_v54 = vadd.f32 %v8419_v45, %v518_v52  ;;  %v6204_v1 = vld [vmem:[%s8759_s17 + $0x5c0] sm:$0xf]  ;;  %v5693_v7 = vor.u32 %v7833_v61, %v5692_v60 }
  0x74   : > { %v412_v22 = vld.sshfl [vmem:[#allocation1 + $0x20] sm:$0xff pattern:$0x73625140]  ;;  %v503_v24 = vsel %vm448_vm0, %v411_v19, 0.0  ;;  %554 = vst [vmem:[#allocation1] ss:$4 sm:$0xff] %v524_v38  ;;  %v5949_v8 = vor.u32 %v7897_v0, %v5948_v63 }
  0x75   : > { %v494_v14 = vadd.f32 %v493_v9, %v492_v11  ;;  %v413_v25 = vld.sshfl [vmem:[#allocation1 + $0x28] sm:$0xff pattern:$0x73625140]  ;;  %v505_v27 = vsel %vm448_vm0, %v412_v22, 0.0  ;;  %v521_v56 = vsel %vm520_vm1, %v8419_v45, %v519_v54  ;;  %v7961_v2 = vld [vmem:[%s8759_s17 + $0x5dc] sm:$0xf0] }
  0x76   : > { %v414_v28 = vld.sshfl [vmem:[#allocation1 + $0x30] sm:$0xff pattern:$0x73625140]  ;;  %v507_v30 = vsel %vm448_vm0, %v413_v25, 0.0  ;;  %v6460_v3 = vld [vmem:[%s8759_s17 + $0x7c0] sm:$0xf] }
  0x77   : > { %v496_v17 = vadd.f32 %v495_v12, %v494_v14  ;;  %v415_v31 = vld.sshfl [vmem:[#allocation1 + $0x38] sm:$0xff pattern:$0x73625140]  ;;  %v509_v33 = vsel %vm448_vm0, %v414_v28, 0.0  ;;  %v8025_v4 = vld [vmem:[%s8759_s17 + $0x7dc] sm:$0xf0]  ;;  %v6205_v14 = vor.u32 %v7961_v2, %v6204_v1 }
  0x78   : > { %v511_v35 = vsel %vm448_vm0, %v415_v31, 0.0  ;;  %556 = vst [vmem:[#allocation1 + $0x20] ss:$4 sm:$0xff] %v525_v44  ;;  %v5660_v9 = vld [vmem:[%s8759_s17 + $0x180] sm:$0xf] }
  0x79   : > { %v498_v20 = vadd.f32 %v497_v15, %v496_v17  ;;  %v7825_v10 = vld [vmem:[%s8759_s17 + $0x19c] sm:$0xf0]  ;;  %v6461_v15 = vor.u32 %v8025_v4, %v6460_v3 }
  0x7a   : > { %v5916_v12 = vld [vmem:[%s8759_s17 + $0x380] sm:$0xf] }
  0x7b   : > { %v500_v23 = vadd.f32 %v499_v18, %v498_v20  ;;  %v557_v40 = vld.sshfl [vmem:[#allocation1] sm:$0xff pattern:$0x73625140]  ;;  %v558_v41 = vld.sshfl [vmem:[#allocation1 + $0x8] sm:$0xff pattern:$0x73625140]  ;;  %v5661_v20 = vor.u32 %v7825_v10, %v5660_v9 }
  0x7c   : > { %5450 = vmatpush.msk.msra.mxu0 %vm448_vm0, %v557_v40  ;;  %5452 = vmatpush.msk.msra.mxu1 %vm448_vm0, %v558_v41  ;;  %v559_v42 = vld.sshfl [vmem:[#allocation1 + $0x10] sm:$0xff pattern:$0x73625140]  ;;  %v560_v43 = vld.sshfl [vmem:[#allocation1 + $0x18] sm:$0xff pattern:$0x73625140] }
  0x7d   : > { %v502_v26 = vadd.f32 %v501_v21, %v500_v23  ;;  %5454 = vmatpush.msk.msra.mxu2 %vm448_vm0, %v559_v42  ;;  %5456 = vmatpush.msk.msra.mxu3 %vm448_vm0, %v560_v43  ;;  %v7889_v13 = vld [vmem:[%s8759_s17 + $0x39c] sm:$0xf0] }
  0x7e   : > { %v6172_v16 = vld [vmem:[%s8759_s17 + $0x580] sm:$0xf]  ;;  %v5917_v21 = vor.u32 %v7889_v13, %v5916_v12 }
  0x7f   : > { %v504_v29 = vadd.f32 %v503_v24, %v502_v26  ;;  %v561_v47 = vld.sshfl [vmem:[#allocation1 + $0x20] sm:$0xff pattern:$0x73625140]  ;;  %v562_v48 = vld.sshfl [vmem:[#allocation1 + $0x28] sm:$0xff pattern:$0x73625140] }
  0x80   : > { %5458 = vmatpush.msk.msrb.mxu0 %vm448_vm0, %v561_v47  ;;  %5460 = vmatpush.msk.msrb.mxu1 %vm448_vm0, %v562_v48  ;;  %v563_v49 = vld.sshfl [vmem:[#allocation1 + $0x30] sm:$0xff pattern:$0x73625140]  ;;  %v564_v50 = vld.sshfl [vmem:[#allocation1 + $0x38] sm:$0xff pattern:$0x73625140] }
  0x81   : > { %v506_v32 = vadd.f32 %v505_v27, %v504_v29  ;;  %5462 = vmatpush.msk.msrb.mxu2 %vm448_vm0, %v563_v49  ;;  %5464 = vmatpush.msk.msrb.mxu3 %vm448_vm0, %v564_v50  ;;  %v7953_v17 = vld [vmem:[%s8759_s17 + $0x59c] sm:$0xf0] }
  0x82   : > { %v6428_v18 = vld [vmem:[%s8759_s17 + $0x780] sm:$0xf]  ;;  %v6173_v26 = vor.u32 %v7953_v17, %v6172_v16 }
  0x83   : > { %v508_v34 = vadd.f32 %v507_v30, %v506_v32  ;;  %v8017_v19 = vld [vmem:[%s8759_s17 + $0x79c] sm:$0xf0] }
  0x84   : > { %v5628_v22 = vld [vmem:[%s8759_s17 + $0x140] sm:$0xf]  ;;  %v6429_v27 = vor.u32 %v8017_v19, %v6428_v18 }
  0x85   : > { %v510_v36 = vadd.f32 %v509_v33, %v508_v34  ;;  %v7817_v23 = vld [vmem:[%s8759_s17 + $0x15c] sm:$0xf0] }
  0x86   : > { %v5884_v24 = vld [vmem:[%s8759_s17 + $0x340] sm:$0xf]  ;;  %v5629_v32 = vor.u32 %v7817_v23, %v5628_v22 }
  0x87   : > { %v512_v37 = vadd.f32 %v511_v35, %v510_v36  ;;  %v7881_v25 = vld [vmem:[%s8759_s17 + $0x35c] sm:$0xf0] }
  0x88   : > { %v6140_v28 = vld [vmem:[%s8759_s17 + $0x540] sm:$0xf]  ;;  %v5885_v33 = vor.u32 %v7881_v25, %v5884_v24 }
  0x89   : > { %513 = vadd.xlane.f32.xlu0 %v512_v37  ;;  %v7945_v29 = vld [vmem:[%s8759_s17 + $0x55c] sm:$0xf0] }
  0x8a   : > { %v6396_v30 = vld [vmem:[%s8759_s17 + $0x740] sm:$0xf]  ;;  %v6141_v38 = vor.u32 %v7945_v29, %v6140_v28 }
  0x8b   : > { %v8009_v31 = vld [vmem:[%s8759_s17 + $0x75c] sm:$0xf0] }
  0x8c   : > { %v5596_v34 = vld [vmem:[%s8759_s17 + $0x100] sm:$0xf]  ;;  %v6397_v39 = vor.u32 %v8009_v31, %v6396_v30 }
  0x8d   : > { %v7809_v35 = vld [vmem:[%s8759_s17 + $0x11c] sm:$0xf0] }
  0x8e   : > { %v5852_v36 = vld [vmem:[%s8759_s17 + $0x300] sm:$0xf]  ;;  %v5597_v44 = vor.u32 %v7809_v35, %v5596_v34 }
  0x8f   : > { %v7873_v37 = vld [vmem:[%s8759_s17 + $0x31c] sm:$0xf0] }
  0x90   : > { %v6108_v40 = vld [vmem:[%s8759_s17 + $0x500] sm:$0xf]  ;;  %v5853_v45 = vor.u32 %v7873_v37, %v5852_v36 }
  0x91   : > { %v7937_v41 = vld [vmem:[%s8759_s17 + $0x51c] sm:$0xf0] }
  0x92   : > { %v6364_v42 = vld [vmem:[%s8759_s17 + $0x700] sm:$0xf]  ;;  %v6109_v50 = vor.u32 %v7937_v41, %v6108_v40 }
  0x93   : > { %v8001_v43 = vld [vmem:[%s8759_s17 + $0x71c] sm:$0xf0] }
  0x94   : > { %v5564_v46 = vld [vmem:[%s8759_s17 + $0xc0] sm:$0xf]  ;;  %v6365_v51 = vor.u32 %v8001_v43, %v6364_v42 }
  0x95   : > { %v7801_v47 = vld [vmem:[%s8759_s17 + $0xdc] sm:$0xf0] }
  0x96   : > { %v5820_v48 = vld [vmem:[%s8759_s17 + $0x2c0] sm:$0xf] }
  0x97   : > { %v7865_v49 = vld [vmem:[%s8759_s17 + $0x2dc] sm:$0xf0] }
  0x98   : > { %v6076_v52 = vld [vmem:[%s8759_s17 + $0x4c0] sm:$0xf] }
  0x99   : > { %v6332_v54 = vld [vmem:[%s8759_s17 + $0x6c0] sm:$0xf] }
  0x9a   : > { %v7993_v55 = vld [vmem:[%s8759_s17 + $0x6dc] sm:$0xf0] }
  0x9b   : > { %v5788_v60 = vld [vmem:[%s8759_s17 + $0x280] sm:$0xf]  ;;  %v6333_v63 = vor.u32 %v7993_v55, %v6332_v54 }
  0x9c   : > { %v7857_v61 = vld [vmem:[%s8759_s17 + $0x29c] sm:$0xf0] }
  0x9d   : > { %v6044_v0 = vld [vmem:[%s8759_s17 + $0x480] sm:$0xf] }
  0x9e   : > { %v7921_v1 = vld [vmem:[%s8759_s17 + $0x49c] sm:$0xf0] }
  0x9f   : > { %v6300_v2 = vld [vmem:[%s8759_s17 + $0x680] sm:$0xf]  ;;  %v6045_v10 = vor.u32 %v7921_v1, %v6044_v0 }
  0xa0   : > { %v7985_v3 = vld [vmem:[%s8759_s17 + $0x69c] sm:$0xf0] }
  0xa1   : > { %v7849_v9 = vld [vmem:[%s8759_s17 + $0x25c] sm:$0xf0] }
  0xa2   : > { %v6012_v12 = vld [vmem:[%s8759_s17 + $0x440] sm:$0xf] }
  0xa3   : > { %v7913_v13 = vld [vmem:[%s8759_s17 + $0x45c] sm:$0xf0] }
  0xa4   : > { %v5468_v16 = vld [vmem:[%s8759_s17] sm:$0xf]  ;;  %v6013_v25 = vor.u32 %v7913_v13, %v6012_v12 }
  0xa5   : > { %v7777_v19 = vld [vmem:[%s8759_s17 + $0x1c] sm:$0xf0] }
  0xa6   : > { %v6716_v22 = vld [vmem:[%s8759_s17 + $0x9c0] sm:$0xf] }
  0xa7   : > { %v8089_v23 = vld [vmem:[%s8759_s17 + $0x9dc] sm:$0xf0] }
  0xa8   : > { %v6972_v24 = vld [vmem:[%s8759_s17 + $0xbc0] sm:$0xf] }
  0xa9   : > { %v5980_v28 = vld [vmem:[%s8759_s17 + $0x400] sm:$0xf] }
  0xaa   : > { %v7905_v29 = vld [vmem:[%s8759_s17 + $0x41c] sm:$0xf0] }
  0xab   : > { %v6236_v30 = vld [vmem:[%s8759_s17 + $0x600] sm:$0xf] }
  0xac   : > { %v7969_v31 = vld [vmem:[%s8759_s17 + $0x61c] sm:$0xf0] }
  0xad   : > { %v8217_v35 = vld [vmem:[%s8759_s17 + $0xddc] sm:$0xf0] }
  0xae   : > { %v7484_v36 = vld [vmem:[%s8759_s17 + $0xfc0] sm:$0xf] }
  0xaf   : > { %v8281_v37 = vld [vmem:[%s8759_s17 + $0xfdc] sm:$0xf0] }
  0xb0   : > { %v6684_v40 = vld [vmem:[%s8759_s17 + $0x980] sm:$0xf] }
  0xb1   : > { %v8081_v41 = vld [vmem:[%s8759_s17 + $0x99c] sm:$0xf0] }
  0xb2   : > { %v6940_v42 = vld [vmem:[%s8759_s17 + $0xb80] sm:$0xf] }
  0xb3   : > { %v8145_v43 = vld [vmem:[%s8759_s17 + $0xb9c] sm:$0xf0] }
  0xb4   : > { %v6652_v54 = vld [vmem:[%s8759_s17 + $0x940] sm:$0xf] }
  0xb5   : > { %v8073_v55 = vld [vmem:[%s8759_s17 + $0x95c] sm:$0xf0] }
  0xb6   : > { %v6653_v0 = vor.u32 %v8073_v55, %v6652_v54  ;;  %v7292_v55 = vld [vmem:[%s8759_s17 + $0xe40] sm:$0xf] }
  0xe6   : > { %v481_v53 = vpop.xlane.xlu0 %480 }
  0xe7   : > { %v522_v58 = vmul.f32 %v521_v56, %v481_v53  ;;  %v7929_v53 = vld [vmem:[%s8759_s17 + $0x4dc] sm:$0xf0] }
  0xe9   : > { %v548_v5 = vperm.slane %v522_v58, %v547_v57  ;;  %v5532_v58 = vld [vmem:[%s8759_s17 + $0x80] sm:$0xf] }
  0xfc   : > { %v514_v59 = vpop.xlane.xlu0 %513 }
  0xfd   : > { %v523_v62 = vmul.f32 %v521_v56, %v514_v59  ;;  %v5565_v56 = vor.u32 %v7801_v47, %v5564_v46  ;;  %v7793_v59 = vld [vmem:[%s8759_s17 + $0x9c] sm:$0xf0]  ;;  %v7485_v47 = vor.u32 %v8281_v37, %v7484_v36 }
  0xfe   : > { %v5533_v4 = vor.u32 %v7793_v59, %v5532_v58  ;;  %v6780_v37 = vld [vmem:[%s8759_s17 + $0xa40] sm:$0xf] }
  0xff   : > { %v549_v6 = vperm.slane %v523_v62, %v547_v57  ;;  %v5821_v57 = vor.u32 %v7865_v49, %v5820_v48  ;;  %v6077_v62 = vor.u32 %v7929_v53, %v6076_v52  ;;  %v7196_v48 = vld [vmem:[%s8759_s17 + $0xd80] sm:$0xf]  ;;  %v6685_v52 = vor.u32 %v8081_v41, %v6684_v40 }
 0x100   : > { %v8209_v49 = vld [vmem:[%s8759_s17 + $0xd9c] sm:$0xf0]  ;;  %v6941_v53 = vor.u32 %v8145_v43, %v6940_v42 }
 0x101   : > { %v551_v11 = vsel %vm550_vm2, %v549_v6, %v548_v5  ;;  %v5789_v5 = vor.u32 %v7857_v61, %v5788_v60  ;;  %v5500_v6 = vld [vmem:[%s8759_s17 + $0x40] sm:$0xf]  ;;  %v7197_v58 = vor.u32 %v8209_v49, %v7196_v48 }
 0x102   : > { %5451 = vmatmul.msk.f32.vlgmr.msra.gmra.mxu0 %vm565_vm3, %v551_v11  ;;  %5453 = vmatmul.msk.f32.vlgmr.msra.gmra.mxu1 %vm565_vm3, %v551_v11  ;;  %v7164_v60 = vld [vmem:[%s8759_s17 + $0xd40] sm:$0xf] }
 0x103   : > { %5455 = vmatmul.msk.f32.vlgmr.msra.gmra.mxu2 %vm565_vm3, %v551_v11  ;;  %5457 = vmatmul.msk.f32.vlgmr.msra.gmra.mxu3 %vm565_vm3, %v551_v11  ;;  %v8201_v61 = vld [vmem:[%s8759_s17 + $0xd5c] sm:$0xf0] }
 0x104   : > { %3850 = vmatpush.bf16.msra.mxu0 %v5693_v7  ;;  %3863 = vmatpush.bf16.msra.mxu1 %v5949_v8  ;;  %v7785_v7 = vld [vmem:[%s8759_s17 + $0x5c] sm:$0xf0] }
 0x105   : > { %3876 = vmatpush.bf16.msra.mxu2 %v6205_v14  ;;  %3889 = vmatpush.bf16.msra.mxu3 %v6461_v15  ;;  %v5756_v8 = vld [vmem:[%s8759_s17 + $0x240] sm:$0xf]  ;;  %v5501_v17 = vor.u32 %v7785_v7, %v5500_v6  ;;  %v7165_v6 = vor.u32 %v8201_v61, %v7164_v60 }
 0x106   : > { %v6268_v14 = vld [vmem:[%s8759_s17 + $0x640] sm:$0xf]  ;;  %v5757_v18 = vor.u32 %v7849_v9, %v5756_v8 }
 0x107   : > { %v7977_v15 = vld [vmem:[%s8759_s17 + $0x65c] sm:$0xf0] }
 0x108   : > { %3851 = vmatpush.bf16.msra.mxu0 %v5661_v20  ;;  %3864 = vmatpush.bf16.msra.mxu1 %v5917_v21  ;;  %v5724_v20 = vld [vmem:[%s8759_s17 + $0x200] sm:$0xf] }
 0x109   : > { %3877 = vmatpush.bf16.msra.mxu2 %v6173_v26  ;;  %3890 = vmatpush.bf16.msra.mxu3 %v6429_v27  ;;  %v7841_v21 = vld [vmem:[%s8759_s17 + $0x21c] sm:$0xf0]  ;;  %v6269_v26 = vor.u32 %v7977_v15, %v6268_v14 }
 0x10a   : > { %5459 = vmatmul.msk.f32.vlgmr.msrb.gmra.mxu0 %vm565_vm3, %v551_v11  ;;  %5461 = vmatmul.msk.f32.vlgmr.msrb.gmra.mxu1 %vm565_vm3, %v551_v11  ;;  %v8153_v27 = vld [vmem:[%s8759_s17 + $0xbdc] sm:$0xf0]  ;;  %v5725_v34 = vor.u32 %v7841_v21, %v5724_v20 }
 0x10b   : > { %5463 = vmatmul.msk.f32.vlgmr.msrb.gmra.mxu2 %vm565_vm3, %v551_v11  ;;  %5465 = vmatmul.msk.f32.vlgmr.msrb.gmra.mxu3 %vm565_vm3, %v551_v11  ;;  %v6301_v11 = vor.u32 %v7985_v3, %v6300_v2  ;;  %v6620_v2 = vld [vmem:[%s8759_s17 + $0x900] sm:$0xf] }
 0x10c   : > { %3852 = vmatpush.bf16.msra.mxu0 %v5629_v32  ;;  %3865 = vmatpush.bf16.msra.mxu1 %v5885_v33  ;;  %v7228_v32 = vld [vmem:[%s8759_s17 + $0xdc0] sm:$0xf]  ;;  %v5469_v33 = vor.u32 %v7777_v19, %v5468_v16 }
 0x10d   : > { %3878 = vmatpush.bf16.msra.mxu2 %v6141_v38  ;;  %3891 = vmatpush.bf16.msra.mxu3 %v6397_v39  ;;  %v6717_v38 = vor.u32 %v8089_v23, %v6716_v22  ;;  %v6973_v39 = vor.u32 %v8153_v27, %v6972_v24  ;;  %v7229_v46 = vor.u32 %v8217_v35, %v7228_v32  ;;  %v8065_v3 = vld [vmem:[%s8759_s17 + $0x91c] sm:$0xf0] }
 0x10e   : > { %v7132_v8 = vld [vmem:[%s8759_s17 + $0xd00] sm:$0xf]  ;;  %v6621_v12 = vor.u32 %v8065_v3, %v6620_v2 }
 0x10f   : > { %v8193_v9 = vld [vmem:[%s8759_s17 + $0xd1c] sm:$0xf0] }
 0x110   : > { %3853 = vmatpush.bf16.msra.mxu0 %v5597_v44  ;;  %3866 = vmatpush.bf16.msra.mxu1 %v5853_v45  ;;  %v5981_v44 = vor.u32 %v7905_v29, %v5980_v28  ;;  %v6237_v45 = vor.u32 %v7969_v31, %v6236_v30  ;;  %v6588_v14 = vld [vmem:[%s8759_s17 + $0x8c0] sm:$0xf] }
 0x111   : > { %3879 = vmatpush.bf16.msra.mxu2 %v6109_v50  ;;  %3892 = vmatpush.bf16.msra.mxu3 %v6365_v51  ;;  %v7452_v50 = vld [vmem:[%s8759_s17 + $0xf80] sm:$0xf] }
 0x112   : > { %v8273_v51 = vld [vmem:[%s8759_s17 + $0xf9c] sm:$0xf0] }
 0x113   : > { %v7453_v59 = vor.u32 %v8273_v51, %v7452_v50  ;;  %v8057_v15 = vld [vmem:[%s8759_s17 + $0x8dc] sm:$0xf0] }
 0x114   : > { %3854 = vmatpush.bf16.msra.mxu0 %v5565_v56  ;;  %3867 = vmatpush.bf16.msra.mxu1 %v5821_v57  ;;  %v6908_v56 = vld [vmem:[%s8759_s17 + $0xb40] sm:$0xf]  ;;  %v6589_v20 = vor.u32 %v8057_v15, %v6588_v14 }
 0x115   : > { %3880 = vmatpush.bf16.msra.mxu2 %v6077_v62  ;;  %3893 = vmatpush.bf16.msra.mxu3 %v6333_v63  ;;  %v8137_v57 = vld [vmem:[%s8759_s17 + $0xb5c] sm:$0xf0] }
 0x116   : > { %v7420_v62 = vld [vmem:[%s8759_s17 + $0xf40] sm:$0xf]  ;;  %v6909_v1 = vor.u32 %v8137_v57, %v6908_v56 }
 0x117   : > { %v8265_v63 = vld [vmem:[%s8759_s17 + $0xf5c] sm:$0xf0] }
 0x118   : > { %3855 = vmatpush.bf16.msra.mxu0 %v5533_v4  ;;  %3868 = vmatpush.bf16.msra.mxu1 %v5789_v5  ;;  %v6876_v4 = vld [vmem:[%s8759_s17 + $0xb00] sm:$0xf]  ;;  %v7421_v7 = vor.u32 %v8265_v63, %v7420_v62 }
 0x119   : > { %3881 = vmatpush.bf16.msra.mxu2 %v6045_v10  ;;  %3894 = vmatpush.bf16.msra.mxu3 %v6301_v11  ;;  %v8129_v5 = vld [vmem:[%s8759_s17 + $0xb1c] sm:$0xf0] }
 0x11a   : > { %v7388_v10 = vld [vmem:[%s8759_s17 + $0xf00] sm:$0xf]  ;;  %v6877_v13 = vor.u32 %v8129_v5, %v6876_v4  ;;  %v7829_v5 = vld [vmem:[%s8759_s17 + $0x1c4] sm:$0xf] }
 0x11b   : > { %v8257_v11 = vld [vmem:[%s8759_s17 + $0xf1c] sm:$0xf0] }
 0x11c   : > { %3856 = vmatpush.bf16.msra.mxu0 %v5501_v17  ;;  %3869 = vmatpush.bf16.msra.mxu1 %v5757_v18  ;;  %v6844_v16 = vld [vmem:[%s8759_s17 + $0xac0] sm:$0xf]  ;;  %v7133_v18 = vor.u32 %v8193_v9, %v7132_v8  ;;  %v7389_v19 = vor.u32 %v8257_v11, %v7388_v10  ;;  %v5694_v8 = vld [vmem:[%s8759_s17 + $0x1e0] sm:$0xf0] }
 0x11d   : > { %3882 = vmatpush.bf16.msra.mxu2 %v6013_v25  ;;  %3895 = vmatpush.bf16.msra.mxu3 %v6269_v26  ;;  %v8121_v17 = vld [vmem:[%s8759_s17 + $0xadc] sm:$0xf0]  ;;  %v7893_v9 = vld [vmem:[%s8759_s17 + $0x3c4] sm:$0xf]  ;;  %v5697_v15 = vor.u32 %v7829_v5, %v5694_v8 }
 0x11e   : > { %v6845_v21 = vor.u32 %v8121_v17, %v6844_v16  ;;  %v6556_v22 = vld [vmem:[%s8759_s17 + $0x880] sm:$0xf]  ;;  %v5950_v10 = vld [vmem:[%s8759_s17 + $0x3e0] sm:$0xf0] }
 0x11f   : > { %v8049_v23 = vld [vmem:[%s8759_s17 + $0x89c] sm:$0xf0]  ;;  %v5953_v16 = vor.u32 %v7893_v9, %v5950_v10  ;;  %v7821_v17 = vld [vmem:[%s8759_s17 + $0x184] sm:$0xf] }
 0x120   : > { %3857 = vmatpush.bf16.msra.mxu0 %v5469_v33  ;;  %3870 = vmatpush.bf16.msra.mxu1 %v5725_v34  ;;  %v6812_v24 = vld [vmem:[%s8759_s17 + $0xa80] sm:$0xf]  ;;  %v6557_v26 = vor.u32 %v8049_v23, %v6556_v22  ;;  %v5918_v22 = vld [vmem:[%s8759_s17 + $0x3a0] sm:$0xf0] }
 0x121   : > { %3883 = vmatpush.bf16.msra.mxu2 %v5981_v44  ;;  %3896 = vmatpush.bf16.msra.mxu3 %v6237_v45  ;;  %v8113_v25 = vld [vmem:[%s8759_s17 + $0xa9c] sm:$0xf0]  ;;  %v6398_v5 = vld [vmem:[%s8759_s17 + $0x760] sm:$0xf0] }
 0x122   : > { %v6813_v27 = vor.u32 %v8113_v25, %v6812_v24  ;;  %v7100_v28 = vld [vmem:[%s8759_s17 + $0xcc0] sm:$0xf]  ;;  %v7797_v8 = vld [vmem:[%s8759_s17 + $0xc4] sm:$0xf] }
 0x123   : > { %v8185_v29 = vld [vmem:[%s8759_s17 + $0xcdc] sm:$0xf0]  ;;  %v5566_v9 = vld [vmem:[%s8759_s17 + $0xe0] sm:$0xf0] }
 0x124   : > { %3902 = vmatpush.bf16.msrb.mxu0 %v6717_v38  ;;  %3915 = vmatpush.bf16.msrb.mxu1 %v6973_v39  ;;  %v7356_v30 = vld [vmem:[%s8759_s17 + $0xec0] sm:$0xf]  ;;  %v7101_v31 = vor.u32 %v8185_v29, %v7100_v28  ;;  %v8021_v28 = vld [vmem:[%s8759_s17 + $0x7c4] sm:$0xf] }
 0x125   : > { %3928 = vmatpush.bf16.msrb.mxu2 %v7229_v46  ;;  %3941 = vmatpush.bf16.msrb.mxu3 %v7485_v47  ;;  %v8249_v32 = vld [vmem:[%s8759_s17 + $0xedc] sm:$0xf0] }
 0x126   : > { %v7357_v33 = vor.u32 %v8249_v32, %v7356_v30  ;;  %v6524_v34 = vld [vmem:[%s8759_s17 + $0x840] sm:$0xf]  ;;  %v6462_v32 = vld [vmem:[%s8759_s17 + $0x7e0] sm:$0xf0] }
 0x127   : > { %v8041_v35 = vld [vmem:[%s8759_s17 + $0x85c] sm:$0xf0] }
 0x128   : > { %3903 = vmatpush.bf16.msrb.mxu0 %v6685_v52  ;;  %3916 = vmatpush.bf16.msrb.mxu1 %v6941_v53  ;;  %v6525_v36 = vor.u32 %v8041_v35, %v6524_v34  ;;  %v8105_v38 = vld [vmem:[%s8759_s17 + $0xa5c] sm:$0xf0]  ;;  %v5630_v34 = vld [vmem:[%s8759_s17 + $0x160] sm:$0xf0] }
 0x129   : > { %3929 = vmatpush.bf16.msrb.mxu2 %v7197_v58  ;;  %3942 = vmatpush.bf16.msrb.mxu3 %v7453_v59  ;;  %v6781_v39 = vor.u32 %v8105_v38, %v6780_v37  ;;  %v7068_v40 = vld [vmem:[%s8759_s17 + $0xc80] sm:$0xf]  ;;  %v7877_v35 = vld [vmem:[%s8759_s17 + $0x344] sm:$0xf] }
 0x12a   : > { %v8177_v41 = vld [vmem:[%s8759_s17 + $0xc9c] sm:$0xf0] }
 0x12b   : > { %v7324_v42 = vld [vmem:[%s8759_s17 + $0xe80] sm:$0xf]  ;;  %v7069_v43 = vor.u32 %v8177_v41, %v7068_v40 }
 0x12c   : > { %3904 = vmatpush.bf16.msrb.mxu0 %v6653_v0  ;;  %3917 = vmatpush.bf16.msrb.mxu1 %v6909_v1  ;;  %v8241_v44 = vld [vmem:[%s8759_s17 + $0xe9c] sm:$0xf0]  ;;  %v8966_v0 = vld [vmem:[#allocation4] sm:$0xff] }
 0x12d   : > { %3930 = vmatpush.bf16.msrb.mxu2 %v7165_v6  ;;  %3943 = vmatpush.bf16.msrb.mxu3 %v7421_v7  ;;  %v7325_v45 = vor.u32 %v8241_v44, %v7324_v42  ;;  %v6492_v46 = vld [vmem:[%s8759_s17 + $0x800] sm:$0xf]  ;;  %v528_v1 = vperm.slane %v8966_v0, 0  ;;  %v529_v2 = vperm.slane %v8966_v0, 1  ;;  %v531_v14 = vperm.slane %v8966_v0, 3 }
 0x12e   : > { %v8033_v47 = vld [vmem:[%s8759_s17 + $0x81c] sm:$0xf0]  ;;  %v533_v40 = vperm.slane %v8966_v0, 5  ;;  %v6465_v44 = vor.u32 %v8021_v28, %v6462_v32  ;;  %v5534_v28 = vld [vmem:[%s8759_s17 + $0xa0] sm:$0xf0] }
 0x12f   : > { %v6748_v48 = vld [vmem:[%s8759_s17 + $0xa00] sm:$0xf]  ;;  %v6493_v49 = vor.u32 %v8033_v47, %v6492_v46  ;;  %v7949_v46 = vld [vmem:[%s8759_s17 + $0x584] sm:$0xf] }
 0x130   : > { %3905 = vmatpush.bf16.msrb.mxu0 %v6621_v12  ;;  %3918 = vmatpush.bf16.msrb.mxu1 %v6877_v13  ;;  %v8097_v50 = vld [vmem:[%s8759_s17 + $0xa1c] sm:$0xf0]  ;;  %v530_v13 = vperm.slane %v8966_v0, 2  ;;  %v6174_v47 = vld [vmem:[%s8759_s17 + $0x5a0] sm:$0xf0] }
 0x131   : > { %3931 = vmatpush.bf16.msrb.mxu2 %v7133_v18  ;;  %3944 = vmatpush.bf16.msrb.mxu3 %v7389_v19  ;;  %v6749_v51 = vor.u32 %v8097_v50, %v6748_v48  ;;  %v7036_v52 = vld [vmem:[%s8759_s17 + $0xc40] sm:$0xf]  ;;  %v5662_v18 = vld [vmem:[%s8759_s17 + $0x1a0] sm:$0xf0] }
 0x132   : > { %v8169_v53 = vld [vmem:[%s8759_s17 + $0xc5c] sm:$0xf0]  ;;  %v5665_v25 = vor.u32 %v7821_v17, %v5662_v18  ;;  %v6110_v18 = vld [vmem:[%s8759_s17 + $0x520] sm:$0xf0] }
 0x133   : > { %v7037_v54 = vor.u32 %v8169_v53, %v7036_v52  ;;  %v8233_v56 = vld [vmem:[%s8759_s17 + $0xe5c] sm:$0xf0]  ;;  %v6430_v52 = vld [vmem:[%s8759_s17 + $0x7a0] sm:$0xf0] }
 0x134   : > { %3906 = vmatpush.bf16.msrb.mxu0 %v6589_v20  ;;  %3919 = vmatpush.bf16.msrb.mxu1 %v6845_v21  ;;  %v7293_v57 = vor.u32 %v8233_v56, %v7292_v55  ;;  %v7004_v58 = vld [vmem:[%s8759_s17 + $0xc00] sm:$0xf]  ;;  %v7885_v21 = vld [vmem:[%s8759_s17 + $0x384] sm:$0xf] }
 0x135   : > { %3932 = vmatpush.bf16.msrb.mxu2 %v7101_v31  ;;  %3945 = vmatpush.bf16.msrb.mxu3 %v7357_v33  ;;  %v8161_v59 = vld [vmem:[%s8759_s17 + $0xc1c] sm:$0xf0]  ;;  %v5921_v31 = vor.u32 %v7885_v21, %v5918_v22  ;;  %v7813_v33 = vld [vmem:[%s8759_s17 + $0x144] sm:$0xf] }
 0x136   : > { %v7005_v60 = vor.u32 %v8161_v59, %v7004_v58  ;;  %v7260_v61 = vld [vmem:[%s8759_s17 + $0xe00] sm:$0xf]  ;;  %v7805_v53 = vld [vmem:[%s8759_s17 + $0x104] sm:$0xf]  ;;  %v534_v59 = vperm.slane %v8966_v0, 6 }
 0x137   : > { %v8225_v62 = vld [vmem:[%s8759_s17 + $0xe1c] sm:$0xf0]  ;;  %v7869_v55 = vld [vmem:[%s8759_s17 + $0x304] sm:$0xf] }
 0x138   : > { %3907 = vmatpush.bf16.msrb.mxu0 %v6557_v26  ;;  %3920 = vmatpush.bf16.msrb.mxu1 %v6813_v27  ;;  %v7261_v63 = vor.u32 %v8225_v62, %v7260_v61  ;;  %v7957_v26 = vld [vmem:[%s8759_s17 + $0x5c4] sm:$0xf]  ;;  %v6177_v61 = vor.u32 %v7949_v46, %v6174_v47 }
 0x139   : > { %3933 = vmatpush.bf16.msrb.mxu2 %v7069_v43  ;;  %3946 = vmatpush.bf16.msrb.mxu3 %v7325_v45  ;;  %v6206_v27 = vld [vmem:[%s8759_s17 + $0x5e0] sm:$0xf0]  ;;  %v5633_v45 = vor.u32 %v7813_v33, %v5630_v34 }
 0x13a   : > { %v6209_v43 = vor.u32 %v7957_v26, %v6206_v27  ;;  %v5854_v56 = vld [vmem:[%s8759_s17 + $0x320] sm:$0xf0] }
 0x13b   : > { %v7997_v21 = vld [vmem:[%s8759_s17 + $0x704] sm:$0xf] }
 0x13c   : > { %3908 = vmatpush.bf16.msrb.mxu0 %v6525_v36  ;;  %3921 = vmatpush.bf16.msrb.mxu1 %v6781_v39  ;;  %v5886_v36 = vld [vmem:[%s8759_s17 + $0x360] sm:$0xf0]  ;;  %v532_v39 = vperm.slane %v8966_v0, 4 }
 0x13d   : > { %3934 = vmatpush.bf16.msrb.mxu2 %v7037_v54  ;;  %3947 = vmatpush.bf16.msrb.mxu3 %v7293_v57  ;;  %v5889_v50 = vor.u32 %v7877_v35, %v5886_v36  ;;  %v5598_v54 = vld [vmem:[%s8759_s17 + $0x120] sm:$0xf0] }
 0x13e   : > { %v6366_v22 = vld [vmem:[%s8759_s17 + $0x720] sm:$0xf0] }
 0x13f   : > { %v6369_v32 = vor.u32 %v7997_v21, %v6366_v22  ;;  %v7925_v33 = vld [vmem:[%s8759_s17 + $0x4c4] sm:$0xf] }
 0x140   : > { %3909 = vmatpush.bf16.msrb.mxu0 %v6493_v49  ;;  %3922 = vmatpush.bf16.msrb.mxu1 %v6749_v51  ;;  %v8013_v51 = vld [vmem:[%s8759_s17 + $0x784] sm:$0xf] }
 0x141   : > { %3935 = vmatpush.bf16.msrb.mxu2 %v7005_v60  ;;  %3948 = vmatpush.bf16.msrb.mxu3 %v7261_v63  ;;  %v535_v60 = vperm.slane %v8966_v0, 7  ;;  %v6433_v62 = vor.u32 %v8013_v51, %v6430_v52  ;;  %v7941_v63 = vld [vmem:[%s8759_s17 + $0x544] sm:$0xf] }
 0x142   : > { %v6078_v34 = vld [vmem:[%s8759_s17 + $0x4e0] sm:$0xf0] }
 0x143   : > { %v7917_v47 = vld [vmem:[%s8759_s17 + $0x484] sm:$0xf] }
 0x144   : > { %v6046_v52 = vld [vmem:[%s8759_s17 + $0x4a0] sm:$0xf0] }
 0x145   : > { %v7965_v21 = vld [vmem:[%s8759_s17 + $0x604] sm:$0xf] }
 0x146   : > { %v6238_v22 = vld [vmem:[%s8759_s17 + $0x620] sm:$0xf0] }
 0x17f   : > { %v601_v3 = vpop.f32.mrf.mxu0  ;;  %v621_v4 = vpop.f32.mrf.mxu1 }
 0x180   : > { %v602_v6 = vadd.f32 %v601_v3, %v528_v1  ;;  %v622_v7 = vadd.f32 %v621_v4, %v529_v2  ;;  %v5601_v1 = vor.u32 %v7805_v53, %v5598_v54  ;;  %v5857_v2 = vor.u32 %v7869_v55, %v5854_v56  ;;  %v6142_v3 = vld [vmem:[%s8759_s17 + $0x560] sm:$0xf0] }
 0x181   : > { %v8005_v4 = vld [vmem:[%s8759_s17 + $0x744] sm:$0xf] }
 0x182   : > { %v744_v11 = vmax.f32 %v602_v6, 0.0  ;;  %v745_v12 = vmax.f32 %v622_v7, 0.0  ;;  %v7981_v53 = vld [vmem:[%s8759_s17 + $0x684] sm:$0xf] }
 0x183   : > { %v6302_v54 = vld [vmem:[%s8759_s17 + $0x6a0] sm:$0xf0] }
 0x184   : > { %v8978_v19 = vpack.c.bf16 %v744_v11, %v744_v11  ;;  %v8980_v20 = vpack.c.bf16 %v745_v12, %v745_v12  ;;  %v7861_v11 = vld [vmem:[%s8759_s17 + $0x2c4] sm:$0xf] }
 0x185   : > { %v5822_v12 = vld [vmem:[%s8759_s17 + $0x2e0] sm:$0xf0] }
 0x186   : > { %v641_v23 = vpop.f32.mrf.mxu2  ;;  %v661_v24 = vpop.f32.mrf.mxu3  ;;  %3858 = vmatmul.bf16.vlgmr.msra.gmra.mxu0 %v8978_v19  ;;  %3871 = vmatmul.bf16.vlgmr.msra.gmra.mxu1 %v8980_v20 }
 0x187   : > { %v642_v29 = vadd.f32 %v641_v23, %v530_v13  ;;  %v662_v30 = vadd.f32 %v661_v24, %v531_v14  ;;  %3954 = vmatpush.bf16.msra.mxu0 %v5697_v15  ;;  %3967 = vmatpush.bf16.msra.mxu1 %v5953_v16  ;;  %v681_v41 = vpop.f32.mrf.mxu0  ;;  %v701_v42 = vpop.f32.mrf.mxu1  ;;  %v6145_v13 = vor.u32 %v7941_v63, %v6142_v3  ;;  %v7933_v15 = vld [vmem:[%s8759_s17 + $0x504] sm:$0xf] }
 0x188   : > { %v682_v57 = vadd.f32 %v681_v41, %v532_v39  ;;  %v702_v58 = vadd.f32 %v701_v42, %v533_v40  ;;  %v6401_v14 = vor.u32 %v8005_v4, %v6398_v5  ;;  %v5569_v23 = vor.u32 %v7797_v8, %v5566_v9  ;;  %v7781_v41 = vld [vmem:[%s8759_s17 + $0x44] sm:$0xf] }
 0x189   : > { %v746_v37 = vmax.f32 %v642_v29, 0.0  ;;  %v747_v38 = vmax.f32 %v662_v30, 0.0  ;;  %v5825_v24 = vor.u32 %v7861_v11, %v5822_v12  ;;  %v7853_v29 = vld [vmem:[%s8759_s17 + $0x284] sm:$0xf]  ;;  %v6049_v63 = vor.u32 %v7917_v47, %v6046_v52 }
 0x18a   : > { %v748_v0 = vmax.f32 %v682_v57, 0.0  ;;  %v749_v10 = vmax.f32 %v702_v58, 0.0  ;;  %v5790_v30 = vld [vmem:[%s8759_s17 + $0x2a0] sm:$0xf0] }
 0x18b   : > { %v8998_v48 = vpack.c.bf16 %v746_v37, %v746_v37  ;;  %v9000_v49 = vpack.c.bf16 %v747_v38, %v747_v38  ;;  %3955 = vmatpush.bf16.msra.mxu0 %v5665_v25  ;;  %3968 = vmatpush.bf16.msra.mxu1 %v5921_v31  ;;  %v7789_v25 = vld [vmem:[%s8759_s17 + $0x84] sm:$0xf]  ;;  %v6113_v31 = vor.u32 %v7933_v15, %v6110_v18 }
 0x18c   : > { %v9025_v26 = vpack.c.bf16 %v748_v0, %v748_v0  ;;  %v9027_v27 = vpack.c.bf16 %v749_v10, %v749_v10  ;;  %v7989_v37 = vld [vmem:[%s8759_s17 + $0x6c4] sm:$0xf]  ;;  %v5537_v39 = vor.u32 %v7789_v25, %v5534_v28  ;;  %v5793_v40 = vor.u32 %v7853_v29, %v5790_v30 }
 0x18d   : > { %3884 = vmatmul.bf16.vlgmr.msra.gmra.mxu2 %v8998_v48  ;;  %3897 = vmatmul.bf16.vlgmr.msra.gmra.mxu3 %v9000_v49  ;;  %v6334_v38 = vld [vmem:[%s8759_s17 + $0x6e0] sm:$0xf0] }
 0x18e   : > { %3980 = vmatpush.bf16.msra.mxu2 %v6209_v43  ;;  %3993 = vmatpush.bf16.msra.mxu3 %v6465_v44  ;;  %v721_v6 = vpop.f32.mrf.mxu2  ;;  %v741_v7 = vpop.f32.mrf.mxu3  ;;  %v5502_v42 = vld [vmem:[%s8759_s17 + $0x60] sm:$0xf0]  ;;  %v6337_v46 = vor.u32 %v7989_v37, %v6334_v38 }
 0x18f   : > { %3956 = vmatpush.bf16.msra.mxu0 %v5633_v45  ;;  %3969 = vmatpush.bf16.msra.mxu1 %v5889_v50  ;;  %v722_v16 = vadd.f32 %v721_v6, %v534_v59  ;;  %v742_v17 = vadd.f32 %v741_v7, %v535_v60  ;;  %v7845_v43 = vld [vmem:[%s8759_s17 + $0x244] sm:$0xf]  ;;  %v6081_v45 = vor.u32 %v7925_v33, %v6078_v34 }
 0x190   : > { %v5758_v44 = vld [vmem:[%s8759_s17 + $0x260] sm:$0xf0]  ;;  %v5505_v55 = vor.u32 %v7781_v41, %v5502_v42  ;;  %v6241_v33 = vor.u32 %v7965_v21, %v6238_v22 }
 0x191   : > { %v750_v35 = vmax.f32 %v722_v16, 0.0  ;;  %v751_v36 = vmax.f32 %v742_v17, 0.0  ;;  %v5761_v56 = vor.u32 %v7845_v43, %v5758_v44  ;;  %v7773_v57 = vld [vmem:[%s8759_s17 + $0x4] sm:$0xf] }
 0x192   : > { %3981 = vmatpush.bf16.msra.mxu2 %v6177_v61  ;;  %3994 = vmatpush.bf16.msra.mxu3 %v6433_v62  ;;  %v5470_v58 = vld [vmem:[%s8759_s17 + $0x20] sm:$0xf0] }
 0x193   : > { %3957 = vmatpush.bf16.msra.mxu0 %v5601_v1  ;;  %3970 = vmatpush.bf16.msra.mxu1 %v5857_v2  ;;  %v9043_v50 = vpack.c.bf16 %v750_v35, %v750_v35  ;;  %v9045_v51 = vpack.c.bf16 %v751_v36, %v751_v36  ;;  %v7837_v59 = vld [vmem:[%s8759_s17 + $0x204] sm:$0xf]  ;;  %v6305_v1 = vor.u32 %v7981_v53, %v6302_v54 }
 0x194   : > { %v5726_v60 = vld [vmem:[%s8759_s17 + $0x220] sm:$0xf0]  ;;  %v5473_v8 = vor.u32 %v7773_v57, %v5470_v58 }
 0x195   : > { %v8085_v61 = vld [vmem:[%s8759_s17 + $0x9c4] sm:$0xf]  ;;  %v5729_v9 = vor.u32 %v7837_v59, %v5726_v60 }
 0x196   : > { %3982 = vmatpush.bf16.msra.mxu2 %v6145_v13  ;;  %3995 = vmatpush.bf16.msra.mxu3 %v6401_v14  ;;  %v6718_v62 = vld [vmem:[%s8759_s17 + $0x9e0] sm:$0xf0] }
 0x197   : > { %3910 = vmatmul.bf16.vlgmr.msrb.gmra.mxu0 %v9025_v26  ;;  %3923 = vmatmul.bf16.vlgmr.msrb.gmra.mxu1 %v9027_v27  ;;  %v8149_v2 = vld [vmem:[%s8759_s17 + $0xbc4] sm:$0xf]  ;;  %v6721_v0 = vor.u32 %v8085_v61, %v6718_v62 }
 0x198   : > { %3958 = vmatpush.bf16.msra.mxu0 %v5569_v23  ;;  %3971 = vmatpush.bf16.msra.mxu1 %v5825_v24  ;;  %v6974_v3 = vld [vmem:[%s8759_s17 + $0xbe0] sm:$0xf0] }
 0x199   : > { %v7909_v4 = vld [vmem:[%s8759_s17 + $0x444] sm:$0xf]  ;;  %v6977_v10 = vor.u32 %v8149_v2, %v6974_v3 }
 0x19a   : > { %3983 = vmatpush.bf16.msra.mxu2 %v6113_v31  ;;  %3996 = vmatpush.bf16.msra.mxu3 %v6369_v32  ;;  %v6014_v5 = vld [vmem:[%s8759_s17 + $0x460] sm:$0xf0] }
 0x19b   : > { %v7973_v6 = vld [vmem:[%s8759_s17 + $0x644] sm:$0xf]  ;;  %v6017_v14 = vor.u32 %v7909_v4, %v6014_v5 }
 0x19c   : > { %3959 = vmatpush.bf16.msra.mxu0 %v5537_v39  ;;  %3972 = vmatpush.bf16.msra.mxu1 %v5793_v40  ;;  %v6270_v7 = vld [vmem:[%s8759_s17 + $0x660] sm:$0xf0] }
 0x19d   : > { %3936 = vmatmul.bf16.vlgmr.msrb.gmra.mxu2 %v9043_v50  ;;  %3949 = vmatmul.bf16.vlgmr.msrb.gmra.mxu3 %v9045_v51  ;;  %v8077_v11 = vld [vmem:[%s8759_s17 + $0x984] sm:$0xf]  ;;  %v6273_v15 = vor.u32 %v7973_v6, %v6270_v7 }
 0x19e   : > { %3984 = vmatpush.bf16.msra.mxu2 %v6081_v45  ;;  %3997 = vmatpush.bf16.msra.mxu3 %v6337_v46  ;;  %v6686_v12 = vld [vmem:[%s8759_s17 + $0x9a0] sm:$0xf0] }
 0x19f   : > { %v8141_v13 = vld [vmem:[%s8759_s17 + $0xb84] sm:$0xf]  ;;  %v6689_v29 = vor.u32 %v8077_v11, %v6686_v12 }
 0x1a0   : > { %3960 = vmatpush.bf16.msra.mxu0 %v5505_v55  ;;  %3973 = vmatpush.bf16.msra.mxu1 %v5761_v56  ;;  %v6942_v16 = vld [vmem:[%s8759_s17 + $0xba0] sm:$0xf0] }
 0x1a1   : > { %v7901_v17 = vld [vmem:[%s8759_s17 + $0x404] sm:$0xf]  ;;  %v6945_v30 = vor.u32 %v8141_v13, %v6942_v16 }
 0x1a2   : > { %3985 = vmatpush.bf16.msra.mxu2 %v6049_v63  ;;  %3998 = vmatpush.bf16.msra.mxu3 %v6305_v1  ;;  %v5982_v18 = vld [vmem:[%s8759_s17 + $0x420] sm:$0xf0] }
 0x1a3   : > { %v8213_v23 = vld [vmem:[%s8759_s17 + $0xdc4] sm:$0xf]  ;;  %v5985_v32 = vor.u32 %v7901_v17, %v5982_v18 }
 0x1a4   : > { %3961 = vmatpush.bf16.msra.mxu0 %v5473_v8  ;;  %3974 = vmatpush.bf16.msra.mxu1 %v5729_v9  ;;  %v7230_v24 = vld [vmem:[%s8759_s17 + $0xde0] sm:$0xf0] }
 0x1a5   : > { %v8277_v25 = vld [vmem:[%s8759_s17 + $0xfc4] sm:$0xf]  ;;  %v7233_v37 = vor.u32 %v8213_v23, %v7230_v24 }
 0x1a6   : > { %v7486_v28 = vld [vmem:[%s8759_s17 + $0xfe0] sm:$0xf0]  ;;  %3986 = vmatpush.bf16.msra.mxu2 %v6017_v14  ;;  %3999 = vmatpush.bf16.msra.mxu3 %v6273_v15 }
 0x1a7   : > { %v8069_v31 = vld [vmem:[%s8759_s17 + $0x944] sm:$0xf]  ;;  %3962 = vmatmul.bf16.vlgmr.msra.gmra.mxu0 %v8978_v19  ;;  %3975 = vmatmul.bf16.vlgmr.msra.gmra.mxu1 %v8980_v20  ;;  %v7489_v38 = vor.u32 %v8277_v25, %v7486_v28 }
 0x1a8   : > { %4006 = vmatpush.bf16.msrb.mxu0 %v6721_v0  ;;  %4019 = vmatpush.bf16.msrb.mxu1 %v6977_v10  ;;  %v6654_v34 = vld [vmem:[%s8759_s17 + $0x960] sm:$0xf0] }
 0x1a9   : > { %v8133_v35 = vld [vmem:[%s8759_s17 + $0xb44] sm:$0xf]  ;;  %v6657_v43 = vor.u32 %v8069_v31, %v6654_v34 }
 0x1aa   : > { %v6910_v36 = vld [vmem:[%s8759_s17 + $0xb60] sm:$0xf0]  ;;  %3987 = vmatpush.bf16.msra.mxu2 %v5985_v32  ;;  %4000 = vmatpush.bf16.msra.mxu3 %v6241_v33 }
 0x1ab   : > { %v8205_v39 = vld [vmem:[%s8759_s17 + $0xd84] sm:$0xf]  ;;  %v6913_v44 = vor.u32 %v8133_v35, %v6910_v36 }
 0x1ac   : > { %v7198_v40 = vld [vmem:[%s8759_s17 + $0xda0] sm:$0xf0]  ;;  %4007 = vmatpush.bf16.msrb.mxu0 %v6689_v29  ;;  %4020 = vmatpush.bf16.msrb.mxu1 %v6945_v30 }
 0x1ad   : > { %v8269_v41 = vld [vmem:[%s8759_s17 + $0xf84] sm:$0xf]  ;;  %v7201_v53 = vor.u32 %v8205_v39, %v7198_v40  ;;  %3988 = vmatmul.bf16.vlgmr.msra.gmra.mxu2 %v8998_v48  ;;  %4001 = vmatmul.bf16.vlgmr.msra.gmra.mxu3 %v9000_v49 }
 0x1ae   : > { %v7454_v42 = vld [vmem:[%s8759_s17 + $0xfa0] sm:$0xf0]  ;;  %4032 = vmatpush.bf16.msrb.mxu2 %v7233_v37  ;;  %4045 = vmatpush.bf16.msrb.mxu3 %v7489_v38 }
 0x1af   : > { %v8061_v45 = vld [vmem:[%s8759_s17 + $0x904] sm:$0xf]  ;;  %v7457_v54 = vor.u32 %v8269_v41, %v7454_v42  ;;  %v5700_v41 = vld [vmem:[%s8759_s17 + $0x1c8] sm:$0xf] }
 0x1b0   : > { %v6622_v46 = vld [vmem:[%s8759_s17 + $0x920] sm:$0xf0]  ;;  %4008 = vmatpush.bf16.msrb.mxu0 %v6657_v43  ;;  %4021 = vmatpush.bf16.msrb.mxu1 %v6913_v44  ;;  %v7834_v42 = vld [vmem:[%s8759_s17 + $0x1e4] sm:$0xf0] }
 0x1b1   : > { %v8125_v47 = vld [vmem:[%s8759_s17 + $0xb04] sm:$0xf]  ;;  %v6625_v59 = vor.u32 %v8061_v45, %v6622_v46  ;;  %v5956_v45 = vld [vmem:[%s8759_s17 + $0x3c8] sm:$0xf] }
 0x1b2   : > { %v6878_v52 = vld [vmem:[%s8759_s17 + $0xb20] sm:$0xf0]  ;;  %4033 = vmatpush.bf16.msrb.mxu2 %v7201_v53  ;;  %4046 = vmatpush.bf16.msrb.mxu3 %v7457_v54  ;;  %v7898_v46 = vld [vmem:[%s8759_s17 + $0x3e4] sm:$0xf0] }
 0x1b3   : > { %v8197_v55 = vld [vmem:[%s8759_s17 + $0xd44] sm:$0xf]  ;;  %v6881_v60 = vor.u32 %v8125_v47, %v6878_v52 }
 0x1b4   : > { %v7166_v56 = vld [vmem:[%s8759_s17 + $0xd60] sm:$0xf0]  ;;  %4009 = vmatpush.bf16.msrb.mxu0 %v6625_v59  ;;  %v5668_v59 = vld [vmem:[%s8759_s17 + $0x188] sm:$0xf] }
 0x1b5   : > { %v8261_v57 = vld [vmem:[%s8759_s17 + $0xf44] sm:$0xf]  ;;  %v7169_v2 = vor.u32 %v8197_v55, %v7166_v56  ;;  %4022 = vmatpush.bf16.msrb.mxu1 %v6881_v60  ;;  %v7826_v60 = vld [vmem:[%s8759_s17 + $0x1a4] sm:$0xf0] }
 0x1b6   : > { %v7422_v58 = vld [vmem:[%s8759_s17 + $0xf60] sm:$0xf0] }
 0x1b7   : > { %v8053_v61 = vld [vmem:[%s8759_s17 + $0x8c4] sm:$0xf]  ;;  %v7425_v3 = vor.u32 %v8261_v57, %v7422_v58  ;;  %4034 = vmatpush.bf16.msrb.mxu2 %v7169_v2  ;;  %v5701_v57 = vor.u32 %v7834_v42, %v5700_v41  ;;  %v5957_v58 = vor.u32 %v7898_v46, %v5956_v45  ;;  %v5572_v41 = vld [vmem:[%s8759_s17 + $0xc8] sm:$0xf] }
 0x1b8   : > { %v6590_v62 = vld [vmem:[%s8759_s17 + $0x8e0] sm:$0xf0]  ;;  %v7802_v42 = vld [vmem:[%s8759_s17 + $0xe4] sm:$0xf0] }
 0x1b9   : > { %v8117_v63 = vld [vmem:[%s8759_s17 + $0xac4] sm:$0xf]  ;;  %v6593_v8 = vor.u32 %v8053_v61, %v6590_v62  ;;  %4047 = vmatpush.bf16.msrb.mxu3 %v7425_v3  ;;  %v5924_v61 = vld [vmem:[%s8759_s17 + $0x388] sm:$0xf] }
 0x1ba   : > { %v6846_v1 = vld [vmem:[%s8759_s17 + $0xae0] sm:$0xf0]  ;;  %v5828_v45 = vld [vmem:[%s8759_s17 + $0x2c8] sm:$0xf] }
 0x1bb   : > { %v8189_v4 = vld [vmem:[%s8759_s17 + $0xd04] sm:$0xf]  ;;  %v6849_v9 = vor.u32 %v8117_v63, %v6846_v1  ;;  %4010 = vmatpush.bf16.msrb.mxu0 %v6593_v8  ;;  %v7890_v1 = vld [vmem:[%s8759_s17 + $0x3a4] sm:$0xf0] }
 0x1bc   : > { %v7134_v5 = vld [vmem:[%s8759_s17 + $0xd20] sm:$0xf0]  ;;  %v6468_v8 = vld [vmem:[%s8759_s17 + $0x7c8] sm:$0xf] }
 0x1bd   : > { %v8253_v6 = vld [vmem:[%s8759_s17 + $0xf04] sm:$0xf]  ;;  %v7137_v13 = vor.u32 %v8189_v4, %v7134_v5  ;;  %4023 = vmatpush.bf16.msrb.mxu1 %v6849_v9  ;;  %v8026_v9 = vld [vmem:[%s8759_s17 + $0x7e4] sm:$0xf0] }
 0x1be   : > { %v7390_v7 = vld [vmem:[%s8759_s17 + $0xf20] sm:$0xf0]  ;;  %v7866_v46 = vld [vmem:[%s8759_s17 + $0x2e4] sm:$0xf0] }
 0x1bf   : > { %v8045_v0 = vld [vmem:[%s8759_s17 + $0x884] sm:$0xf]  ;;  %v7393_v14 = vor.u32 %v8253_v6, %v7390_v7  ;;  %4035 = vmatpush.bf16.msrb.mxu2 %v7137_v13  ;;  %v6212_v6 = vld [vmem:[%s8759_s17 + $0x5c8] sm:$0xf] }
 0x1c0   : > { %v6558_v10 = vld [vmem:[%s8759_s17 + $0x8a0] sm:$0xf0]  ;;  %v7962_v7 = vld [vmem:[%s8759_s17 + $0x5e4] sm:$0xf0] }
 0x1c1   : > { %v8109_v11 = vld [vmem:[%s8759_s17 + $0xa84] sm:$0xf]  ;;  %v6561_v21 = vor.u32 %v8045_v0, %v6558_v10  ;;  %4048 = vmatpush.bf16.msrb.mxu3 %v7393_v14  ;;  %v5669_v0 = vor.u32 %v7826_v60, %v5668_v59  ;;  %v5925_v10 = vor.u32 %v7890_v1, %v5924_v61  ;;  %v5636_v13 = vld [vmem:[%s8759_s17 + $0x148] sm:$0xf] }
 0x1c2   : > { %v6814_v12 = vld [vmem:[%s8759_s17 + $0xaa0] sm:$0xf0]  ;;  %v7818_v14 = vld [vmem:[%s8759_s17 + $0x164] sm:$0xf0] }
 0x1c3   : > { %v8181_v15 = vld [vmem:[%s8759_s17 + $0xcc4] sm:$0xf]  ;;  %v6817_v22 = vor.u32 %v8109_v11, %v6814_v12  ;;  %4011 = vmatpush.bf16.msrb.mxu0 %v6561_v21  ;;  %v6180_v21 = vld [vmem:[%s8759_s17 + $0x588] sm:$0xf] }
 0x1c4   : > { %v7102_v16 = vld [vmem:[%s8759_s17 + $0xce0] sm:$0xf0]  ;;  %v5796_v61 = vld [vmem:[%s8759_s17 + $0x288] sm:$0xf] }
 0x1c5   : > { %v8245_v17 = vld [vmem:[%s8759_s17 + $0xec4] sm:$0xf]  ;;  %v7105_v29 = vor.u32 %v8181_v15, %v7102_v16  ;;  %4024 = vmatpush.bf16.msrb.mxu1 %v6817_v22  ;;  %v6213_v15 = vor.u32 %v7962_v7, %v6212_v6  ;;  %v6469_v16 = vor.u32 %v8026_v9, %v6468_v8  ;;  %v7954_v22 = vld [vmem:[%s8759_s17 + $0x5a4] sm:$0xf0] }
 0x1c6   : > { %v7358_v18 = vld [vmem:[%s8759_s17 + $0xee0] sm:$0xf0]  ;;  %v7930_v1 = vld [vmem:[%s8759_s17 + $0x4e4] sm:$0xf0] }
 0x1c7   : > { %v8037_v23 = vld [vmem:[%s8759_s17 + $0x844] sm:$0xf]  ;;  %v7361_v30 = vor.u32 %v8245_v17, %v7358_v18  ;;  %4036 = vmatpush.bf16.msrb.mxu2 %v7105_v29  ;;  %v5892_v17 = vld [vmem:[%s8759_s17 + $0x348] sm:$0xf] }
 0x1c8   : > { %v6526_v24 = vld [vmem:[%s8759_s17 + $0x860] sm:$0xf0]  ;;  %v7882_v18 = vld [vmem:[%s8759_s17 + $0x364] sm:$0xf0] }
 0x1c9   : > { %v8101_v25 = vld [vmem:[%s8759_s17 + $0xa44] sm:$0xf]  ;;  %v6529_v35 = vor.u32 %v8037_v23, %v6526_v24  ;;  %4049 = vmatpush.bf16.msrb.mxu3 %v7361_v30  ;;  %v6436_v23 = vld [vmem:[%s8759_s17 + $0x788] sm:$0xf] }
 0x1ca   : > { %v6782_v28 = vld [vmem:[%s8759_s17 + $0xa60] sm:$0xf0]  ;;  %v8018_v24 = vld [vmem:[%s8759_s17 + $0x7a4] sm:$0xf0] }
 0x1cb   : > { %v8173_v31 = vld [vmem:[%s8759_s17 + $0xc84] sm:$0xf]  ;;  %v6785_v36 = vor.u32 %v8101_v25, %v6782_v28  ;;  %4012 = vmatpush.bf16.msrb.mxu0 %v6529_v35  ;;  %v5637_v25 = vor.u32 %v7818_v14, %v5636_v13  ;;  %v5893_v28 = vor.u32 %v7882_v18, %v5892_v17  ;;  %v5604_v29 = vld [vmem:[%s8759_s17 + $0x108] sm:$0xf] }
 0x1cc   : > { %v7070_v32 = vld [vmem:[%s8759_s17 + $0xca0] sm:$0xf0]  ;;  %v7810_v30 = vld [vmem:[%s8759_s17 + $0x124] sm:$0xf0] }
 0x1cd   : > { %v8237_v33 = vld [vmem:[%s8759_s17 + $0xe84] sm:$0xf]  ;;  %v7073_v43 = vor.u32 %v8173_v31, %v7070_v32  ;;  %4025 = vmatpush.bf16.msrb.mxu1 %v6785_v36  ;;  %v6181_v31 = vor.u32 %v7954_v22, %v6180_v21  ;;  %v6437_v32 = vor.u32 %v8018_v24, %v6436_v23  ;;  %v6148_v35 = vld [vmem:[%s8759_s17 + $0x548] sm:$0xf] }
 0x1ce   : > { %v7326_v34 = vld [vmem:[%s8759_s17 + $0xea0] sm:$0xf0]  ;;  %v7946_v36 = vld [vmem:[%s8759_s17 + $0x564] sm:$0xf0] }
 0x1cf   : > { %v8029_v37 = vld [vmem:[%s8759_s17 + $0x804] sm:$0xf]  ;;  %v7329_v44 = vor.u32 %v8237_v33, %v7326_v34  ;;  %4037 = vmatpush.bf16.msrb.mxu2 %v7073_v43  ;;  %v5860_v33 = vld [vmem:[%s8759_s17 + $0x308] sm:$0xf]  ;;  %v6149_v43 = vor.u32 %v7946_v36, %v6148_v35 }
 0x1d0   : > { %v6494_v38 = vld [vmem:[%s8759_s17 + $0x820] sm:$0xf0]  ;;  %v7874_v34 = vld [vmem:[%s8759_s17 + $0x324] sm:$0xf0] }
 0x1d1   : > { %v8093_v39 = vld [vmem:[%s8759_s17 + $0xa04] sm:$0xf]  ;;  %v6497_v55 = vor.u32 %v8029_v37, %v6494_v38  ;;  %4050 = vmatpush.bf16.msrb.mxu3 %v7329_v44  ;;  %v6404_v37 = vld [vmem:[%s8759_s17 + $0x748] sm:$0xf] }
 0x1d2   : > { %v6750_v40 = vld [vmem:[%s8759_s17 + $0xa20] sm:$0xf0]  ;;  %v8010_v38 = vld [vmem:[%s8759_s17 + $0x764] sm:$0xf0] }
 0x1d3   : > { %v8165_v47 = vld [vmem:[%s8759_s17 + $0xc44] sm:$0xf]  ;;  %v6753_v56 = vor.u32 %v8093_v39, %v6750_v40  ;;  %4013 = vmatpush.bf16.msrb.mxu0 %v6497_v55  ;;  %v5605_v39 = vor.u32 %v7810_v30, %v5604_v29  ;;  %v5861_v40 = vor.u32 %v7874_v34, %v5860_v33  ;;  %v6405_v44 = vor.u32 %v8010_v38, %v6404_v37  ;;  %v5508_v6 = vld [vmem:[%s8759_s17 + $0x48] sm:$0xf] }
 0x1d4   : > { %v7038_v52 = vld [vmem:[%s8759_s17 + $0xc60] sm:$0xf0]  ;;  %v5573_v55 = vor.u32 %v7802_v42, %v5572_v41  ;;  %v7786_v7 = vld [vmem:[%s8759_s17 + $0x64] sm:$0xf0] }
 0x1d5   : > { %v8229_v53 = vld [vmem:[%s8759_s17 + $0xe44] sm:$0xf]  ;;  %v7041_v62 = vor.u32 %v8165_v47, %v7038_v52  ;;  %4026 = vmatpush.bf16.msrb.mxu1 %v6753_v56  ;;  %v6116_v47 = vld [vmem:[%s8759_s17 + $0x508] sm:$0xf]  ;;  %v5829_v56 = vor.u32 %v7866_v46, %v5828_v45 }
 0x1d6   : > { %v7294_v54 = vld [vmem:[%s8759_s17 + $0xe60] sm:$0xf0]  ;;  %4014 = vmatmul.bf16.vlgmr.msrb.gmra.mxu0 %v9025_v26  ;;  %v7938_v52 = vld [vmem:[%s8759_s17 + $0x524] sm:$0xf0] }
 0x1d7   : > { %v7297_v63 = vor.u32 %v8229_v53, %v7294_v54  ;;  %v8157_v2 = vld [vmem:[%s8759_s17 + $0xc04] sm:$0xf]  ;;  %4058 = vmatpush.bf16.msra.mxu0 %v5701_v57  ;;  %4038 = vmatpush.bf16.msrb.mxu2 %v7041_v62  ;;  %v6372_v53 = vld [vmem:[%s8759_s17 + $0x708] sm:$0xf]  ;;  %v6117_v59 = vor.u32 %v7938_v52, %v6116_v47 }
 0x1d8   : > { %v7006_v3 = vld [vmem:[%s8759_s17 + $0xc20] sm:$0xf0]  ;;  %4027 = vmatmul.bf16.vlgmr.msrb.gmra.mxu1 %v9027_v27  ;;  %v8002_v54 = vld [vmem:[%s8759_s17 + $0x724] sm:$0xf0] }
 0x1d9   : > { %v8221_v4 = vld [vmem:[%s8759_s17 + $0xe04] sm:$0xf]  ;;  %4071 = vmatpush.bf16.msra.mxu1 %v5957_v58  ;;  %4051 = vmatpush.bf16.msrb.mxu3 %v7297_v63  ;;  %v7009_v11 = vor.u32 %v8157_v2, %v7006_v3  ;;  %v5540_v57 = vld [vmem:[%s8759_s17 + $0x88] sm:$0xf]  ;;  %v6373_v60 = vor.u32 %v8002_v54, %v6372_v53 }
 0x1da   : > { %v7262_v5 = vld [vmem:[%s8759_s17 + $0xe20] sm:$0xf0]  ;;  %v7794_v58 = vld [vmem:[%s8759_s17 + $0xa4] sm:$0xf0] }
 0x1db   : > { %v7265_v12 = vor.u32 %v8221_v4, %v7262_v5  ;;  %4059 = vmatpush.bf16.msra.mxu0 %v5669_v0  ;;  %4039 = vmatpush.bf16.msrb.mxu2 %v7009_v11  ;;  %v7858_v62 = vld [vmem:[%s8759_s17 + $0x2a4] sm:$0xf0]  ;;  %v5541_v4 = vor.u32 %v7794_v58, %v5540_v57 }
 0x1dc   : > { %v6084_v63 = vld [vmem:[%s8759_s17 + $0x4c8] sm:$0xf]  ;;  %v5797_v5 = vor.u32 %v7858_v62, %v5796_v61 }
 0x1dd   : > { %4072 = vmatpush.bf16.msra.mxu1 %v5925_v10  ;;  %4052 = vmatpush.bf16.msrb.mxu3 %v7265_v12  ;;  %v6340_v2 = vld [vmem:[%s8759_s17 + $0x6c8] sm:$0xf]  ;;  %v6085_v8 = vor.u32 %v7930_v1, %v6084_v63 }
 0x1de   : > { %4040 = vmatmul.bf16.vlgmr.msrb.gmra.mxu2 %v9043_v50  ;;  %v7994_v3 = vld [vmem:[%s8759_s17 + $0x6e4] sm:$0xf0] }
 0x1df   : > { %4084 = vmatpush.bf16.msra.mxu2 %v6213_v15  ;;  %4060 = vmatpush.bf16.msra.mxu0 %v5637_v25  ;;  %v6341_v9 = vor.u32 %v7994_v3, %v6340_v2  ;;  %v5764_v0 = vld [vmem:[%s8759_s17 + $0x248] sm:$0xf]  ;;  %v5509_v15 = vor.u32 %v7786_v7, %v5508_v6 }
 0x1e0   : > { %4053 = vmatmul.bf16.vlgmr.msrb.gmra.mxu3 %v9045_v51  ;;  %v7850_v10 = vld [vmem:[%s8759_s17 + $0x264] sm:$0xf0] }
 0x1e1   : > { %4097 = vmatpush.bf16.msra.mxu3 %v6469_v16  ;;  %4073 = vmatpush.bf16.msra.mxu1 %v5893_v28  ;;  %v6052_v11 = vld [vmem:[%s8759_s17 + $0x488] sm:$0xf]  ;;  %v5765_v16 = vor.u32 %v7850_v10, %v5764_v0 }
 0x1e2   : > { %v7922_v12 = vld [vmem:[%s8759_s17 + $0x4a4] sm:$0xf0] }
 0x1e3   : > { %4085 = vmatpush.bf16.msra.mxu2 %v6181_v31  ;;  %4061 = vmatpush.bf16.msra.mxu0 %v5605_v39  ;;  %v6308_v13 = vld [vmem:[%s8759_s17 + $0x688] sm:$0xf]  ;;  %v6053_v22 = vor.u32 %v7922_v12, %v6052_v11 }
 0x1e4   : > { %v7986_v14 = vld [vmem:[%s8759_s17 + $0x6a4] sm:$0xf0] }
 0x1e5   : > { %4098 = vmatpush.bf16.msra.mxu3 %v6437_v32  ;;  %4074 = vmatpush.bf16.msra.mxu1 %v5861_v40  ;;  %v5476_v17 = vld [vmem:[%s8759_s17 + $0x8] sm:$0xf]  ;;  %v6309_v23 = vor.u32 %v7986_v14, %v6308_v13 }
 0x1e6   : > { %v7778_v18 = vld [vmem:[%s8759_s17 + $0x24] sm:$0xf0] }
 0x1e7   : > { %4086 = vmatpush.bf16.msra.mxu2 %v6149_v43  ;;  %4062 = vmatpush.bf16.msra.mxu0 %v5573_v55  ;;  %v5732_v21 = vld [vmem:[%s8759_s17 + $0x208] sm:$0xf]  ;;  %v5477_v35 = vor.u32 %v7778_v18, %v5476_v17 }
 0x1e8   : > { %v7842_v24 = vld [vmem:[%s8759_s17 + $0x224] sm:$0xf0] }
 0x1e9   : > { %4099 = vmatpush.bf16.msra.mxu3 %v6405_v44  ;;  %4075 = vmatpush.bf16.msra.mxu1 %v5829_v56  ;;  %v6724_v25 = vld [vmem:[%s8759_s17 + $0x9c8] sm:$0xf]  ;;  %v5733_v36 = vor.u32 %v7842_v24, %v5732_v21 }
 0x1ea   : > { %v8090_v28 = vld [vmem:[%s8759_s17 + $0x9e4] sm:$0xf0] }
 0x1eb   : > { %4087 = vmatpush.bf16.msra.mxu2 %v6117_v59  ;;  %4063 = vmatpush.bf16.msra.mxu0 %v5541_v4  ;;  %v6980_v29 = vld [vmem:[%s8759_s17 + $0xbc8] sm:$0xf]  ;;  %v6725_v37 = vor.u32 %v8090_v28, %v6724_v25 }
 0x1ec   : > { %v8154_v30 = vld [vmem:[%s8759_s17 + $0xbe4] sm:$0xf0] }
 0x1ed   : > { %4100 = vmatpush.bf16.msra.mxu3 %v6373_v60  ;;  %4076 = vmatpush.bf16.msra.mxu1 %v5797_v5  ;;  %v6020_v31 = vld [vmem:[%s8759_s17 + $0x448] sm:$0xf]  ;;  %v6981_v38 = vor.u32 %v8154_v30, %v6980_v29 }
 0x1ee   : > { %v7914_v32 = vld [vmem:[%s8759_s17 + $0x464] sm:$0xf0] }
 0x1ef   : > { %4088 = vmatpush.bf16.msra.mxu2 %v6085_v8  ;;  %v6276_v33 = vld [vmem:[%s8759_s17 + $0x648] sm:$0xf]  ;;  %4064 = vmatpush.bf16.msra.mxu0 %v5509_v15  ;;  %v6021_v42 = vor.u32 %v7914_v32, %v6020_v31 }
 0x1f0   : > { %v7978_v34 = vld [vmem:[%s8759_s17 + $0x664] sm:$0xf0] }
 0x1f1   : > { %4101 = vmatpush.bf16.msra.mxu3 %v6341_v9  ;;  %4077 = vmatpush.bf16.msra.mxu1 %v5765_v16  ;;  %v6692_v39 = vld [vmem:[%s8759_s17 + $0x988] sm:$0xf]  ;;  %v6277_v43 = vor.u32 %v7978_v34, %v6276_v33 }
 0x1f2   : > { %v8082_v40 = vld [vmem:[%s8759_s17 + $0x9a4] sm:$0xf0] }
 0x1f3   : > { %4089 = vmatpush.bf16.msra.mxu2 %v6053_v22  ;;  %v6948_v41 = vld [vmem:[%s8759_s17 + $0xb88] sm:$0xf]  ;;  %4065 = vmatpush.bf16.msra.mxu0 %v5477_v35  ;;  %v6693_v57 = vor.u32 %v8082_v40, %v6692_v39 }
 0x1f4   : > { %v8146_v44 = vld [vmem:[%s8759_s17 + $0xba4] sm:$0xf0] }
 0x1f5   : > { %4102 = vmatpush.bf16.msra.mxu3 %v6309_v23  ;;  %v5988_v45 = vld [vmem:[%s8759_s17 + $0x408] sm:$0xf]  ;;  %4078 = vmatpush.bf16.msra.mxu1 %v5733_v36  ;;  %v6949_v58 = vor.u32 %v8146_v44, %v6948_v41 }
 0x1f6   : > { %v7906_v46 = vld [vmem:[%s8759_s17 + $0x424] sm:$0xf0]  ;;  %4066 = vmatmul.bf16.vlgmr.msra.gmra.mxu0 %v8978_v19 }
 0x1f7   : > { %v6244_v47 = vld [vmem:[%s8759_s17 + $0x608] sm:$0xf]  ;;  %4110 = vmatpush.bf16.msrb.mxu0 %v6725_v37  ;;  %4090 = vmatpush.bf16.msra.mxu2 %v6021_v42  ;;  %v5989_v59 = vor.u32 %v7906_v46, %v5988_v45 }
 0x1f8   : > { %v7970_v52 = vld [vmem:[%s8759_s17 + $0x624] sm:$0xf0]  ;;  %4079 = vmatmul.bf16.vlgmr.msra.gmra.mxu1 %v8980_v20 }
 0x1f9   : > { %v7236_v53 = vld [vmem:[%s8759_s17 + $0xdc8] sm:$0xf]  ;;  %4123 = vmatpush.bf16.msrb.mxu1 %v6981_v38  ;;  %4103 = vmatpush.bf16.msra.mxu3 %v6277_v43  ;;  %v6245_v60 = vor.u32 %v7970_v52, %v6244_v47 }
 0x1fa   : > { %v8218_v54 = vld [vmem:[%s8759_s17 + $0xde4] sm:$0xf0] }
 0x1fb   : > { %v7492_v55 = vld [vmem:[%s8759_s17 + $0xfc8] sm:$0xf]  ;;  %v7237_v63 = vor.u32 %v8218_v54, %v7236_v53  ;;  %4111 = vmatpush.bf16.msrb.mxu0 %v6693_v57  ;;  %4091 = vmatpush.bf16.msra.mxu2 %v5989_v59 }
 0x1fc   : > { %v8282_v56 = vld [vmem:[%s8759_s17 + $0xfe4] sm:$0xf0] }
 0x1fd   : > { %v6660_v61 = vld [vmem:[%s8759_s17 + $0x948] sm:$0xf]  ;;  %v7493_v1 = vor.u32 %v8282_v56, %v7492_v55  ;;  %4124 = vmatpush.bf16.msrb.mxu1 %v6949_v58  ;;  %4104 = vmatpush.bf16.msra.mxu3 %v6245_v60 }
 0x1fe   : > { %v8074_v62 = vld [vmem:[%s8759_s17 + $0x964] sm:$0xf0]  ;;  %4092 = vmatmul.bf16.vlgmr.msra.gmra.mxu2 %v8998_v48 }
 0x1ff   : > { %v6916_v2 = vld [vmem:[%s8759_s17 + $0xb48] sm:$0xf]  ;;  %v6661_v8 = vor.u32 %v8074_v62, %v6660_v61  ;;  %4136 = vmatpush.bf16.msrb.mxu2 %v7237_v63 }
 0x200   : > { %v8138_v3 = vld [vmem:[%s8759_s17 + $0xb64] sm:$0xf0]  ;;  %4105 = vmatmul.bf16.vlgmr.msra.gmra.mxu3 %v9000_v49 }
 0x201   : > { %v7204_v4 = vld [vmem:[%s8759_s17 + $0xd88] sm:$0xf]  ;;  %v6917_v9 = vor.u32 %v8138_v3, %v6916_v2  ;;  %4149 = vmatpush.bf16.msrb.mxu3 %v7493_v1  ;;  %4112 = vmatpush.bf16.msrb.mxu0 %v6661_v8  ;;  %v7830_v8 = vld [vmem:[%s8759_s17 + $0x1cc] sm:$0xf] }
 0x202   : > { %v8210_v5 = vld [vmem:[%s8759_s17 + $0xda4] sm:$0xf0] }
 0x203   : > { %v7460_v6 = vld [vmem:[%s8759_s17 + $0xf88] sm:$0xf]  ;;  %v7205_v11 = vor.u32 %v8210_v5, %v7204_v4  ;;  %4125 = vmatpush.bf16.msrb.mxu1 %v6917_v9  ;;  %v5702_v9 = vld [vmem:[%s8759_s17 + $0x1e8] sm:$0xf0] }
 0x204   : > { %v8274_v7 = vld [vmem:[%s8759_s17 + $0xfa4] sm:$0xf0] }
 0x205   : > { %v6628_v0 = vld [vmem:[%s8759_s17 + $0x908] sm:$0xf]  ;;  %v7461_v12 = vor.u32 %v8274_v7, %v7460_v6  ;;  %4137 = vmatpush.bf16.msrb.mxu2 %v7205_v11 }
 0x206   : > { %v8066_v10 = vld [vmem:[%s8759_s17 + $0x924] sm:$0xf0] }
 0x207   : > { %v6884_v13 = vld [vmem:[%s8759_s17 + $0xb08] sm:$0xf]  ;;  %v6629_v21 = vor.u32 %v8066_v10, %v6628_v0  ;;  %4150 = vmatpush.bf16.msrb.mxu3 %v7461_v12  ;;  %v7894_v0 = vld [vmem:[%s8759_s17 + $0x3cc] sm:$0xf] }
 0x208   : > { %v8130_v14 = vld [vmem:[%s8759_s17 + $0xb24] sm:$0xf0]  ;;  %v5958_v10 = vld [vmem:[%s8759_s17 + $0x3e8] sm:$0xf0] }
 0x209   : > { %v7172_v15 = vld [vmem:[%s8759_s17 + $0xd48] sm:$0xf]  ;;  %v6885_v22 = vor.u32 %v8130_v14, %v6884_v13  ;;  %4113 = vmatpush.bf16.msrb.mxu0 %v6629_v21  ;;  %v5961_v21 = vor.u32 %v7894_v0, %v5958_v10 }
 0x20a   : > { %v8202_v16 = vld [vmem:[%s8759_s17 + $0xd64] sm:$0xf0] }
 0x20b   : > { %v7428_v17 = vld [vmem:[%s8759_s17 + $0xf48] sm:$0xf]  ;;  %v7173_v25 = vor.u32 %v8202_v16, %v7172_v15  ;;  %4126 = vmatpush.bf16.msrb.mxu1 %v6885_v22  ;;  %v5670_v22 = vld [vmem:[%s8759_s17 + $0x1a8] sm:$0xf0] }
 0x20c   : > { %v8266_v18 = vld [vmem:[%s8759_s17 + $0xf64] sm:$0xf0] }
 0x20d   : > { %v6596_v23 = vld [vmem:[%s8759_s17 + $0x8c8] sm:$0xf]  ;;  %v7429_v28 = vor.u32 %v8266_v18, %v7428_v17  ;;  %4138 = vmatpush.bf16.msrb.mxu2 %v7173_v25  ;;  %v7822_v17 = vld [vmem:[%s8759_s17 + $0x18c] sm:$0xf]  ;;  %v5705_v18 = vor.u32 %v7830_v8, %v5702_v9 }
 0x20e   : > { %v8058_v24 = vld [vmem:[%s8759_s17 + $0x8e4] sm:$0xf0]  ;;  %v6406_v8 = vld [vmem:[%s8759_s17 + $0x768] sm:$0xf0] }
 0x20f   : > { %v6852_v29 = vld [vmem:[%s8759_s17 + $0xac8] sm:$0xf]  ;;  %v6597_v35 = vor.u32 %v8058_v24, %v6596_v23  ;;  %4151 = vmatpush.bf16.msrb.mxu3 %v7429_v28  ;;  %v7886_v23 = vld [vmem:[%s8759_s17 + $0x38c] sm:$0xf] }
 0x210   : > { %v8122_v30 = vld [vmem:[%s8759_s17 + $0xae4] sm:$0xf0]  ;;  %v5926_v24 = vld [vmem:[%s8759_s17 + $0x3a8] sm:$0xf0] }
 0x211   : > { %v7140_v31 = vld [vmem:[%s8759_s17 + $0xd08] sm:$0xf]  ;;  %v6853_v36 = vor.u32 %v8122_v30, %v6852_v29  ;;  %4114 = vmatpush.bf16.msrb.mxu0 %v6597_v35  ;;  %v8022_v35 = vld [vmem:[%s8759_s17 + $0x7cc] sm:$0xf] }
 0x212   : > { %v8194_v32 = vld [vmem:[%s8759_s17 + $0xd24] sm:$0xf0] }
 0x213   : > { %v7396_v33 = vld [vmem:[%s8759_s17 + $0xf08] sm:$0xf]  ;;  %v7141_v39 = vor.u32 %v8194_v32, %v7140_v31  ;;  %4127 = vmatpush.bf16.msrb.mxu1 %v6853_v36  ;;  %v6470_v36 = vld [vmem:[%s8759_s17 + $0x7e8] sm:$0xf0] }
 0x214   : > { %v8258_v34 = vld [vmem:[%s8759_s17 + $0xf24] sm:$0xf0] }
 0x215   : > { %v6564_v37 = vld [vmem:[%s8759_s17 + $0x888] sm:$0xf]  ;;  %v7397_v40 = vor.u32 %v8258_v34, %v7396_v33  ;;  %4139 = vmatpush.bf16.msrb.mxu2 %v7141_v39  ;;  %v7958_v33 = vld [vmem:[%s8759_s17 + $0x5cc] sm:$0xf]  ;;  %v5929_v39 = vor.u32 %v7886_v23, %v5926_v24 }
 0x216   : > { %v8050_v38 = vld [vmem:[%s8759_s17 + $0x8a4] sm:$0xf0]  ;;  %v6214_v34 = vld [vmem:[%s8759_s17 + $0x5e8] sm:$0xf0] }
 0x217   : > { %v6820_v41 = vld [vmem:[%s8759_s17 + $0xa88] sm:$0xf]  ;;  %v6565_v47 = vor.u32 %v8050_v38, %v6564_v37  ;;  %4152 = vmatpush.bf16.msrb.mxu3 %v7397_v40  ;;  %v5673_v38 = vor.u32 %v7822_v17, %v5670_v22  ;;  %v7934_v17 = vld [vmem:[%s8759_s17 + $0x50c] sm:$0xf] }
 0x218   : > { %v8114_v42 = vld [vmem:[%s8759_s17 + $0xaa4] sm:$0xf0]  ;;  %v6374_v22 = vld [vmem:[%s8759_s17 + $0x728] sm:$0xf0] }
 0x219   : > { %v7108_v43 = vld [vmem:[%s8759_s17 + $0xcc8] sm:$0xf]  ;;  %v6821_v52 = vor.u32 %v8114_v42, %v6820_v41  ;;  %4115 = vmatpush.bf16.msrb.mxu0 %v6565_v47  ;;  %v7814_v42 = vld [vmem:[%s8759_s17 + $0x14c] sm:$0xf] }
 0x21a   : > { %v8186_v44 = vld [vmem:[%s8759_s17 + $0xce4] sm:$0xf0]  ;;  %v5894_v47 = vld [vmem:[%s8759_s17 + $0x368] sm:$0xf0] }
 0x21b   : > { %v7364_v45 = vld [vmem:[%s8759_s17 + $0xec8] sm:$0xf]  ;;  %v7109_v55 = vor.u32 %v8186_v44, %v7108_v43  ;;  %4128 = vmatpush.bf16.msrb.mxu1 %v6821_v52  ;;  %v5638_v43 = vld [vmem:[%s8759_s17 + $0x168] sm:$0xf0] }
 0x21c   : > { %v8250_v46 = vld [vmem:[%s8759_s17 + $0xee4] sm:$0xf0]  ;;  %v7878_v44 = vld [vmem:[%s8759_s17 + $0x34c] sm:$0xf] }
 0x21d   : > { %v6532_v53 = vld [vmem:[%s8759_s17 + $0x848] sm:$0xf]  ;;  %v7365_v56 = vor.u32 %v8250_v46, %v7364_v45  ;;  %4140 = vmatpush.bf16.msrb.mxu2 %v7109_v55  ;;  %v6217_v45 = vor.u32 %v7958_v33, %v6214_v34  ;;  %v6473_v46 = vor.u32 %v8022_v35, %v6470_v36  ;;  %v8014_v55 = vld [vmem:[%s8759_s17 + $0x78c] sm:$0xf] }
 0x21e   : > { %v8042_v54 = vld [vmem:[%s8759_s17 + $0x864] sm:$0xf0]  ;;  %v7854_v33 = vld [vmem:[%s8759_s17 + $0x28c] sm:$0xf] }
 0x21f   : > { %v6788_v57 = vld [vmem:[%s8759_s17 + $0xa48] sm:$0xf]  ;;  %v6533_v63 = vor.u32 %v8042_v54, %v6532_v53  ;;  %4153 = vmatpush.bf16.msrb.mxu3 %v7365_v56  ;;  %v7950_v53 = vld [vmem:[%s8759_s17 + $0x58c] sm:$0xf] }
 0x220   : > { %v8106_v58 = vld [vmem:[%s8759_s17 + $0xa64] sm:$0xf0]  ;;  %v6182_v54 = vld [vmem:[%s8759_s17 + $0x5a8] sm:$0xf0] }
 0x221   : > { %v7076_v59 = vld [vmem:[%s8759_s17 + $0xc88] sm:$0xf]  ;;  %v6789_v1 = vor.u32 %v8106_v58, %v6788_v57  ;;  %4116 = vmatpush.bf16.msrb.mxu0 %v6533_v63  ;;  %v6438_v56 = vld [vmem:[%s8759_s17 + $0x7a8] sm:$0xf0]  ;;  %v5641_v57 = vor.u32 %v7814_v42, %v5638_v43  ;;  %v5897_v58 = vor.u32 %v7878_v44, %v5894_v47  ;;  %v3885_v44 = vpop.f32.mrf.mxu2 }
 0x222   : > { %v8178_v60 = vld [vmem:[%s8759_s17 + $0xca4] sm:$0xf0]  ;;  %v5798_v34 = vld [vmem:[%s8759_s17 + $0x2a8] sm:$0xf0] }
 0x223   : > { %v7332_v61 = vld [vmem:[%s8759_s17 + $0xe88] sm:$0xf]  ;;  %v7077_v5 = vor.u32 %v8178_v60, %v7076_v59  ;;  %4129 = vmatpush.bf16.msrb.mxu1 %v6789_v1  ;;  %v3859_v59 = vpop.f32.mrf.mxu0  ;;  %v3872_v60 = vpop.f32.mrf.mxu1  ;;  %v6185_v1 = vor.u32 %v7950_v53, %v6182_v54  ;;  %v7926_v35 = vld [vmem:[%s8759_s17 + $0x4cc] sm:$0xf] }
 0x224   : > { %v8242_v62 = vld [vmem:[%s8759_s17 + $0xea4] sm:$0xf0]  ;;  %v6086_v36 = vld [vmem:[%s8759_s17 + $0x4e8] sm:$0xf0] }
 0x225   : > { %v6500_v2 = vld [vmem:[%s8759_s17 + $0x808] sm:$0xf]  ;;  %v7333_v6 = vor.u32 %v8242_v62, %v7332_v61  ;;  %4141 = vmatpush.bf16.msrb.mxu2 %v7077_v5  ;;  %v7806_v61 = vld [vmem:[%s8759_s17 + $0x10c] sm:$0xf] }
 0x226   : > { %v8034_v3 = vld [vmem:[%s8759_s17 + $0x824] sm:$0xf0]  ;;  %v5606_v62 = vld [vmem:[%s8759_s17 + $0x128] sm:$0xf0] }
 0x227   : > { %v6756_v4 = vld [vmem:[%s8759_s17 + $0xa08] sm:$0xf]  ;;  %v6501_v15 = vor.u32 %v8034_v3, %v6500_v2  ;;  %4154 = vmatpush.bf16.msrb.mxu3 %v7333_v6  ;;  %v6441_v2 = vor.u32 %v8014_v55, %v6438_v56  ;;  %v7870_v3 = vld [vmem:[%s8759_s17 + $0x30c] sm:$0xf]  ;;  %v5609_v0 = vor.u32 %v7806_v61, %v5606_v62 }
 0x228   : > { %v8098_v7 = vld [vmem:[%s8759_s17 + $0xa24] sm:$0xf0]  ;;  %v7942_v5 = vld [vmem:[%s8759_s17 + $0x54c] sm:$0xf] }
 0x229   : > { %v7044_v11 = vld [vmem:[%s8759_s17 + $0xc48] sm:$0xf]  ;;  %v6757_v16 = vor.u32 %v8098_v7, %v6756_v4  ;;  %4117 = vmatpush.bf16.msrb.mxu0 %v6501_v15  ;;  %v5862_v4 = vld [vmem:[%s8759_s17 + $0x328] sm:$0xf0] }
 0x22a   : > { %v8170_v12 = vld [vmem:[%s8759_s17 + $0xc64] sm:$0xf0]  ;;  %v6150_v6 = vld [vmem:[%s8759_s17 + $0x568] sm:$0xf0]  ;;  %v5865_v10 = vor.u32 %v7870_v3, %v5862_v4 }
 0x22b   : > { %v7300_v13 = vld [vmem:[%s8759_s17 + $0xe48] sm:$0xf]  ;;  %v7045_v25 = vor.u32 %v8170_v12, %v7044_v11  ;;  %4130 = vmatpush.bf16.msrb.mxu1 %v6757_v16  ;;  %v8006_v7 = vld [vmem:[%s8759_s17 + $0x74c] sm:$0xf] }
 0x22c   : > { %v8234_v14 = vld [vmem:[%s8759_s17 + $0xe64] sm:$0xf0]  ;;  %4118 = vmatmul.bf16.vlgmr.msrb.gmra.mxu0 %v9025_v26  ;;  %v7798_v11 = vld [vmem:[%s8759_s17 + $0xcc] sm:$0xf] }
 0x22d   : > { %v7301_v28 = vor.u32 %v8234_v14, %v7300_v13  ;;  %v7012_v29 = vld [vmem:[%s8759_s17 + $0xc08] sm:$0xf]  ;;  %4162 = vmatpush.bf16.msra.mxu0 %v5705_v18  ;;  %4142 = vmatpush.bf16.msrb.mxu2 %v7045_v25  ;;  %v5574_v12 = vld [vmem:[%s8759_s17 + $0xe8] sm:$0xf0]  ;;  %v6153_v13 = vor.u32 %v7942_v5, %v6150_v6  ;;  %v6409_v14 = vor.u32 %v8006_v7, %v6406_v8  ;;  %v3861_v25 = vpop.f32.mrf.mxu0 }
 0x22e   : > { %v8162_v30 = vld [vmem:[%s8759_s17 + $0xc24] sm:$0xf0]  ;;  %4131 = vmatmul.bf16.vlgmr.msrb.gmra.mxu1 %v9027_v27  ;;  %v7862_v15 = vld [vmem:[%s8759_s17 + $0x2cc] sm:$0xf]  ;;  %v5577_v23 = vor.u32 %v7798_v11, %v5574_v12 }
 0x22f   : > { %v7268_v31 = vld [vmem:[%s8759_s17 + $0xe08] sm:$0xf]  ;;  %4175 = vmatpush.bf16.msra.mxu1 %v5961_v21  ;;  %4155 = vmatpush.bf16.msrb.mxu3 %v7301_v28  ;;  %v7013_v40 = vor.u32 %v8162_v30, %v7012_v29  ;;  %v5830_v16 = vld [vmem:[%s8759_s17 + $0x2e8] sm:$0xf0]  ;;  %v3874_v28 = vpop.f32.mrf.mxu1 }
 0x230   : > { %v8226_v32 = vld [vmem:[%s8759_s17 + $0xe24] sm:$0xf0]  ;;  %v6118_v18 = vld [vmem:[%s8759_s17 + $0x528] sm:$0xf0]  ;;  %v5833_v24 = vor.u32 %v7862_v15, %v5830_v16 }
 0x231   : > { %v9288_v37 = vld [vmem:[%s9285_s15] sm:$0xff]  ;;  %v7269_v41 = vor.u32 %v8226_v32, %v7268_v31  ;;  %4163 = vmatpush.bf16.msra.mxu0 %v5673_v38  ;;  %4143 = vmatpush.bf16.msrb.mxu2 %v7013_v40  ;;  %v6121_v31 = vor.u32 %v7934_v17, %v6118_v18  ;;  %v3887_v18 = vpop.f32.mrf.mxu2 }
 0x232   : > { %v1274_v52 = vperm.slane %v9288_v37, 0  ;;  %v7998_v21 = vld [vmem:[%s8759_s17 + $0x70c] sm:$0xf] }
 0x233   : > { %4176 = vmatpush.bf16.msra.mxu1 %v5929_v39  ;;  %4156 = vmatpush.bf16.msrb.mxu3 %v7269_v41  ;;  %v7790_v29 = vld [vmem:[%s8759_s17 + $0x8c] sm:$0xf]  ;;  %v6377_v32 = vor.u32 %v7998_v21, %v6374_v22  ;;  %v5801_v41 = vor.u32 %v7854_v33, %v5798_v34 }
 0x234   : > { %v3860_v63 = vadd.f32 %v3859_v59, %v1274_v52  ;;  %4144 = vmatmul.bf16.vlgmr.msrb.gmra.mxu2 %v9043_v50  ;;  %v5542_v30 = vld [vmem:[%s8759_s17 + $0xa8] sm:$0xf0] }
 0x235   : > { %4188 = vmatpush.bf16.msra.mxu2 %v6217_v45  ;;  %4164 = vmatpush.bf16.msra.mxu0 %v5641_v57  ;;  %v7990_v38 = vld [vmem:[%s8759_s17 + $0x6cc] sm:$0xf]  ;;  %v5545_v40 = vor.u32 %v7790_v29, %v5542_v30  ;;  %v3898_v45 = vpop.f32.mrf.mxu3 }
 0x236   : > { %4157 = vmatmul.bf16.vlgmr.msrb.gmra.mxu3 %v9045_v51  ;;  %v3873_v9 = vadd.f32 %v3872_v60, %v3860_v63  ;;  %v6342_v39 = vld [vmem:[%s8759_s17 + $0x6e8] sm:$0xf0] }
 0x237   : > { %4201 = vmatpush.bf16.msra.mxu3 %v6473_v46  ;;  %4177 = vmatpush.bf16.msra.mxu1 %v5897_v58  ;;  %v7782_v42 = vld [vmem:[%s8759_s17 + $0x4c] sm:$0xf]  ;;  %v6089_v46 = vor.u32 %v7926_v35, %v6086_v36  ;;  %v6345_v47 = vor.u32 %v7990_v38, %v6342_v39  ;;  %v3924_v3 = vpop.f32.mrf.mxu1 }
 0x238   : > { %v5510_v43 = vld [vmem:[%s8759_s17 + $0x68] sm:$0xf0]  ;;  %v3886_v55 = vadd.f32 %v3885_v44, %v3873_v9 }
 0x239   : > { %4189 = vmatpush.bf16.msra.mxu2 %v6185_v1  ;;  %4165 = vmatpush.bf16.msra.mxu0 %v5609_v0  ;;  %v7846_v52 = vld [vmem:[%s8759_s17 + $0x24c] sm:$0xf]  ;;  %v5513_v60 = vor.u32 %v7782_v42, %v5510_v43 }
 0x23a   : > { %v5766_v53 = vld [vmem:[%s8759_s17 + $0x268] sm:$0xf0]  ;;  %v3899_v59 = vadd.f32 %v3898_v45, %v3886_v55 }
 0x23b   : > { %4202 = vmatpush.bf16.msra.mxu3 %v6441_v2  ;;  %4178 = vmatpush.bf16.msra.mxu1 %v5865_v10  ;;  %v7918_v54 = vld [vmem:[%s8759_s17 + $0x48c] sm:$0xf]  ;;  %v5769_v61 = vor.u32 %v7846_v52, %v5766_v53  ;;  %v3911_v2 = vpop.f32.mrf.mxu0 }
 0x23c   : > { %v6054_v56 = vld [vmem:[%s8759_s17 + $0x4a8] sm:$0xf0]  ;;  %v3912_v9 = vadd.f32 %v3911_v2, %v3899_v59 }
 0x23d   : > { %4190 = vmatpush.bf16.msra.mxu2 %v6153_v13  ;;  %4166 = vmatpush.bf16.msra.mxu0 %v5577_v23  ;;  %v7982_v57 = vld [vmem:[%s8759_s17 + $0x68c] sm:$0xf]  ;;  %v6057_v4 = vor.u32 %v7918_v54, %v6054_v56  ;;  %v3900_v21 = vpop.f32.mrf.mxu3 }
 0x23e   : > { %v6310_v58 = vld [vmem:[%s8759_s17 + $0x6a8] sm:$0xf0]  ;;  %v3925_v15 = vadd.f32 %v3924_v3, %v3912_v9  ;;  %v1275_v3 = vperm.slane %v9288_v37, 1 }
 0x23f   : > { %4203 = vmatpush.bf16.msra.mxu3 %v6409_v14  ;;  %4179 = vmatpush.bf16.msra.mxu1 %v5833_v24  ;;  %v7774_v62 = vld [vmem:[%s8759_s17 + $0xc] sm:$0xf]  ;;  %v6313_v5 = vor.u32 %v7982_v57, %v6310_v58  ;;  %v3926_v42 = vpop.f32.mrf.mxu1 }
 0x240   : > { %v5478_v63 = vld [vmem:[%s8759_s17 + $0x28] sm:$0xf0] }
 0x241   : > { %4191 = vmatpush.bf16.msra.mxu2 %v6121_v31  ;;  %4167 = vmatpush.bf16.msra.mxu0 %v5545_v40  ;;  %v7838_v1 = vld [vmem:[%s8759_s17 + $0x20c] sm:$0xf]  ;;  %v5481_v16 = vor.u32 %v7774_v62, %v5478_v63 }
 0x242   : > { %v5734_v6 = vld [vmem:[%s8759_s17 + $0x228] sm:$0xf0] }
 0x243   : > { %4204 = vmatpush.bf16.msra.mxu3 %v6377_v32  ;;  %4180 = vmatpush.bf16.msra.mxu1 %v5801_v41  ;;  %v8086_v7 = vld [vmem:[%s8759_s17 + $0x9cc] sm:$0xf]  ;;  %v5737_v17 = vor.u32 %v7838_v1, %v5734_v6  ;;  %v3913_v41 = vpop.f32.mrf.mxu0 }
 0x244   : > { %v6726_v8 = vld [vmem:[%s8759_s17 + $0x9e8] sm:$0xf0] }
 0x245   : > { %4192 = vmatpush.bf16.msra.mxu2 %v6089_v46  ;;  %v8150_v0 = vld [vmem:[%s8759_s17 + $0xbcc] sm:$0xf]  ;;  %4168 = vmatpush.bf16.msra.mxu0 %v5513_v60  ;;  %v6729_v22 = vor.u32 %v8086_v7, %v6726_v8  ;;  %v3950_v62 = vpop.f32.mrf.mxu3 }
 0x246   : > { %v6982_v10 = vld [vmem:[%s8759_s17 + $0xbe8] sm:$0xf0] }
 0x247   : > { %4205 = vmatpush.bf16.msra.mxu3 %v6345_v47  ;;  %v7910_v11 = vld [vmem:[%s8759_s17 + $0x44c] sm:$0xf]  ;;  %4181 = vmatpush.bf16.msra.mxu1 %v5769_v61  ;;  %v6985_v23 = vor.u32 %v8150_v0, %v6982_v10  ;;  %v3937_v61 = vpop.f32.mrf.mxu2 }
 0x248   : > { %v6022_v12 = vld [vmem:[%s8759_s17 + $0x468] sm:$0xf0]  ;;  %v3938_v63 = vadd.f32 %v3937_v61, %v3925_v15  ;;  %v3976_v15 = vpop.f32.mrf.mxu1 }
 0x249   : > { %v7974_v13 = vld [vmem:[%s8759_s17 + $0x64c] sm:$0xf]  ;;  %4193 = vmatpush.bf16.msra.mxu2 %v6057_v4  ;;  %v6025_v29 = vor.u32 %v7910_v11, %v6022_v12  ;;  %4169 = vmatpush.bf16.msra.mxu0 %v5481_v16 }
 0x24a   : > { %v6278_v14 = vld [vmem:[%s8759_s17 + $0x668] sm:$0xf0]  ;;  %v9375_v10 = vadd.f32 %v3950_v62, %v3938_v63 }
 0x24b   : > { %4206 = vmatpush.bf16.msra.mxu3 %v6313_v5  ;;  %v8078_v24 = vld [vmem:[%s8759_s17 + $0x98c] sm:$0xf]  ;;  %v6281_v30 = vor.u32 %v7974_v13, %v6278_v14  ;;  %4182 = vmatpush.bf16.msra.mxu1 %v5737_v17  ;;  %v3963_v14 = vpop.f32.mrf.mxu0 }
 0x24c   : > { %v6694_v25 = vld [vmem:[%s8759_s17 + $0x9a8] sm:$0xf0]  ;;  %4170 = vmatmul.bf16.vlgmr.msra.gmra.mxu0 %v8978_v19  ;;  %v3964_v16 = vadd.f32 %v3963_v14, %v1275_v3 }
 0x24d   : > { %v8142_v28 = vld [vmem:[%s8759_s17 + $0xb8c] sm:$0xf]  ;;  %4214 = vmatpush.bf16.msrb.mxu0 %v6729_v22  ;;  %v6697_v43 = vor.u32 %v8078_v24, %v6694_v25  ;;  %4194 = vmatpush.bf16.msra.mxu2 %v6025_v29 }
 0x24e   : > { %v6950_v31 = vld [vmem:[%s8759_s17 + $0xba8] sm:$0xf0]  ;;  %4183 = vmatmul.bf16.vlgmr.msra.gmra.mxu1 %v8980_v20 }
 0x24f   : > { %v7902_v32 = vld [vmem:[%s8759_s17 + $0x40c] sm:$0xf]  ;;  %4227 = vmatpush.bf16.msrb.mxu1 %v6985_v23  ;;  %v6953_v44 = vor.u32 %v8142_v28, %v6950_v31  ;;  %4207 = vmatpush.bf16.msra.mxu3 %v6281_v30  ;;  %v3977_v30 = vadd.f32 %v3976_v15, %v3964_v16  ;;  %v5708_v15 = vld [vmem:[%s8759_s17 + $0x1d0] sm:$0xf] }
 0x250   : > { %v5990_v33 = vld [vmem:[%s8759_s17 + $0x428] sm:$0xf0]  ;;  %v7835_v16 = vld [vmem:[%s8759_s17 + $0x1ec] sm:$0xf0] }
 0x251   : > { %v7966_v34 = vld [vmem:[%s8759_s17 + $0x60c] sm:$0xf]  ;;  %v5993_v45 = vor.u32 %v7902_v32, %v5990_v33  ;;  %4215 = vmatpush.bf16.msrb.mxu0 %v6697_v43 }
 0x252   : > { %v6246_v35 = vld [vmem:[%s8759_s17 + $0x628] sm:$0xf0] }
 0x253   : > { %v8214_v36 = vld [vmem:[%s8759_s17 + $0xdcc] sm:$0xf]  ;;  %v6249_v46 = vor.u32 %v7966_v34, %v6246_v35  ;;  %4228 = vmatpush.bf16.msrb.mxu1 %v6953_v44  ;;  %4195 = vmatpush.bf16.msra.mxu2 %v5993_v45  ;;  %v3939_v34 = vpop.f32.mrf.mxu2  ;;  %v3952_v35 = vpop.f32.mrf.mxu3 }
 0x254   : > { %v7238_v38 = vld [vmem:[%s8759_s17 + $0xde8] sm:$0xf0]  ;;  %v5932_v34 = vld [vmem:[%s8759_s17 + $0x390] sm:$0xf] }
 0x255   : > { %v8278_v39 = vld [vmem:[%s8759_s17 + $0xfcc] sm:$0xf]  ;;  %v7241_v53 = vor.u32 %v8214_v36, %v7238_v38  ;;  %4208 = vmatpush.bf16.msra.mxu3 %v6249_v46 }
 0x256   : > { %v7494_v40 = vld [vmem:[%s8759_s17 + $0xfe8] sm:$0xf0]  ;;  %4196 = vmatmul.bf16.vlgmr.msra.gmra.mxu2 %v8998_v48 }
 0x257   : > { %v8070_v47 = vld [vmem:[%s8759_s17 + $0x94c] sm:$0xf]  ;;  %v7497_v54 = vor.u32 %v8278_v39, %v7494_v40  ;;  %4240 = vmatpush.bf16.msrb.mxu2 %v7241_v53  ;;  %v3965_v53 = vpop.f32.mrf.mxu0 }
 0x258   : > { %v6662_v52 = vld [vmem:[%s8759_s17 + $0x968] sm:$0xf0]  ;;  %4209 = vmatmul.bf16.vlgmr.msra.gmra.mxu3 %v9000_v49 }
 0x259   : > { %v8134_v55 = vld [vmem:[%s8759_s17 + $0xb4c] sm:$0xf]  ;;  %v6665_v1 = vor.u32 %v8070_v47, %v6662_v52  ;;  %4253 = vmatpush.bf16.msrb.mxu3 %v7497_v54  ;;  %v3978_v54 = vpop.f32.mrf.mxu1 }
 0x25a   : > { %v6918_v56 = vld [vmem:[%s8759_s17 + $0xb68] sm:$0xf0] }
 0x25b   : > { %v8206_v57 = vld [vmem:[%s8759_s17 + $0xd8c] sm:$0xf]  ;;  %v6921_v2 = vor.u32 %v8134_v55, %v6918_v56  ;;  %4216 = vmatpush.bf16.msrb.mxu0 %v6665_v1 }
 0x25c   : > { %v7206_v58 = vld [vmem:[%s8759_s17 + $0xda8] sm:$0xf0] }
 0x25d   : > { %v8270_v59 = vld [vmem:[%s8759_s17 + $0xf8c] sm:$0xf]  ;;  %v7209_v6 = vor.u32 %v8206_v57, %v7206_v58  ;;  %4229 = vmatpush.bf16.msrb.mxu1 %v6921_v2 }
 0x25e   : > { %v7462_v60 = vld [vmem:[%s8759_s17 + $0xfa8] sm:$0xf0] }
 0x25f   : > { %v8062_v4 = vld [vmem:[%s8759_s17 + $0x90c] sm:$0xf]  ;;  %v7465_v7 = vor.u32 %v8270_v59, %v7462_v60  ;;  %4241 = vmatpush.bf16.msrb.mxu2 %v7209_v6 }
 0x260   : > { %v6630_v5 = vld [vmem:[%s8759_s17 + $0x928] sm:$0xf0] }
 0x261   : > { %v8126_v8 = vld [vmem:[%s8759_s17 + $0xb0c] sm:$0xf]  ;;  %v6633_v17 = vor.u32 %v8062_v4, %v6630_v5  ;;  %4254 = vmatpush.bf16.msrb.mxu3 %v7465_v7  ;;  %v3989_v4 = vpop.f32.mrf.mxu2  ;;  %v4002_v5 = vpop.f32.mrf.mxu3 }
 0x262   : > { %v6886_v9 = vld [vmem:[%s8759_s17 + $0xb28] sm:$0xf0] }
 0x263   : > { %v8198_v0 = vld [vmem:[%s8759_s17 + $0xd4c] sm:$0xf]  ;;  %v6889_v18 = vor.u32 %v8126_v8, %v6886_v9  ;;  %4217 = vmatpush.bf16.msrb.mxu0 %v6633_v17  ;;  %v5964_v17 = vld [vmem:[%s8759_s17 + $0x3d0] sm:$0xf] }
 0x264   : > { %v7174_v11 = vld [vmem:[%s8759_s17 + $0xd68] sm:$0xf0] }
 0x265   : > { %v8262_v12 = vld [vmem:[%s8759_s17 + $0xf4c] sm:$0xf]  ;;  %v7177_v23 = vor.u32 %v8198_v0, %v7174_v11  ;;  %4230 = vmatpush.bf16.msrb.mxu1 %v6889_v18  ;;  %v3990_v11 = vadd.f32 %v3989_v4, %v3977_v30  ;;  %v7899_v18 = vld [vmem:[%s8759_s17 + $0x3ec] sm:$0xf0]  ;;  %v5709_v30 = vor.u32 %v7835_v16, %v5708_v15 }
 0x266   : > { %v7430_v13 = vld [vmem:[%s8759_s17 + $0xf68] sm:$0xf0]  ;;  %v7947_v15 = vld [vmem:[%s8759_s17 + $0x56c] sm:$0xf0] }
 0x267   : > { %v8054_v21 = vld [vmem:[%s8759_s17 + $0x8cc] sm:$0xf]  ;;  %v7433_v24 = vor.u32 %v8262_v12, %v7430_v13  ;;  %4242 = vmatpush.bf16.msrb.mxu2 %v7177_v23  ;;  %v6412_v16 = vld [vmem:[%s8759_s17 + $0x750] sm:$0xf] }
 0x268   : > { %v6598_v22 = vld [vmem:[%s8759_s17 + $0x8e8] sm:$0xf0] }
 0x269   : > { %v8118_v25 = vld [vmem:[%s8759_s17 + $0xacc] sm:$0xf]  ;;  %v6601_v36 = vor.u32 %v8054_v21, %v6598_v22  ;;  %4255 = vmatpush.bf16.msrb.mxu3 %v7433_v24  ;;  %v9415_v22 = vadd.f32 %v4002_v5, %v3990_v11  ;;  %v7875_v11 = vld [vmem:[%s8759_s17 + $0x32c] sm:$0xf0] }
 0x26a   : > { %v6854_v28 = vld [vmem:[%s8759_s17 + $0xae8] sm:$0xf0] }
 0x26b   : > { %v8190_v29 = vld [vmem:[%s8759_s17 + $0xd0c] sm:$0xf]  ;;  %v6857_v38 = vor.u32 %v8118_v25, %v6854_v28  ;;  %4218 = vmatpush.bf16.msrb.mxu0 %v6601_v36 }
 0x26c   : > { %v7142_v31 = vld [vmem:[%s8759_s17 + $0xd28] sm:$0xf0] }
 0x26d   : > { %v8254_v32 = vld [vmem:[%s8759_s17 + $0xf0c] sm:$0xf]  ;;  %v7145_v41 = vor.u32 %v8190_v29, %v7142_v31  ;;  %4231 = vmatpush.bf16.msrb.mxu1 %v6857_v38  ;;  %v5965_v31 = vor.u32 %v7899_v18, %v5964_v17  ;;  %v7891_v38 = vld [vmem:[%s8759_s17 + $0x3ac] sm:$0xf0] }
 0x26e   : > { %v7398_v33 = vld [vmem:[%s8759_s17 + $0xf28] sm:$0xf0]  ;;  %v5933_v54 = vor.u32 %v7891_v38, %v5932_v34  ;;  %v8011_v17 = vld [vmem:[%s8759_s17 + $0x76c] sm:$0xf0] }
 0x26f   : > { %v8046_v39 = vld [vmem:[%s8759_s17 + $0x88c] sm:$0xf]  ;;  %v7401_v42 = vor.u32 %v8254_v32, %v7398_v33  ;;  %4243 = vmatpush.bf16.msrb.mxu2 %v7145_v41  ;;  %v5676_v32 = vld [vmem:[%s8759_s17 + $0x190] sm:$0xf] }
 0x270   : > { %v6566_v40 = vld [vmem:[%s8759_s17 + $0x8a8] sm:$0xf0]  ;;  %v7827_v33 = vld [vmem:[%s8759_s17 + $0x1ac] sm:$0xf0] }
 0x271   : > { %v8110_v43 = vld [vmem:[%s8759_s17 + $0xa8c] sm:$0xf]  ;;  %v6569_v55 = vor.u32 %v8046_v39, %v6566_v40  ;;  %4256 = vmatpush.bf16.msrb.mxu3 %v7401_v42  ;;  %v5677_v53 = vor.u32 %v7827_v33, %v5676_v32  ;;  %v7867_v32 = vld [vmem:[%s8759_s17 + $0x2ec] sm:$0xf0] }
 0x272   : > { %v6822_v44 = vld [vmem:[%s8759_s17 + $0xaa8] sm:$0xf0]  ;;  %v7939_v33 = vld [vmem:[%s8759_s17 + $0x52c] sm:$0xf0] }
 0x273   : > { %v8182_v45 = vld [vmem:[%s8759_s17 + $0xccc] sm:$0xf]  ;;  %v6825_v56 = vor.u32 %v8110_v43, %v6822_v44  ;;  %4219 = vmatpush.bf16.msrb.mxu0 %v6569_v55  ;;  %v6220_v43 = vld [vmem:[%s8759_s17 + $0x5d0] sm:$0xf]  ;;  %v3991_v44 = vpop.f32.mrf.mxu2 }
 0x274   : > { %v7110_v46 = vld [vmem:[%s8759_s17 + $0xce8] sm:$0xf0]  ;;  %v6380_v34 = vld [vmem:[%s8759_s17 + $0x710] sm:$0xf] }
 0x275   : > { %v8246_v47 = vld [vmem:[%s8759_s17 + $0xecc] sm:$0xf]  ;;  %v7113_v59 = vor.u32 %v8182_v45, %v7110_v46  ;;  %4232 = vmatpush.bf16.msrb.mxu1 %v6825_v56  ;;  %v4004_v45 = vpop.f32.mrf.mxu3  ;;  %v7963_v46 = vld [vmem:[%s8759_s17 + $0x5ec] sm:$0xf0] }
 0x276   : > { %v7366_v52 = vld [vmem:[%s8759_s17 + $0xee8] sm:$0xf0]  ;;  %v7859_v44 = vld [vmem:[%s8759_s17 + $0x2ac] sm:$0xf0] }
 0x277   : > { %v8038_v57 = vld [vmem:[%s8759_s17 + $0x84c] sm:$0xf]  ;;  %v7369_v60 = vor.u32 %v8246_v47, %v7366_v52  ;;  %4244 = vmatpush.bf16.msrb.mxu2 %v7113_v59  ;;  %v6476_v47 = vld [vmem:[%s8759_s17 + $0x7d0] sm:$0xf]  ;;  %v6221_v59 = vor.u32 %v7963_v46, %v6220_v43 }
 0x278   : > { %v6534_v58 = vld [vmem:[%s8759_s17 + $0x868] sm:$0xf0]  ;;  %v8027_v52 = vld [vmem:[%s8759_s17 + $0x7ec] sm:$0xf0] }
 0x279   : > { %v8102_v61 = vld [vmem:[%s8759_s17 + $0xa4c] sm:$0xf]  ;;  %v6537_v6 = vor.u32 %v8038_v57, %v6534_v58  ;;  %4257 = vmatpush.bf16.msrb.mxu3 %v7369_v60  ;;  %v5644_v57 = vld [vmem:[%s8759_s17 + $0x150] sm:$0xf]  ;;  %v6477_v60 = vor.u32 %v8027_v52, %v6476_v47 }
 0x27a   : > { %v6790_v62 = vld [vmem:[%s8759_s17 + $0xa68] sm:$0xf0]  ;;  %v7819_v58 = vld [vmem:[%s8759_s17 + $0x16c] sm:$0xf0] }
 0x27b   : > { %v8174_v63 = vld [vmem:[%s8759_s17 + $0xc8c] sm:$0xf]  ;;  %v6793_v7 = vor.u32 %v8102_v61, %v6790_v62  ;;  %4220 = vmatpush.bf16.msrb.mxu0 %v6537_v6  ;;  %v5900_v61 = vld [vmem:[%s8759_s17 + $0x350] sm:$0xf]  ;;  %v5645_v4 = vor.u32 %v7819_v58, %v5644_v57 }
 0x27c   : > { %v7078_v1 = vld [vmem:[%s8759_s17 + $0xca8] sm:$0xf0]  ;;  %v7883_v62 = vld [vmem:[%s8759_s17 + $0x36c] sm:$0xf0] }
 0x27d   : > { %v8238_v2 = vld [vmem:[%s8759_s17 + $0xe8c] sm:$0xf]  ;;  %v7081_v12 = vor.u32 %v8174_v63, %v7078_v1  ;;  %4233 = vmatpush.bf16.msrb.mxu1 %v6793_v7  ;;  %v6188_v63 = vld [vmem:[%s8759_s17 + $0x590] sm:$0xf]  ;;  %v5901_v5 = vor.u32 %v7883_v62, %v5900_v61 }
 0x27e   : > { %v7334_v3 = vld [vmem:[%s8759_s17 + $0xea8] sm:$0xf0]  ;;  %v7955_v1 = vld [vmem:[%s8759_s17 + $0x5ac] sm:$0xf0] }
 0x27f   : > { %v8030_v8 = vld [vmem:[%s8759_s17 + $0x80c] sm:$0xf]  ;;  %v7337_v13 = vor.u32 %v8238_v2, %v7334_v3  ;;  %4245 = vmatpush.bf16.msrb.mxu2 %v7081_v12  ;;  %v6444_v2 = vld [vmem:[%s8759_s17 + $0x790] sm:$0xf] }
 0x280   : > { %v6502_v9 = vld [vmem:[%s8759_s17 + $0x828] sm:$0xf0]  ;;  %v8019_v3 = vld [vmem:[%s8759_s17 + $0x7ac] sm:$0xf0] }
 0x281   : > { %v8094_v0 = vld [vmem:[%s8759_s17 + $0xa0c] sm:$0xf]  ;;  %v6505_v28 = vor.u32 %v8030_v8, %v6502_v9  ;;  %4258 = vmatpush.bf16.msrb.mxu3 %v7337_v13  ;;  %v5612_v6 = vld [vmem:[%s8759_s17 + $0x110] sm:$0xf]  ;;  %v6189_v8 = vor.u32 %v7955_v1, %v6188_v63  ;;  %v6445_v9 = vor.u32 %v8019_v3, %v6444_v2  ;;  %v4015_v13 = vpop.f32.mrf.mxu0  ;;  %v4041_v1 = vpop.f32.mrf.mxu2 }
 0x282   : > { %v6758_v14 = vld [vmem:[%s8759_s17 + $0xa28] sm:$0xf0]  ;;  %v7811_v7 = vld [vmem:[%s8759_s17 + $0x12c] sm:$0xf0]  ;;  %v4016_v18 = vadd.f32 %v4015_v13, %v9415_v22  ;;  %v4054_v2 = vpop.f32.mrf.mxu3 }
 0x283   : > { %v8166_v21 = vld [vmem:[%s8759_s17 + $0xc4c] sm:$0xf]  ;;  %v6761_v29 = vor.u32 %v8094_v0, %v6758_v14  ;;  %4221 = vmatpush.bf16.msrb.mxu0 %v6505_v28  ;;  %v5868_v0 = vld [vmem:[%s8759_s17 + $0x310] sm:$0xf]  ;;  %v4028_v14 = vpop.f32.mrf.mxu1 }
 0x284   : > { %v7046_v23 = vld [vmem:[%s8759_s17 + $0xc68] sm:$0xf0]  ;;  %v6156_v12 = vld [vmem:[%s8759_s17 + $0x550] sm:$0xf]  ;;  %v4029_v28 = vadd.f32 %v4028_v14, %v4016_v18 }
 0x285   : > { %v8230_v24 = vld [vmem:[%s8759_s17 + $0xe4c] sm:$0xf]  ;;  %v7049_v35 = vor.u32 %v8166_v21, %v7046_v23  ;;  %4234 = vmatpush.bf16.msrb.mxu1 %v6761_v29  ;;  %v5613_v21 = vor.u32 %v7811_v7, %v5612_v6  ;;  %v5869_v23 = vor.u32 %v7875_v11, %v5868_v0  ;;  %v6157_v29 = vor.u32 %v7947_v15, %v6156_v12  ;;  %v6124_v22 = vld [vmem:[%s8759_s17 + $0x510] sm:$0xf] }
 0x286   : > { %v7302_v25 = vld [vmem:[%s8759_s17 + $0xe68] sm:$0xf0]  ;;  %4222 = vmatmul.bf16.vlgmr.msrb.gmra.mxu0 %v9025_v26  ;;  %v5804_v43 = vld [vmem:[%s8759_s17 + $0x290] sm:$0xf]  ;;  %v4042_v6 = vadd.f32 %v4041_v1, %v4029_v28 }
 0x287   : > { %v7305_v36 = vor.u32 %v8230_v24, %v7302_v25  ;;  %v8158_v39 = vld [vmem:[%s8759_s17 + $0xc0c] sm:$0xf]  ;;  %4266 = vmatpush.bf16.msra.mxu0 %v5709_v30  ;;  %4246 = vmatpush.bf16.msrb.mxu2 %v7049_v35  ;;  %v5580_v24 = vld [vmem:[%s8759_s17 + $0xd0] sm:$0xf]  ;;  %v6413_v30 = vor.u32 %v8011_v17, %v6412_v16 }
 0x288   : > { %v7014_v40 = vld [vmem:[%s8759_s17 + $0xc28] sm:$0xf0]  ;;  %4235 = vmatmul.bf16.vlgmr.msrb.gmra.mxu1 %v9027_v27  ;;  %v7803_v25 = vld [vmem:[%s8759_s17 + $0xec] sm:$0xf0]  ;;  %v9480_v12 = vadd.f32 %v4054_v2, %v4042_v6 }
 0x289   : > { %v8222_v41 = vld [vmem:[%s8759_s17 + $0xe0c] sm:$0xf]  ;;  %4279 = vmatpush.bf16.msra.mxu1 %v5965_v31  ;;  %4259 = vmatpush.bf16.msrb.mxu3 %v7305_v36  ;;  %v7017_v55 = vor.u32 %v8158_v39, %v7014_v40  ;;  %v5836_v31 = vld [vmem:[%s8759_s17 + $0x2d0] sm:$0xf]  ;;  %v5581_v36 = vor.u32 %v7803_v25, %v5580_v24  ;;  %v4017_v46 = vpop.f32.mrf.mxu0 }
 0x28a   : > { %v7270_v42 = vld [vmem:[%s8759_s17 + $0xe28] sm:$0xf0]  ;;  %v8003_v35 = vld [vmem:[%s8759_s17 + $0x72c] sm:$0xf0]  ;;  %v5837_v38 = vor.u32 %v7867_v32, %v5836_v31 }
 0x28b   : > { %v7273_v56 = vor.u32 %v8222_v41, %v7270_v42  ;;  %4267 = vmatpush.bf16.msra.mxu0 %v5677_v53  ;;  %4247 = vmatpush.bf16.msrb.mxu2 %v7017_v55  ;;  %v5548_v39 = vld [vmem:[%s8759_s17 + $0x90] sm:$0xf]  ;;  %v6125_v41 = vor.u32 %v7939_v33, %v6124_v22  ;;  %v6381_v42 = vor.u32 %v8003_v35, %v6380_v34  ;;  %v4030_v47 = vpop.f32.mrf.mxu1 }
 0x28c   : > { %v7795_v40 = vld [vmem:[%s8759_s17 + $0xac] sm:$0xf0] }
 0x28d   : > { %4280 = vmatpush.bf16.msra.mxu1 %v5933_v54  ;;  %4260 = vmatpush.bf16.msrb.mxu3 %v7273_v56  ;;  %v6092_v45 = vld [vmem:[%s8759_s17 + $0x4d0] sm:$0xf]  ;;  %v5549_v55 = vor.u32 %v7795_v40, %v5548_v39  ;;  %v5805_v56 = vor.u32 %v7859_v44, %v5804_v43  ;;  %v4056_v39 = vpop.f32.mrf.mxu3 }
 0x28e   : > { %4248 = vmatmul.bf16.vlgmr.msrb.gmra.mxu2 %v9043_v50  ;;  %v7931_v52 = vld [vmem:[%s8759_s17 + $0x4ec] sm:$0xf0] }
 0x28f   : > { %4292 = vmatpush.bf16.msra.mxu2 %v6221_v59  ;;  %4268 = vmatpush.bf16.msra.mxu0 %v5645_v4  ;;  %v6348_v53 = vld [vmem:[%s8759_s17 + $0x6d0] sm:$0xf]  ;;  %v6093_v59 = vor.u32 %v7931_v52, %v6092_v45 }
 0x290   : > { %4261 = vmatmul.bf16.vlgmr.msrb.gmra.mxu3 %v9045_v51  ;;  %v7995_v54 = vld [vmem:[%s8759_s17 + $0x6ec] sm:$0xf0] }
 0x291   : > { %4305 = vmatpush.bf16.msra.mxu3 %v6477_v60  ;;  %4281 = vmatpush.bf16.msra.mxu1 %v5901_v5  ;;  %v5516_v57 = vld [vmem:[%s8759_s17 + $0x50] sm:$0xf]  ;;  %v6349_v60 = vor.u32 %v7995_v54, %v6348_v53 }
 0x292   : > { %v7787_v58 = vld [vmem:[%s8759_s17 + $0x6c] sm:$0xf0] }
 0x293   : > { %4293 = vmatpush.bf16.msra.mxu2 %v6189_v8  ;;  %4269 = vmatpush.bf16.msra.mxu0 %v5613_v21  ;;  %v5772_v61 = vld [vmem:[%s8759_s17 + $0x250] sm:$0xf]  ;;  %v5517_v7 = vor.u32 %v7787_v58, %v5516_v57 }
 0x294   : > { %v7851_v62 = vld [vmem:[%s8759_s17 + $0x26c] sm:$0xf0] }
 0x295   : > { %4306 = vmatpush.bf16.msra.mxu3 %v6445_v9  ;;  %4282 = vmatpush.bf16.msra.mxu1 %v5869_v23  ;;  %v6060_v63 = vld [vmem:[%s8759_s17 + $0x490] sm:$0xf]  ;;  %v5773_v8 = vor.u32 %v7851_v62, %v5772_v61 }
 0x296   : > { %v7923_v3 = vld [vmem:[%s8759_s17 + $0x4ac] sm:$0xf0] }
 0x297   : > { %4294 = vmatpush.bf16.msra.mxu2 %v6157_v29  ;;  %4270 = vmatpush.bf16.msra.mxu0 %v5581_v36  ;;  %v6316_v4 = vld [vmem:[%s8759_s17 + $0x690] sm:$0xf]  ;;  %v6061_v13 = vor.u32 %v7923_v3, %v6060_v63 }
 0x298   : > { %v7987_v5 = vld [vmem:[%s8759_s17 + $0x6ac] sm:$0xf0] }
 0x299   : > { %4307 = vmatpush.bf16.msra.mxu3 %v6413_v30  ;;  %4283 = vmatpush.bf16.msra.mxu1 %v5837_v38  ;;  %v5484_v9 = vld [vmem:[%s8759_s17 + $0x10] sm:$0xf]  ;;  %v6317_v14 = vor.u32 %v7987_v5, %v6316_v4  ;;  %v4043_v38 = vpop.f32.mrf.mxu2  ;;  %v1276_v4 = vperm.slane %v9288_v37, 2  ;;  %v4080_v37 = vpop.f32.mrf.mxu1 }
 0x29a   : > { %v7779_v0 = vld [vmem:[%s8759_s17 + $0x2c] sm:$0xf0] }
 0x29b   : > { %4295 = vmatpush.bf16.msra.mxu2 %v6125_v41  ;;  %4271 = vmatpush.bf16.msra.mxu0 %v5549_v55  ;;  %v5740_v11 = vld [vmem:[%s8759_s17 + $0x210] sm:$0xf]  ;;  %v5485_v29 = vor.u32 %v7779_v0, %v5484_v9 }
 0x29c   : > { %v7843_v15 = vld [vmem:[%s8759_s17 + $0x22c] sm:$0xf0] }
 0x29d   : > { %4308 = vmatpush.bf16.msra.mxu3 %v6381_v42  ;;  %4284 = vmatpush.bf16.msra.mxu1 %v5805_v56  ;;  %v6732_v16 = vld [vmem:[%s8759_s17 + $0x9d0] sm:$0xf]  ;;  %v5741_v30 = vor.u32 %v7843_v15, %v5740_v11  ;;  %v4067_v15 = vpop.f32.mrf.mxu0 }
 0x29e   : > { %v8091_v17 = vld [vmem:[%s8759_s17 + $0x9ec] sm:$0xf0] }
 0x29f   : > { %4296 = vmatpush.bf16.msra.mxu2 %v6093_v59  ;;  %v6988_v18 = vld [vmem:[%s8759_s17 + $0xbd0] sm:$0xf]  ;;  %4272 = vmatpush.bf16.msra.mxu0 %v5517_v7  ;;  %v6733_v31 = vor.u32 %v8091_v17, %v6732_v16 }
 0x2a0   : > { %v8155_v21 = vld [vmem:[%s8759_s17 + $0xbec] sm:$0xf0] }
 0x2a1   : > { %4309 = vmatpush.bf16.msra.mxu3 %v6349_v60  ;;  %v6028_v23 = vld [vmem:[%s8759_s17 + $0x450] sm:$0xf]  ;;  %4285 = vmatpush.bf16.msra.mxu1 %v5773_v8  ;;  %v6989_v32 = vor.u32 %v8155_v21, %v6988_v18  ;;  %v4068_v21 = vadd.f32 %v4067_v15, %v1276_v4 }
 0x2a2   : > { %v7915_v24 = vld [vmem:[%s8759_s17 + $0x46c] sm:$0xf0] }
 0x2a3   : > { %v6284_v25 = vld [vmem:[%s8759_s17 + $0x650] sm:$0xf]  ;;  %4297 = vmatpush.bf16.msra.mxu2 %v6061_v13  ;;  %v6029_v35 = vor.u32 %v7915_v24, %v6028_v23  ;;  %4273 = vmatpush.bf16.msra.mxu0 %v5485_v29  ;;  %v4081_v29 = vadd.f32 %v4080_v37, %v4068_v21  ;;  %v7895_v21 = vld [vmem:[%s8759_s17 + $0x3d4] sm:$0xf] }
 0x2a4   : > { %v7979_v28 = vld [vmem:[%s8759_s17 + $0x66c] sm:$0xf0] }
 0x2a5   : > { %4310 = vmatpush.bf16.msra.mxu3 %v6317_v14  ;;  %v6700_v22 = vld [vmem:[%s8759_s17 + $0x990] sm:$0xf]  ;;  %v6285_v36 = vor.u32 %v7979_v28, %v6284_v25  ;;  %4286 = vmatpush.bf16.msra.mxu1 %v5741_v30 }
 0x2a6   : > { %v8083_v33 = vld [vmem:[%s8759_s17 + $0x9ac] sm:$0xf0]  ;;  %4274 = vmatmul.bf16.vlgmr.msra.gmra.mxu0 %v8978_v19 }
 0x2a7   : > { %v6956_v34 = vld [vmem:[%s8759_s17 + $0xb90] sm:$0xf]  ;;  %4318 = vmatpush.bf16.msrb.mxu0 %v6733_v31  ;;  %v6701_v53 = vor.u32 %v8083_v33, %v6700_v22  ;;  %4298 = vmatpush.bf16.msra.mxu2 %v6029_v35 }
 0x2a8   : > { %v8147_v40 = vld [vmem:[%s8759_s17 + $0xbac] sm:$0xf0]  ;;  %4287 = vmatmul.bf16.vlgmr.msra.gmra.mxu1 %v8980_v20 }
 0x2a9   : > { %v5996_v41 = vld [vmem:[%s8759_s17 + $0x410] sm:$0xf]  ;;  %4331 = vmatpush.bf16.msrb.mxu1 %v6989_v32  ;;  %v6957_v54 = vor.u32 %v8147_v40, %v6956_v34  ;;  %4311 = vmatpush.bf16.msra.mxu3 %v6285_v36 }
 0x2aa   : > { %v7907_v42 = vld [vmem:[%s8759_s17 + $0x42c] sm:$0xf0] }
 0x2ab   : > { %v6252_v43 = vld [vmem:[%s8759_s17 + $0x610] sm:$0xf]  ;;  %v5997_v55 = vor.u32 %v7907_v42, %v5996_v41  ;;  %4319 = vmatpush.bf16.msrb.mxu0 %v6701_v53 }
 0x2ac   : > { %v7971_v44 = vld [vmem:[%s8759_s17 + $0x62c] sm:$0xf0] }
 0x2ad   : > { %v7244_v45 = vld [vmem:[%s8759_s17 + $0xdd0] sm:$0xf]  ;;  %v6253_v56 = vor.u32 %v7971_v44, %v6252_v43  ;;  %4332 = vmatpush.bf16.msrb.mxu1 %v6957_v54  ;;  %4299 = vmatpush.bf16.msra.mxu2 %v5997_v55 }
 0x2ae   : > { %v8219_v46 = vld [vmem:[%s8759_s17 + $0xdec] sm:$0xf0] }
 0x2af   : > { %v7500_v47 = vld [vmem:[%s8759_s17 + $0xfd0] sm:$0xf]  ;;  %v7245_v59 = vor.u32 %v8219_v46, %v7244_v45  ;;  %4312 = vmatpush.bf16.msra.mxu3 %v6253_v56 }
 0x2b0   : > { %v8283_v52 = vld [vmem:[%s8759_s17 + $0xfec] sm:$0xf0]  ;;  %4300 = vmatmul.bf16.vlgmr.msra.gmra.mxu2 %v8998_v48 }
 0x2b1   : > { %v6668_v57 = vld [vmem:[%s8759_s17 + $0x950] sm:$0xf]  ;;  %v7501_v60 = vor.u32 %v8283_v52, %v7500_v47  ;;  %4344 = vmatpush.bf16.msrb.mxu2 %v7245_v59  ;;  %v4069_v47 = vpop.f32.mrf.mxu0  ;;  %v4082_v52 = vpop.f32.mrf.mxu1 }
 0x2b2   : > { %v8075_v58 = vld [vmem:[%s8759_s17 + $0x96c] sm:$0xf0]  ;;  %4313 = vmatmul.bf16.vlgmr.msra.gmra.mxu3 %v9000_v49  ;;  %v6222_v47 = vld [vmem:[%s8759_s17 + $0x5f0] sm:$0xf0] }
 0x2b3   : > { %v6924_v61 = vld [vmem:[%s8759_s17 + $0xb50] sm:$0xf]  ;;  %v6669_v5 = vor.u32 %v8075_v58, %v6668_v57  ;;  %4357 = vmatpush.bf16.msrb.mxu3 %v7501_v60  ;;  %v8023_v52 = vld [vmem:[%s8759_s17 + $0x7d4] sm:$0xf] }
 0x2b4   : > { %v8139_v62 = vld [vmem:[%s8759_s17 + $0xb6c] sm:$0xf0] }
 0x2b5   : > { %v7212_v63 = vld [vmem:[%s8759_s17 + $0xd90] sm:$0xf]  ;;  %v6925_v6 = vor.u32 %v8139_v62, %v6924_v61  ;;  %4320 = vmatpush.bf16.msrb.mxu0 %v6669_v5 }
 0x2b6   : > { %v8211_v1 = vld [vmem:[%s8759_s17 + $0xdac] sm:$0xf0] }
 0x2b7   : > { %v7468_v2 = vld [vmem:[%s8759_s17 + $0xf90] sm:$0xf]  ;;  %v7213_v9 = vor.u32 %v8211_v1, %v7212_v63  ;;  %4333 = vmatpush.bf16.msrb.mxu1 %v6925_v6 }
 0x2b8   : > { %v8275_v3 = vld [vmem:[%s8759_s17 + $0xfac] sm:$0xf0] }
 0x2b9   : > { %v6636_v7 = vld [vmem:[%s8759_s17 + $0x910] sm:$0xf]  ;;  %v7469_v0 = vor.u32 %v8275_v3, %v7468_v2  ;;  %4345 = vmatpush.bf16.msrb.mxu2 %v7213_v9  ;;  %v4093_v2 = vpop.f32.mrf.mxu2  ;;  %v4106_v3 = vpop.f32.mrf.mxu3 }
 0x2ba   : > { %v8067_v8 = vld [vmem:[%s8759_s17 + $0x92c] sm:$0xf0] }
 0x2bb   : > { %v6892_v11 = vld [vmem:[%s8759_s17 + $0xb10] sm:$0xf]  ;;  %v6637_v23 = vor.u32 %v8067_v8, %v6636_v7  ;;  %4358 = vmatpush.bf16.msrb.mxu3 %v7469_v0  ;;  %v4094_v7 = vadd.f32 %v4093_v2, %v4081_v29  ;;  %v6190_v2 = vld [vmem:[%s8759_s17 + $0x5b0] sm:$0xf0] }
 0x2bc   : > { %v8131_v13 = vld [vmem:[%s8759_s17 + $0xb2c] sm:$0xf0] }
 0x2bd   : > { %v7180_v14 = vld [vmem:[%s8759_s17 + $0xd50] sm:$0xf]  ;;  %v6893_v24 = vor.u32 %v8131_v13, %v6892_v11  ;;  %4321 = vmatpush.bf16.msrb.mxu0 %v6637_v23  ;;  %v5966_v23 = vld [vmem:[%s8759_s17 + $0x3f0] sm:$0xf0] }
 0x2be   : > { %v8203_v16 = vld [vmem:[%s8759_s17 + $0xd6c] sm:$0xf0] }
 0x2bf   : > { %v7436_v17 = vld [vmem:[%s8759_s17 + $0xf50] sm:$0xf]  ;;  %v7181_v30 = vor.u32 %v8203_v16, %v7180_v14  ;;  %4334 = vmatpush.bf16.msrb.mxu1 %v6893_v24  ;;  %v9551_v14 = vadd.f32 %v4106_v3, %v4094_v7  ;;  %v8015_v3 = vld [vmem:[%s8759_s17 + $0x794] sm:$0xf] }
 0x2c0   : > { %v8267_v18 = vld [vmem:[%s8759_s17 + $0xf6c] sm:$0xf0]  ;;  %v7807_v7 = vld [vmem:[%s8759_s17 + $0x114] sm:$0xf] }
 0x2c1   : > { %v6604_v25 = vld [vmem:[%s8759_s17 + $0x8d0] sm:$0xf]  ;;  %v7437_v31 = vor.u32 %v8267_v18, %v7436_v17  ;;  %4346 = vmatpush.bf16.msrb.mxu2 %v7181_v30  ;;  %v7831_v17 = vld [vmem:[%s8759_s17 + $0x1d4] sm:$0xf] }
 0x2c2   : > { %v8059_v28 = vld [vmem:[%s8759_s17 + $0x8ec] sm:$0xf0]  ;;  %v5710_v18 = vld [vmem:[%s8759_s17 + $0x1f0] sm:$0xf0] }
 0x2c3   : > { %v6860_v32 = vld [vmem:[%s8759_s17 + $0xad0] sm:$0xf]  ;;  %v6605_v38 = vor.u32 %v8059_v28, %v6604_v25  ;;  %4359 = vmatpush.bf16.msrb.mxu3 %v7437_v31 }
 0x2c4   : > { %v8123_v22 = vld [vmem:[%s8759_s17 + $0xaec] sm:$0xf0] }
 0x2c5   : > { %v7148_v33 = vld [vmem:[%s8759_s17 + $0xd10] sm:$0xf]  ;;  %v6861_v39 = vor.u32 %v8123_v22, %v6860_v32  ;;  %4322 = vmatpush.bf16.msrb.mxu0 %v6605_v38  ;;  %v5713_v32 = vor.u32 %v7831_v17, %v5710_v18  ;;  %v5969_v22 = vor.u32 %v7895_v21, %v5966_v23  ;;  %v6158_v17 = vld [vmem:[%s8759_s17 + $0x570] sm:$0xf0] }
 0x2c6   : > { %v8195_v34 = vld [vmem:[%s8759_s17 + $0xd2c] sm:$0xf0]  ;;  %v8007_v18 = vld [vmem:[%s8759_s17 + $0x754] sm:$0xf] }
 0x2c7   : > { %v7404_v35 = vld [vmem:[%s8759_s17 + $0xf10] sm:$0xf]  ;;  %v7149_v42 = vor.u32 %v8195_v34, %v7148_v33  ;;  %4335 = vmatpush.bf16.msrb.mxu1 %v6861_v39  ;;  %v7823_v33 = vld [vmem:[%s8759_s17 + $0x194] sm:$0xf]  ;;  %v4095_v39 = vpop.f32.mrf.mxu2 }
 0x2c8   : > { %v8259_v36 = vld [vmem:[%s8759_s17 + $0xf2c] sm:$0xf0]  ;;  %v5678_v34 = vld [vmem:[%s8759_s17 + $0x1b0] sm:$0xf0] }
 0x2c9   : > { %v6572_v40 = vld [vmem:[%s8759_s17 + $0x890] sm:$0xf]  ;;  %v7405_v43 = vor.u32 %v8259_v36, %v7404_v35  ;;  %4347 = vmatpush.bf16.msrb.mxu2 %v7149_v42  ;;  %v7887_v35 = vld [vmem:[%s8759_s17 + $0x394] sm:$0xf] }
 0x2ca   : > { %v8051_v41 = vld [vmem:[%s8759_s17 + $0x8ac] sm:$0xf0]  ;;  %v6414_v21 = vld [vmem:[%s8759_s17 + $0x770] sm:$0xf0] }
 0x2cb   : > { %v6828_v44 = vld [vmem:[%s8759_s17 + $0xa90] sm:$0xf]  ;;  %v6573_v56 = vor.u32 %v8051_v41, %v6572_v40  ;;  %4360 = vmatpush.bf16.msrb.mxu3 %v7405_v43  ;;  %v4108_v40 = vpop.f32.mrf.mxu3  ;;  %v5934_v41 = vld [vmem:[%s8759_s17 + $0x3b0] sm:$0xf0] }
 0x2cc   : > { %v8115_v45 = vld [vmem:[%s8759_s17 + $0xaac] sm:$0xf0]  ;;  %v7791_v40 = vld [vmem:[%s8759_s17 + $0x94] sm:$0xf] }
 0x2cd   : > { %v7116_v46 = vld [vmem:[%s8759_s17 + $0xcd0] sm:$0xf]  ;;  %v6829_v57 = vor.u32 %v8115_v45, %v6828_v44  ;;  %4323 = vmatpush.bf16.msrb.mxu0 %v6573_v56 }
 0x2ce   : > { %v8187_v53 = vld [vmem:[%s8759_s17 + $0xcec] sm:$0xf0] }
 0x2cf   : > { %v7372_v54 = vld [vmem:[%s8759_s17 + $0xed0] sm:$0xf]  ;;  %v7117_v60 = vor.u32 %v8187_v53, %v7116_v46  ;;  %4336 = vmatpush.bf16.msrb.mxu1 %v6829_v57  ;;  %v7959_v46 = vld [vmem:[%s8759_s17 + $0x5d4] sm:$0xf] }
 0x2d0   : > { %v8251_v55 = vld [vmem:[%s8759_s17 + $0xeec] sm:$0xf0]  ;;  %v6478_v53 = vld [vmem:[%s8759_s17 + $0x7f0] sm:$0xf0] }
 0x2d1   : > { %v6540_v58 = vld [vmem:[%s8759_s17 + $0x850] sm:$0xf]  ;;  %v7373_v61 = vor.u32 %v8251_v55, %v7372_v54  ;;  %4348 = vmatpush.bf16.msrb.mxu2 %v7117_v60  ;;  %v5681_v54 = vor.u32 %v7823_v33, %v5678_v34  ;;  %v5937_v55 = vor.u32 %v7887_v35, %v5934_v41  ;;  %v6225_v60 = vor.u32 %v7959_v46, %v6222_v47  ;;  %v5838_v33 = vld [vmem:[%s8759_s17 + $0x2f0] sm:$0xf0] }
 0x2d2   : > { %v8043_v59 = vld [vmem:[%s8759_s17 + $0x86c] sm:$0xf0]  ;;  %v6126_v34 = vld [vmem:[%s8759_s17 + $0x530] sm:$0xf0] }
 0x2d3   : > { %v6796_v62 = vld [vmem:[%s8759_s17 + $0xa50] sm:$0xf]  ;;  %v6541_v8 = vor.u32 %v8043_v59, %v6540_v58  ;;  %4361 = vmatpush.bf16.msrb.mxu3 %v7373_v61  ;;  %v7815_v58 = vld [vmem:[%s8759_s17 + $0x154] sm:$0xf]  ;;  %v6481_v61 = vor.u32 %v8023_v52, %v6478_v53 }
 0x2d4   : > { %v8107_v63 = vld [vmem:[%s8759_s17 + $0xa6c] sm:$0xf0]  ;;  %v5646_v59 = vld [vmem:[%s8759_s17 + $0x170] sm:$0xf0] }
 0x2d5   : > { %v7084_v1 = vld [vmem:[%s8759_s17 + $0xc90] sm:$0xf]  ;;  %v6797_v9 = vor.u32 %v8107_v63, %v6796_v62  ;;  %4324 = vmatpush.bf16.msrb.mxu0 %v6541_v8  ;;  %v7879_v62 = vld [vmem:[%s8759_s17 + $0x354] sm:$0xf] }
 0x2d6   : > { %v8179_v4 = vld [vmem:[%s8759_s17 + $0xcac] sm:$0xf0]  ;;  %v5902_v63 = vld [vmem:[%s8759_s17 + $0x370] sm:$0xf0] }
 0x2d7   : > { %v7340_v5 = vld [vmem:[%s8759_s17 + $0xe90] sm:$0xf]  ;;  %v7085_v15 = vor.u32 %v8179_v4, %v7084_v1  ;;  %4337 = vmatpush.bf16.msrb.mxu1 %v6797_v9  ;;  %v7951_v1 = vld [vmem:[%s8759_s17 + $0x594] sm:$0xf] }
 0x2d8   : > { %v8243_v6 = vld [vmem:[%s8759_s17 + $0xeac] sm:$0xf0]  ;;  %v6446_v4 = vld [vmem:[%s8759_s17 + $0x7b0] sm:$0xf0]  ;;  %v6193_v9 = vor.u32 %v7951_v1, %v6190_v2  ;;  %v4145_v2 = vpop.f32.mrf.mxu2 }
 0x2d9   : > { %v6508_v0 = vld [vmem:[%s8759_s17 + $0x810] sm:$0xf]  ;;  %v7341_v37 = vor.u32 %v8243_v6, %v7340_v5  ;;  %4349 = vmatpush.bf16.msrb.mxu2 %v7085_v15  ;;  %v5649_v5 = vor.u32 %v7815_v58, %v5646_v59  ;;  %v5905_v6 = vor.u32 %v7879_v62, %v5902_v63  ;;  %v5614_v8 = vld [vmem:[%s8759_s17 + $0x130] sm:$0xf0] }
 0x2da   : > { %v8035_v11 = vld [vmem:[%s8759_s17 + $0x82c] sm:$0xf0]  ;;  %v7943_v15 = vld [vmem:[%s8759_s17 + $0x554] sm:$0xf] }
 0x2db   : > { %v6764_v13 = vld [vmem:[%s8759_s17 + $0xa10] sm:$0xf]  ;;  %v6509_v30 = vor.u32 %v8035_v11, %v6508_v0  ;;  %4362 = vmatpush.bf16.msrb.mxu3 %v7341_v37  ;;  %v6449_v0 = vor.u32 %v8015_v3, %v6446_v4  ;;  %v7871_v11 = vld [vmem:[%s8759_s17 + $0x314] sm:$0xf]  ;;  %v4119_v37 = vpop.f32.mrf.mxu0  ;;  %v4158_v3 = vpop.f32.mrf.mxu3 }
 0x2dc   : > { %v8099_v16 = vld [vmem:[%s8759_s17 + $0xa2c] sm:$0xf0]  ;;  %v4120_v23 = vadd.f32 %v4119_v37, %v9551_v14  ;;  %v7935_v14 = vld [vmem:[%s8759_s17 + $0x514] sm:$0xf] }
 0x2dd   : > { %v7052_v24 = vld [vmem:[%s8759_s17 + $0xc50] sm:$0xf]  ;;  %v6765_v31 = vor.u32 %v8099_v16, %v6764_v13  ;;  %4325 = vmatpush.bf16.msrb.mxu0 %v6509_v30  ;;  %v5870_v13 = vld [vmem:[%s8759_s17 + $0x330] sm:$0xf0]  ;;  %v4132_v16 = vpop.f32.mrf.mxu1 }
 0x2de   : > { %v8171_v25 = vld [vmem:[%s8759_s17 + $0xc6c] sm:$0xf0]  ;;  %v4133_v30 = vadd.f32 %v4132_v16, %v4120_v23  ;;  %v7999_v35 = vld [vmem:[%s8759_s17 + $0x714] sm:$0xf] }
 0x2df   : > { %v7308_v28 = vld [vmem:[%s8759_s17 + $0xe50] sm:$0xf]  ;;  %v7053_v36 = vor.u32 %v8171_v25, %v7052_v24  ;;  %4338 = vmatpush.bf16.msrb.mxu1 %v6765_v31  ;;  %v5617_v24 = vor.u32 %v7807_v7, %v5614_v8  ;;  %v5873_v25 = vor.u32 %v7871_v11, %v5870_v13  ;;  %v6161_v31 = vor.u32 %v7943_v15, %v6158_v17  ;;  %v5550_v41 = vld [vmem:[%s8759_s17 + $0xb0] sm:$0xf0] }
 0x2e0   : > { %v8235_v29 = vld [vmem:[%s8759_s17 + $0xe6c] sm:$0xf0]  ;;  %4326 = vmatmul.bf16.vlgmr.msrb.gmra.mxu0 %v9025_v26  ;;  %v7927_v46 = vld [vmem:[%s8759_s17 + $0x4d4] sm:$0xf]  ;;  %v4146_v7 = vadd.f32 %v4145_v2, %v4133_v30 }
 0x2e1   : > { %v7309_v38 = vor.u32 %v8235_v29, %v7308_v28  ;;  %v7020_v42 = vld [vmem:[%s8759_s17 + $0xc10] sm:$0xf]  ;;  %4370 = vmatpush.bf16.msra.mxu0 %v5713_v32  ;;  %4350 = vmatpush.bf16.msrb.mxu2 %v7053_v36  ;;  %v7799_v28 = vld [vmem:[%s8759_s17 + $0xd4] sm:$0xf]  ;;  %v6417_v32 = vor.u32 %v8007_v18, %v6414_v21 }
 0x2e2   : > { %v8163_v43 = vld [vmem:[%s8759_s17 + $0xc2c] sm:$0xf0]  ;;  %4339 = vmatmul.bf16.vlgmr.msrb.gmra.mxu1 %v9027_v27  ;;  %v5582_v29 = vld [vmem:[%s8759_s17 + $0xf0] sm:$0xf0]  ;;  %v9622_v15 = vadd.f32 %v4158_v3, %v4146_v7 }
 0x2e3   : > { %v7276_v44 = vld [vmem:[%s8759_s17 + $0xe10] sm:$0xf]  ;;  %4383 = vmatpush.bf16.msra.mxu1 %v5969_v22  ;;  %4363 = vmatpush.bf16.msrb.mxu3 %v7309_v38  ;;  %v7021_v56 = vor.u32 %v8163_v43, %v7020_v42  ;;  %v7863_v22 = vld [vmem:[%s8759_s17 + $0x2d4] sm:$0xf]  ;;  %v5585_v38 = vor.u32 %v7799_v28, %v5582_v29  ;;  %v6129_v42 = vor.u32 %v7935_v14, %v6126_v34  ;;  %v4121_v47 = vpop.f32.mrf.mxu0 }
 0x2e4   : > { %v8227_v45 = vld [vmem:[%s8759_s17 + $0xe2c] sm:$0xf0]  ;;  %v6382_v36 = vld [vmem:[%s8759_s17 + $0x730] sm:$0xf0]  ;;  %v5841_v39 = vor.u32 %v7863_v22, %v5838_v33 }
 0x2e5   : > { %v7277_v57 = vor.u32 %v8227_v45, %v7276_v44  ;;  %4371 = vmatpush.bf16.msra.mxu0 %v5681_v54  ;;  %4351 = vmatpush.bf16.msrb.mxu2 %v7021_v56  ;;  %v6385_v43 = vor.u32 %v7999_v35, %v6382_v36  ;;  %v7855_v44 = vld [vmem:[%s8759_s17 + $0x294] sm:$0xf]  ;;  %v4134_v52 = vpop.f32.mrf.mxu1  ;;  %v5553_v56 = vor.u32 %v7791_v40, %v5550_v41  ;;  %v4160_v40 = vpop.f32.mrf.mxu3 }
 0x2e6   : > { %v5806_v45 = vld [vmem:[%s8759_s17 + $0x2b0] sm:$0xf0] }
 0x2e7   : > { %4384 = vmatpush.bf16.msra.mxu1 %v5937_v55  ;;  %4364 = vmatpush.bf16.msrb.mxu3 %v7277_v57  ;;  %v6094_v53 = vld [vmem:[%s8759_s17 + $0x4f0] sm:$0xf0]  ;;  %v5809_v57 = vor.u32 %v7855_v44, %v5806_v45 }
 0x2e8   : > { %4352 = vmatmul.bf16.vlgmr.msrb.gmra.mxu2 %v9043_v50  ;;  %v7991_v54 = vld [vmem:[%s8759_s17 + $0x6d4] sm:$0xf] }
 0x2e9   : > { %4396 = vmatpush.bf16.msra.mxu2 %v6225_v60  ;;  %4372 = vmatpush.bf16.msra.mxu0 %v5649_v5  ;;  %v6350_v55 = vld [vmem:[%s8759_s17 + $0x6f0] sm:$0xf0]  ;;  %v6097_v60 = vor.u32 %v7927_v46, %v6094_v53 }
 0x2ea   : > { %4365 = vmatmul.bf16.vlgmr.msrb.gmra.mxu3 %v9045_v51  ;;  %v7783_v58 = vld [vmem:[%s8759_s17 + $0x54] sm:$0xf] }
 0x2eb   : > { %4409 = vmatpush.bf16.msra.mxu3 %v6481_v61  ;;  %4385 = vmatpush.bf16.msra.mxu1 %v5905_v6  ;;  %v5518_v59 = vld [vmem:[%s8759_s17 + $0x70] sm:$0xf0]  ;;  %v6353_v61 = vor.u32 %v7991_v54, %v6350_v55 }
 0x2ec   : > { %v7847_v62 = vld [vmem:[%s8759_s17 + $0x254] sm:$0xf]  ;;  %v5521_v8 = vor.u32 %v7783_v58, %v5518_v59 }
 0x2ed   : > { %4397 = vmatpush.bf16.msra.mxu2 %v6193_v9  ;;  %4373 = vmatpush.bf16.msra.mxu0 %v5617_v24  ;;  %v5774_v63 = vld [vmem:[%s8759_s17 + $0x270] sm:$0xf0] }
 0x2ee   : > { %v7919_v1 = vld [vmem:[%s8759_s17 + $0x494] sm:$0xf]  ;;  %v5777_v9 = vor.u32 %v7847_v62, %v5774_v63 }
 0x2ef   : > { %4410 = vmatpush.bf16.msra.mxu3 %v6449_v0  ;;  %4386 = vmatpush.bf16.msra.mxu1 %v5873_v25  ;;  %v6062_v4 = vld [vmem:[%s8759_s17 + $0x4b0] sm:$0xf0] }
 0x2f0   : > { %v7983_v5 = vld [vmem:[%s8759_s17 + $0x694] sm:$0xf]  ;;  %v6065_v37 = vor.u32 %v7919_v1, %v6062_v4 }
 0x2f1   : > { %4398 = vmatpush.bf16.msra.mxu2 %v6161_v31  ;;  %4374 = vmatpush.bf16.msra.mxu0 %v5585_v38  ;;  %v6318_v6 = vld [vmem:[%s8759_s17 + $0x6b0] sm:$0xf0] }
 0x2f2   : > { %v7775_v0 = vld [vmem:[%s8759_s17 + $0x14] sm:$0xf]  ;;  %v6321_v16 = vor.u32 %v7983_v5, %v6318_v6  ;;  %v9656_v5 = vld [vmem:[%s9285_s15] sm:$0xff] }
 0x2f3   : > { %4411 = vmatpush.bf16.msra.mxu3 %v6417_v32  ;;  %4387 = vmatpush.bf16.msra.mxu1 %v5841_v39  ;;  %v5486_v11 = vld [vmem:[%s8759_s17 + $0x30] sm:$0xf0]  ;;  %v4147_v39 = vpop.f32.mrf.mxu2  ;;  %v1277_v6 = vperm.slane %v9656_v5, 3 }
 0x2f4   : > { %v7839_v13 = vld [vmem:[%s8759_s17 + $0x214] sm:$0xf]  ;;  %v5489_v31 = vor.u32 %v7775_v0, %v5486_v11 }
 0x2f5   : > { %4399 = vmatpush.bf16.msra.mxu2 %v6129_v42  ;;  %4375 = vmatpush.bf16.msra.mxu0 %v5553_v56  ;;  %v5742_v17 = vld [vmem:[%s8759_s17 + $0x230] sm:$0xf0] }
 0x2f6   : > { %v8087_v18 = vld [vmem:[%s8759_s17 + $0x9d4] sm:$0xf]  ;;  %v5745_v32 = vor.u32 %v7839_v13, %v5742_v17 }
 0x2f7   : > { %4412 = vmatpush.bf16.msra.mxu3 %v6385_v43  ;;  %4388 = vmatpush.bf16.msra.mxu1 %v5809_v57  ;;  %v6734_v21 = vld [vmem:[%s8759_s17 + $0x9f0] sm:$0xf0] }
 0x2f8   : > { %v8151_v23 = vld [vmem:[%s8759_s17 + $0xbd4] sm:$0xf]  ;;  %v6737_v22 = vor.u32 %v8087_v18, %v6734_v21  ;;  %v4171_v18 = vpop.f32.mrf.mxu0  ;;  %v4184_v21 = vpop.f32.mrf.mxu1 }
 0x2f9   : > { %4400 = vmatpush.bf16.msra.mxu2 %v6097_v60  ;;  %v6990_v24 = vld [vmem:[%s8759_s17 + $0xbf0] sm:$0xf0]  ;;  %4376 = vmatpush.bf16.msra.mxu0 %v5521_v8 }
 0x2fa   : > { %v7911_v25 = vld [vmem:[%s8759_s17 + $0x454] sm:$0xf]  ;;  %v6993_v33 = vor.u32 %v8151_v23, %v6990_v24 }
 0x2fb   : > { %4413 = vmatpush.bf16.msra.mxu3 %v6353_v61  ;;  %v6030_v28 = vld [vmem:[%s8759_s17 + $0x470] sm:$0xf0]  ;;  %4389 = vmatpush.bf16.msra.mxu1 %v5777_v9 }
 0x2fc   : > { %v7975_v29 = vld [vmem:[%s8759_s17 + $0x654] sm:$0xf]  ;;  %v6033_v36 = vor.u32 %v7911_v25, %v6030_v28  ;;  %v4172_v28 = vadd.f32 %v4171_v18, %v1277_v6  ;;  %v4197_v6 = vpop.f32.mrf.mxu2 }
 0x2fd   : > { %v6286_v30 = vld [vmem:[%s8759_s17 + $0x670] sm:$0xf0]  ;;  %4401 = vmatpush.bf16.msra.mxu2 %v6065_v37  ;;  %4377 = vmatpush.bf16.msra.mxu0 %v5489_v31 }
 0x2fe   : > { %v8079_v14 = vld [vmem:[%s8759_s17 + $0x994] sm:$0xf]  ;;  %v6289_v38 = vor.u32 %v7975_v29, %v6286_v30 }
 0x2ff   : > { %4414 = vmatpush.bf16.msra.mxu3 %v6321_v16  ;;  %v6702_v34 = vld [vmem:[%s8759_s17 + $0x9b0] sm:$0xf0]  ;;  %4390 = vmatpush.bf16.msra.mxu1 %v5745_v32 }
 0x300   : > { %v8143_v35 = vld [vmem:[%s8759_s17 + $0xb94] sm:$0xf]  ;;  %v6705_v54 = vor.u32 %v8079_v14, %v6702_v34  ;;  %4378 = vmatmul.bf16.vlgmr.msra.gmra.mxu0 %v8978_v19 }
 0x301   : > { %v6958_v41 = vld [vmem:[%s8759_s17 + $0xbb0] sm:$0xf0]  ;;  %4422 = vmatpush.bf16.msrb.mxu0 %v6737_v22  ;;  %4402 = vmatpush.bf16.msra.mxu2 %v6033_v36  ;;  %v4185_v22 = vadd.f32 %v4184_v21, %v4172_v28  ;;  %v5716_v28 = vld [vmem:[%s8759_s17 + $0x1d8] sm:$0xf] }
 0x302   : > { %v7903_v42 = vld [vmem:[%s8759_s17 + $0x414] sm:$0xf]  ;;  %v6961_v55 = vor.u32 %v8143_v35, %v6958_v41  ;;  %4391 = vmatmul.bf16.vlgmr.msra.gmra.mxu1 %v8980_v20 }
 0x303   : > { %v5998_v43 = vld [vmem:[%s8759_s17 + $0x430] sm:$0xf0]  ;;  %4435 = vmatpush.bf16.msrb.mxu1 %v6993_v33  ;;  %4415 = vmatpush.bf16.msra.mxu3 %v6289_v38 }
 0x304   : > { %v7967_v44 = vld [vmem:[%s8759_s17 + $0x614] sm:$0xf]  ;;  %v6001_v56 = vor.u32 %v7903_v42, %v5998_v43 }
 0x305   : > { %v6254_v45 = vld [vmem:[%s8759_s17 + $0x630] sm:$0xf0]  ;;  %4423 = vmatpush.bf16.msrb.mxu0 %v6705_v54  ;;  %v4173_v54 = vpop.f32.mrf.mxu0 }
 0x306   : > { %v8215_v46 = vld [vmem:[%s8759_s17 + $0xdd4] sm:$0xf]  ;;  %v6257_v57 = vor.u32 %v7967_v44, %v6254_v45  ;;  %4403 = vmatpush.bf16.msra.mxu2 %v6001_v56 }
 0x307   : > { %v7246_v47 = vld [vmem:[%s8759_s17 + $0xdf0] sm:$0xf0]  ;;  %4436 = vmatpush.bf16.msrb.mxu1 %v6961_v55  ;;  %v4186_v55 = vpop.f32.mrf.mxu1 }
 0x308   : > { %v8279_v52 = vld [vmem:[%s8759_s17 + $0xfd4] sm:$0xf]  ;;  %v7249_v60 = vor.u32 %v8215_v46, %v7246_v47  ;;  %4416 = vmatpush.bf16.msra.mxu3 %v6257_v57  ;;  %v6228_v55 = vld [vmem:[%s8759_s17 + $0x5d8] sm:$0xf] }
 0x309   : > { %v7502_v53 = vld [vmem:[%s8759_s17 + $0xff0] sm:$0xf0]  ;;  %4404 = vmatmul.bf16.vlgmr.msra.gmra.mxu2 %v8998_v48 }
 0x30a   : > { %v8071_v58 = vld [vmem:[%s8759_s17 + $0x954] sm:$0xf]  ;;  %v7505_v61 = vor.u32 %v8279_v52, %v7502_v53  ;;  %4448 = vmatpush.bf16.msrb.mxu2 %v7249_v60 }
 0x30b   : > { %v6670_v59 = vld [vmem:[%s8759_s17 + $0x970] sm:$0xf0]  ;;  %4417 = vmatmul.bf16.vlgmr.msra.gmra.mxu3 %v9000_v49 }
 0x30c   : > { %v8135_v62 = vld [vmem:[%s8759_s17 + $0xb54] sm:$0xf]  ;;  %v6673_v7 = vor.u32 %v8071_v58, %v6670_v59  ;;  %4461 = vmatpush.bf16.msrb.mxu3 %v7505_v61 }
 0x30d   : > { %v6926_v63 = vld [vmem:[%s8759_s17 + $0xb70] sm:$0xf0] }
 0x30e   : > { %v8207_v1 = vld [vmem:[%s8759_s17 + $0xd94] sm:$0xf]  ;;  %v6929_v8 = vor.u32 %v8135_v62, %v6926_v63  ;;  %4424 = vmatpush.bf16.msrb.mxu0 %v6673_v7  ;;  %v4210_v7 = vpop.f32.mrf.mxu3 }
 0x30f   : > { %v7214_v2 = vld [vmem:[%s8759_s17 + $0xdb0] sm:$0xf0] }
 0x310   : > { %v8271_v3 = vld [vmem:[%s8759_s17 + $0xf94] sm:$0xf]  ;;  %v7217_v11 = vor.u32 %v8207_v1, %v7214_v2  ;;  %4437 = vmatpush.bf16.msrb.mxu1 %v6929_v8 }
 0x311   : > { %v7470_v4 = vld [vmem:[%s8759_s17 + $0xfb0] sm:$0xf0] }
 0x312   : > { %v8063_v9 = vld [vmem:[%s8759_s17 + $0x914] sm:$0xf]  ;;  %v7473_v13 = vor.u32 %v8271_v3, %v7470_v4  ;;  %4449 = vmatpush.bf16.msrb.mxu2 %v7217_v11  ;;  %v4198_v11 = vadd.f32 %v4197_v6, %v4185_v22  ;;  %v7884_v6 = vld [vmem:[%s8759_s17 + $0x374] sm:$0xf0] }
 0x313   : > { %v6638_v0 = vld [vmem:[%s8759_s17 + $0x930] sm:$0xf0] }
 0x314   : > { %v8127_v37 = vld [vmem:[%s8759_s17 + $0xb14] sm:$0xf]  ;;  %v6641_v29 = vor.u32 %v8063_v9, %v6638_v0  ;;  %4462 = vmatpush.bf16.msrb.mxu3 %v7473_v13  ;;  %v9696_v21 = vadd.f32 %v4210_v7, %v4198_v11  ;;  %v6196_v7 = vld [vmem:[%s8759_s17 + $0x598] sm:$0xf] }
 0x315   : > { %v6894_v16 = vld [vmem:[%s8759_s17 + $0xb30] sm:$0xf0] }
 0x316   : > { %v8199_v17 = vld [vmem:[%s8759_s17 + $0xd54] sm:$0xf]  ;;  %v6897_v30 = vor.u32 %v8127_v37, %v6894_v16  ;;  %4425 = vmatpush.bf16.msrb.mxu0 %v6641_v29  ;;  %v7836_v29 = vld [vmem:[%s8759_s17 + $0x1f4] sm:$0xf0] }
 0x317   : > { %v7182_v23 = vld [vmem:[%s8759_s17 + $0xd70] sm:$0xf0] }
 0x318   : > { %v8263_v24 = vld [vmem:[%s8759_s17 + $0xf54] sm:$0xf]  ;;  %v7185_v33 = vor.u32 %v8199_v17, %v7182_v23  ;;  %4438 = vmatpush.bf16.msrb.mxu1 %v6897_v30  ;;  %v5972_v30 = vld [vmem:[%s8759_s17 + $0x3d8] sm:$0xf] }
 0x319   : > { %v7438_v25 = vld [vmem:[%s8759_s17 + $0xf70] sm:$0xf0] }
 0x31a   : > { %v8055_v31 = vld [vmem:[%s8759_s17 + $0x8d4] sm:$0xf]  ;;  %v7441_v14 = vor.u32 %v8263_v24, %v7438_v25  ;;  %4450 = vmatpush.bf16.msrb.mxu2 %v7185_v33 }
 0x31b   : > { %v6606_v32 = vld [vmem:[%s8759_s17 + $0x8f0] sm:$0xf0] }
 0x31c   : > { %v8119_v34 = vld [vmem:[%s8759_s17 + $0xad4] sm:$0xf]  ;;  %v6609_v41 = vor.u32 %v8055_v31, %v6606_v32  ;;  %4463 = vmatpush.bf16.msrb.mxu3 %v7441_v14  ;;  %v7900_v31 = vld [vmem:[%s8759_s17 + $0x3f4] sm:$0xf0] }
 0x31d   : > { %v6862_v35 = vld [vmem:[%s8759_s17 + $0xaf0] sm:$0xf0] }
 0x31e   : > { %v8191_v36 = vld [vmem:[%s8759_s17 + $0xd14] sm:$0xf]  ;;  %v6865_v42 = vor.u32 %v8119_v34, %v6862_v35  ;;  %4426 = vmatpush.bf16.msrb.mxu0 %v6609_v41  ;;  %v5940_v41 = vld [vmem:[%s8759_s17 + $0x398] sm:$0xf] }
 0x31f   : > { %v7150_v38 = vld [vmem:[%s8759_s17 + $0xd30] sm:$0xf0] }
 0x320   : > { %v8255_v39 = vld [vmem:[%s8759_s17 + $0xf14] sm:$0xf]  ;;  %v7153_v45 = vor.u32 %v8191_v36, %v7150_v38  ;;  %4439 = vmatpush.bf16.msrb.mxu1 %v6865_v42  ;;  %v5717_v36 = vor.u32 %v7836_v29, %v5716_v28  ;;  %v5973_v38 = vor.u32 %v7900_v31, %v5972_v30  ;;  %v4223_v28 = vpop.f32.mrf.mxu0  ;;  %v4236_v29 = vpop.f32.mrf.mxu1  ;;  %v7948_v30 = vld [vmem:[%s8759_s17 + $0x574] sm:$0xf0] }
 0x321   : > { %v7406_v40 = vld [vmem:[%s8759_s17 + $0xf30] sm:$0xf0]  ;;  %v6420_v31 = vld [vmem:[%s8759_s17 + $0x758] sm:$0xf] }
 0x322   : > { %v8047_v43 = vld [vmem:[%s8759_s17 + $0x894] sm:$0xf]  ;;  %v7409_v46 = vor.u32 %v8255_v39, %v7406_v40  ;;  %4451 = vmatpush.bf16.msrb.mxu2 %v7153_v45  ;;  %v5684_v39 = vld [vmem:[%s8759_s17 + $0x198] sm:$0xf]  ;;  %v4212_v45 = vpop.f32.mrf.mxu3 }
 0x323   : > { %v6574_v44 = vld [vmem:[%s8759_s17 + $0x8b0] sm:$0xf0]  ;;  %v7828_v40 = vld [vmem:[%s8759_s17 + $0x1b4] sm:$0xf0] }
 0x324   : > { %v8111_v47 = vld [vmem:[%s8759_s17 + $0xa94] sm:$0xf]  ;;  %v6577_v59 = vor.u32 %v8047_v43, %v6574_v44  ;;  %4464 = vmatpush.bf16.msrb.mxu3 %v7409_v46  ;;  %v4199_v44 = vpop.f32.mrf.mxu2  ;;  %v7892_v46 = vld [vmem:[%s8759_s17 + $0x3b4] sm:$0xf0] }
 0x325   : > { %v6830_v52 = vld [vmem:[%s8759_s17 + $0xab0] sm:$0xf0]  ;;  %v8004_v44 = vld [vmem:[%s8759_s17 + $0x734] sm:$0xf0] }
 0x326   : > { %v8183_v53 = vld [vmem:[%s8759_s17 + $0xcd4] sm:$0xf]  ;;  %v6833_v60 = vor.u32 %v8111_v47, %v6830_v52  ;;  %4427 = vmatpush.bf16.msrb.mxu0 %v6577_v59  ;;  %v5685_v59 = vor.u32 %v7828_v40, %v5684_v39  ;;  %v5844_v40 = vld [vmem:[%s8759_s17 + $0x2d8] sm:$0xf] }
 0x327   : > { %v7118_v56 = vld [vmem:[%s8759_s17 + $0xcf0] sm:$0xf0] }
 0x328   : > { %v8247_v57 = vld [vmem:[%s8759_s17 + $0xed4] sm:$0xf]  ;;  %v7121_v63 = vor.u32 %v8183_v53, %v7118_v56  ;;  %4440 = vmatpush.bf16.msrb.mxu1 %v6833_v60  ;;  %v7964_v56 = vld [vmem:[%s8759_s17 + $0x5f4] sm:$0xf0]  ;;  %v5941_v60 = vor.u32 %v7892_v46, %v5940_v41 }
 0x329   : > { %v7374_v58 = vld [vmem:[%s8759_s17 + $0xef0] sm:$0xf0]  ;;  %v7868_v41 = vld [vmem:[%s8759_s17 + $0x2f4] sm:$0xf0] }
 0x32a   : > { %v8039_v61 = vld [vmem:[%s8759_s17 + $0x854] sm:$0xf]  ;;  %v7377_v1 = vor.u32 %v8247_v57, %v7374_v58  ;;  %4452 = vmatpush.bf16.msrb.mxu2 %v7121_v63  ;;  %v6484_v57 = vld [vmem:[%s8759_s17 + $0x7d8] sm:$0xf]  ;;  %v5845_v46 = vor.u32 %v7868_v41, %v5844_v40 }
 0x32b   : > { %v6542_v62 = vld [vmem:[%s8759_s17 + $0x870] sm:$0xf0]  ;;  %v8028_v58 = vld [vmem:[%s8759_s17 + $0x7f4] sm:$0xf0] }
 0x32c   : > { %v8103_v2 = vld [vmem:[%s8759_s17 + $0xa54] sm:$0xf]  ;;  %v6545_v13 = vor.u32 %v8039_v61, %v6542_v62  ;;  %4465 = vmatpush.bf16.msrb.mxu3 %v7377_v1  ;;  %v5652_v63 = vld [vmem:[%s8759_s17 + $0x158] sm:$0xf] }
 0x32d   : > { %v6798_v3 = vld [vmem:[%s8759_s17 + $0xa70] sm:$0xf0]  ;;  %v7820_v1 = vld [vmem:[%s8759_s17 + $0x174] sm:$0xf0] }
 0x32e   : > { %v8175_v4 = vld [vmem:[%s8759_s17 + $0xc94] sm:$0xf]  ;;  %v6801_v37 = vor.u32 %v8103_v2, %v6798_v3  ;;  %4428 = vmatpush.bf16.msrb.mxu0 %v6545_v13  ;;  %v6229_v2 = vor.u32 %v7964_v56, %v6228_v55  ;;  %v6485_v3 = vor.u32 %v8028_v58, %v6484_v57  ;;  %v5653_v11 = vor.u32 %v7820_v1, %v5652_v63  ;;  %v5812_v55 = vld [vmem:[%s8759_s17 + $0x298] sm:$0xf]  ;;  %v4225_v58 = vpop.f32.mrf.mxu0 }
 0x32f   : > { %v7086_v8 = vld [vmem:[%s8759_s17 + $0xcb0] sm:$0xf0]  ;;  %v7860_v56 = vld [vmem:[%s8759_s17 + $0x2b4] sm:$0xf0] }
 0x330   : > { %v8239_v9 = vld [vmem:[%s8759_s17 + $0xe94] sm:$0xf]  ;;  %v7089_v23 = vor.u32 %v8175_v4, %v7086_v8  ;;  %4441 = vmatpush.bf16.msrb.mxu1 %v6801_v37  ;;  %v5908_v4 = vld [vmem:[%s8759_s17 + $0x358] sm:$0xf]  ;;  %v5813_v1 = vor.u32 %v7860_v56, %v5812_v55 }
 0x331   : > { %v7342_v0 = vld [vmem:[%s8759_s17 + $0xeb0] sm:$0xf0]  ;;  %v7956_v8 = vld [vmem:[%s8759_s17 + $0x5b4] sm:$0xf0]  ;;  %v5909_v13 = vor.u32 %v7884_v6, %v5908_v4 }
 0x332   : > { %v8031_v16 = vld [vmem:[%s8759_s17 + $0x814] sm:$0xf]  ;;  %v7345_v24 = vor.u32 %v8239_v9, %v7342_v0  ;;  %4453 = vmatpush.bf16.msrb.mxu2 %v7089_v23  ;;  %v6452_v9 = vld [vmem:[%s8759_s17 + $0x798] sm:$0xf] }
 0x333   : > { %v6510_v17 = vld [vmem:[%s8759_s17 + $0x830] sm:$0xf0]  ;;  %v8020_v0 = vld [vmem:[%s8759_s17 + $0x7b4] sm:$0xf0] }
 0x334   : > { %v8095_v18 = vld [vmem:[%s8759_s17 + $0xa14] sm:$0xf]  ;;  %v6513_v34 = vor.u32 %v8031_v16, %v6510_v17  ;;  %4466 = vmatpush.bf16.msrb.mxu3 %v7345_v24  ;;  %v5620_v37 = vld [vmem:[%s8759_s17 + $0x118] sm:$0xf]  ;;  %v6197_v17 = vor.u32 %v7956_v8, %v6196_v7 }
 0x335   : > { %v6766_v25 = vld [vmem:[%s8759_s17 + $0xa30] sm:$0xf0]  ;;  %v7812_v16 = vld [vmem:[%s8759_s17 + $0x134] sm:$0xf0] }
 0x336   : > { %v8167_v32 = vld [vmem:[%s8759_s17 + $0xc54] sm:$0xf]  ;;  %v6769_v35 = vor.u32 %v8095_v18, %v6766_v25  ;;  %4429 = vmatpush.bf16.msrb.mxu0 %v6513_v34  ;;  %v6453_v18 = vor.u32 %v8020_v0, %v6452_v9  ;;  %v5876_v23 = vld [vmem:[%s8759_s17 + $0x318] sm:$0xf]  ;;  %v4249_v0 = vpop.f32.mrf.mxu2 }
 0x337   : > { %v7054_v22 = vld [vmem:[%s8759_s17 + $0xc70] sm:$0xf0]  ;;  %v7876_v24 = vld [vmem:[%s8759_s17 + $0x334] sm:$0xf0] }
 0x338   : > { %v8231_v33 = vld [vmem:[%s8759_s17 + $0xe54] sm:$0xf]  ;;  %v7057_v42 = vor.u32 %v8167_v32, %v7054_v22  ;;  %4442 = vmatpush.bf16.msrb.mxu1 %v6769_v35  ;;  %v6164_v25 = vld [vmem:[%s8759_s17 + $0x558] sm:$0xf]  ;;  %v4224_v22 = vadd.f32 %v4223_v28, %v9696_v21 }
 0x339   : > { %v7310_v14 = vld [vmem:[%s8759_s17 + $0xe70] sm:$0xf0]  ;;  %4430 = vmatmul.bf16.vlgmr.msrb.gmra.mxu0 %v9025_v26  ;;  %v8012_v32 = vld [vmem:[%s8759_s17 + $0x774] sm:$0xf0] }
 0x33a   : > { %v7313_v43 = vor.u32 %v8231_v33, %v7310_v14  ;;  %v8159_v47 = vld [vmem:[%s8759_s17 + $0xc14] sm:$0xf]  ;;  %4474 = vmatpush.bf16.msra.mxu0 %v5717_v36  ;;  %4454 = vmatpush.bf16.msrb.mxu2 %v7057_v42  ;;  %v5621_v33 = vor.u32 %v7812_v16, %v5620_v37  ;;  %v5877_v14 = vor.u32 %v7876_v24, %v5876_v23  ;;  %v5588_v34 = vld [vmem:[%s8759_s17 + $0xd8] sm:$0xf] }
 0x33b   : > { %v7022_v52 = vld [vmem:[%s8759_s17 + $0xc30] sm:$0xf0]  ;;  %4443 = vmatmul.bf16.vlgmr.msrb.gmra.mxu1 %v9027_v27  ;;  %v7804_v35 = vld [vmem:[%s8759_s17 + $0xf4] sm:$0xf0]  ;;  %v4237_v36 = vadd.f32 %v4236_v29, %v4224_v22  ;;  %v6421_v39 = vor.u32 %v8012_v32, %v6420_v31 }
 0x33c   : > { %v8223_v53 = vld [vmem:[%s8759_s17 + $0xe14] sm:$0xf]  ;;  %4487 = vmatpush.bf16.msra.mxu1 %v5973_v38  ;;  %4467 = vmatpush.bf16.msrb.mxu3 %v7313_v43  ;;  %v7025_v61 = vor.u32 %v8159_v47, %v7022_v52  ;;  %v6165_v38 = vor.u32 %v7948_v30, %v6164_v25  ;;  %v6132_v21 = vld [vmem:[%s8759_s17 + $0x518] sm:$0xf]  ;;  %v5589_v45 = vor.u32 %v7804_v35, %v5588_v34 }
 0x33d   : > { %v7278_v54 = vld [vmem:[%s8759_s17 + $0xe30] sm:$0xf0]  ;;  %v7940_v42 = vld [vmem:[%s8759_s17 + $0x534] sm:$0xf0] }
 0x33e   : > { %v7281_v62 = vor.u32 %v8223_v53, %v7278_v54  ;;  %4475 = vmatpush.bf16.msra.mxu0 %v5685_v59  ;;  %4455 = vmatpush.bf16.msrb.mxu2 %v7025_v61  ;;  %v6388_v43 = vld [vmem:[%s8759_s17 + $0x718] sm:$0xf]  ;;  %v6133_v53 = vor.u32 %v7940_v42, %v6132_v21  ;;  %v4238_v59 = vpop.f32.mrf.mxu1 }
 0x33f   : > { %v5556_v47 = vld [vmem:[%s8759_s17 + $0x98] sm:$0xf]  ;;  %v6389_v54 = vor.u32 %v8004_v44, %v6388_v43 }
 0x340   : > { %4488 = vmatpush.bf16.msra.mxu1 %v5941_v60  ;;  %4468 = vmatpush.bf16.msrb.mxu3 %v7281_v62  ;;  %v7796_v52 = vld [vmem:[%s8759_s17 + $0xb4] sm:$0xf0] }
 0x341   : > { %4456 = vmatmul.bf16.vlgmr.msrb.gmra.mxu2 %v9043_v50  ;;  %v6100_v57 = vld [vmem:[%s8759_s17 + $0x4d8] sm:$0xf]  ;;  %v5557_v63 = vor.u32 %v7796_v52, %v5556_v47  ;;  %v4251_v52 = vpop.f32.mrf.mxu2 }
 0x342   : > { %4500 = vmatpush.bf16.msra.mxu2 %v6229_v2  ;;  %4476 = vmatpush.bf16.msra.mxu0 %v5653_v11  ;;  %v7932_v60 = vld [vmem:[%s8759_s17 + $0x4f4] sm:$0xf0]  ;;  %v4262_v11 = vpop.f32.mrf.mxu3 }
 0x343   : > { %4469 = vmatmul.bf16.vlgmr.msrb.gmra.mxu3 %v9045_v51  ;;  %v6356_v61 = vld [vmem:[%s8759_s17 + $0x6d8] sm:$0xf]  ;;  %v6101_v4 = vor.u32 %v7932_v60, %v6100_v57 }
 0x344   : > { %4513 = vmatpush.bf16.msra.mxu3 %v6485_v3  ;;  %4489 = vmatpush.bf16.msra.mxu1 %v5909_v13  ;;  %v7996_v62 = vld [vmem:[%s8759_s17 + $0x6f4] sm:$0xf0] }
 0x345   : > { %v5524_v2 = vld [vmem:[%s8759_s17 + $0x58] sm:$0xf]  ;;  %v6357_v6 = vor.u32 %v7996_v62, %v6356_v61 }
 0x346   : > { %4501 = vmatpush.bf16.msra.mxu2 %v6197_v17  ;;  %4477 = vmatpush.bf16.msra.mxu0 %v5621_v33  ;;  %v7788_v3 = vld [vmem:[%s8759_s17 + $0x74] sm:$0xf0]  ;;  %v4250_v17 = vadd.f32 %v4249_v0, %v4237_v36 }
 0x347   : > { %v5780_v7 = vld [vmem:[%s8759_s17 + $0x258] sm:$0xf] }
 0x348   : > { %4514 = vmatpush.bf16.msra.mxu3 %v6453_v18  ;;  %4490 = vmatpush.bf16.msra.mxu1 %v5877_v14  ;;  %v7852_v8 = vld [vmem:[%s8759_s17 + $0x274] sm:$0xf0]  ;;  %v5525_v18 = vor.u32 %v7788_v3, %v5524_v2  ;;  %v9767_v29 = vadd.f32 %v4262_v11, %v4250_v17  ;;  %v1278_v17 = vperm.slane %v9656_v5, 4  ;;  %v4288_v5 = vpop.f32.mrf.mxu1 }
 0x349   : > { %v6068_v9 = vld [vmem:[%s8759_s17 + $0x498] sm:$0xf]  ;;  %v5781_v23 = vor.u32 %v7852_v8, %v5780_v7 }
 0x34a   : > { %4502 = vmatpush.bf16.msra.mxu2 %v6165_v38  ;;  %4478 = vmatpush.bf16.msra.mxu0 %v5589_v45  ;;  %v7924_v13 = vld [vmem:[%s8759_s17 + $0x4b4] sm:$0xf0] }
 0x34b   : > { %v6324_v37 = vld [vmem:[%s8759_s17 + $0x698] sm:$0xf]  ;;  %v6069_v30 = vor.u32 %v7924_v13, %v6068_v9 }
 0x34c   : > { %4515 = vmatpush.bf16.msra.mxu3 %v6421_v39  ;;  %4491 = vmatpush.bf16.msra.mxu1 %v5845_v46  ;;  %v7988_v16 = vld [vmem:[%s8759_s17 + $0x6b4] sm:$0xf0] }
 0x34d   : > { %v5492_v24 = vld [vmem:[%s8759_s17 + $0x18] sm:$0xf]  ;;  %v6325_v31 = vor.u32 %v7988_v16, %v6324_v37 }
 0x34e   : > { %4503 = vmatpush.bf16.msra.mxu2 %v6133_v53  ;;  %4479 = vmatpush.bf16.msra.mxu0 %v5557_v63  ;;  %v7780_v25 = vld [vmem:[%s8759_s17 + $0x34] sm:$0xf0]  ;;  %v4264_v53 = vpop.f32.mrf.mxu3 }
 0x34f   : > { %v5748_v28 = vld [vmem:[%s8759_s17 + $0x218] sm:$0xf]  ;;  %v5493_v40 = vor.u32 %v7780_v25, %v5492_v24 }
 0x350   : > { %4516 = vmatpush.bf16.msra.mxu3 %v6389_v54  ;;  %4492 = vmatpush.bf16.msra.mxu1 %v5813_v1  ;;  %v7844_v32 = vld [vmem:[%s8759_s17 + $0x234] sm:$0xf0] }
 0x351   : > { %v6740_v22 = vld [vmem:[%s8759_s17 + $0x9d8] sm:$0xf]  ;;  %v5749_v41 = vor.u32 %v7844_v32, %v5748_v28 }
 0x352   : > { %4504 = vmatpush.bf16.msra.mxu2 %v6101_v4  ;;  %v8092_v33 = vld [vmem:[%s8759_s17 + $0x9f4] sm:$0xf0]  ;;  %4480 = vmatpush.bf16.msra.mxu0 %v5525_v18 }
 0x353   : > { %v6996_v14 = vld [vmem:[%s8759_s17 + $0xbd8] sm:$0xf]  ;;  %v6741_v21 = vor.u32 %v8092_v33, %v6740_v22  ;;  %v4275_v33 = vpop.f32.mrf.mxu0 }
 0x354   : > { %4517 = vmatpush.bf16.msra.mxu3 %v6357_v6  ;;  %v8156_v34 = vld [vmem:[%s8759_s17 + $0xbf4] sm:$0xf0]  ;;  %4493 = vmatpush.bf16.msra.mxu1 %v5781_v23 }
 0x355   : > { %v6036_v35 = vld [vmem:[%s8759_s17 + $0x458] sm:$0xf]  ;;  %v6997_v42 = vor.u32 %v8156_v34, %v6996_v14 }
 0x356   : > { %v7916_v36 = vld [vmem:[%s8759_s17 + $0x474] sm:$0xf0]  ;;  %4505 = vmatpush.bf16.msra.mxu2 %v6069_v30  ;;  %4481 = vmatpush.bf16.msra.mxu0 %v5493_v40 }
 0x357   : > { %v6292_v38 = vld [vmem:[%s8759_s17 + $0x658] sm:$0xf]  ;;  %v6037_v46 = vor.u32 %v7916_v36, %v6036_v35  ;;  %v4276_v36 = vadd.f32 %v4275_v33, %v1278_v17  ;;  %v4301_v17 = vpop.f32.mrf.mxu2 }
 0x358   : > { %v7980_v39 = vld [vmem:[%s8759_s17 + $0x674] sm:$0xf0]  ;;  %4518 = vmatpush.bf16.msra.mxu3 %v6325_v31  ;;  %4494 = vmatpush.bf16.msra.mxu1 %v5749_v41 }
 0x359   : > { %v6708_v43 = vld [vmem:[%s8759_s17 + $0x998] sm:$0xf]  ;;  %v6293_v47 = vor.u32 %v7980_v39, %v6292_v38  ;;  %4482 = vmatmul.bf16.vlgmr.msra.gmra.mxu0 %v8978_v19 }
 0x35a   : > { %v8084_v44 = vld [vmem:[%s8759_s17 + $0x9b4] sm:$0xf0]  ;;  %4526 = vmatpush.bf16.msrb.mxu0 %v6741_v21  ;;  %4506 = vmatpush.bf16.msra.mxu2 %v6037_v46  ;;  %v4289_v21 = vadd.f32 %v4288_v5, %v4276_v36  ;;  %v7832_v36 = vld [vmem:[%s8759_s17 + $0x1dc] sm:$0xf] }
 0x35b   : > { %v6964_v45 = vld [vmem:[%s8759_s17 + $0xb98] sm:$0xf]  ;;  %v6709_v63 = vor.u32 %v8084_v44, %v6708_v43  ;;  %4495 = vmatmul.bf16.vlgmr.msra.gmra.mxu1 %v8980_v20 }
 0x35c   : > { %v8148_v54 = vld [vmem:[%s8759_s17 + $0xbb4] sm:$0xf0]  ;;  %4539 = vmatpush.bf16.msrb.mxu1 %v6997_v42  ;;  %4519 = vmatpush.bf16.msra.mxu3 %v6293_v47 }
 0x35d   : > { %v6004_v55 = vld [vmem:[%s8759_s17 + $0x418] sm:$0xf]  ;;  %v6965_v1 = vor.u32 %v8148_v54, %v6964_v45 }
 0x35e   : > { %v7908_v56 = vld [vmem:[%s8759_s17 + $0x434] sm:$0xf0]  ;;  %4527 = vmatpush.bf16.msrb.mxu0 %v6709_v63  ;;  %v4277_v63 = vpop.f32.mrf.mxu0 }
 0x35f   : > { %v6260_v57 = vld [vmem:[%s8759_s17 + $0x618] sm:$0xf]  ;;  %v6005_v2 = vor.u32 %v7908_v56, %v6004_v55 }
 0x360   : > { %v7972_v58 = vld [vmem:[%s8759_s17 + $0x634] sm:$0xf0]  ;;  %4540 = vmatpush.bf16.msrb.mxu1 %v6965_v1  ;;  %v4290_v1 = vpop.f32.mrf.mxu1 }
 0x361   : > { %v7252_v59 = vld [vmem:[%s8759_s17 + $0xdd8] sm:$0xf]  ;;  %v6261_v3 = vor.u32 %v7972_v58, %v6260_v57  ;;  %4507 = vmatpush.bf16.msra.mxu2 %v6005_v2  ;;  %v7960_v1 = vld [vmem:[%s8759_s17 + $0x5dc] sm:$0xf] }
 0x362   : > { %v8220_v60 = vld [vmem:[%s8759_s17 + $0xdf4] sm:$0xf0] }
 0x363   : > { %v7508_v61 = vld [vmem:[%s8759_s17 + $0xfd8] sm:$0xf]  ;;  %v7253_v7 = vor.u32 %v8220_v60, %v7252_v59  ;;  %4520 = vmatpush.bf16.msra.mxu3 %v6261_v3 }
 0x364   : > { %v8284_v62 = vld [vmem:[%s8759_s17 + $0xff4] sm:$0xf0]  ;;  %4508 = vmatmul.bf16.vlgmr.msra.gmra.mxu2 %v8998_v48 }
 0x365   : > { %v6676_v4 = vld [vmem:[%s8759_s17 + $0x958] sm:$0xf]  ;;  %v7509_v8 = vor.u32 %v8284_v62, %v7508_v61  ;;  %4552 = vmatpush.bf16.msrb.mxu2 %v7253_v7 }
 0x366   : > { %v8076_v6 = vld [vmem:[%s8759_s17 + $0x974] sm:$0xf0]  ;;  %4521 = vmatmul.bf16.vlgmr.msra.gmra.mxu3 %v9000_v49 }
 0x367   : > { %v6932_v9 = vld [vmem:[%s8759_s17 + $0xb58] sm:$0xf]  ;;  %v6677_v18 = vor.u32 %v8076_v6, %v6676_v4  ;;  %4565 = vmatpush.bf16.msrb.mxu3 %v7509_v8 }
 0x368   : > { %v8140_v0 = vld [vmem:[%s8759_s17 + $0xb74] sm:$0xf0] }
 0x369   : > { %v7220_v11 = vld [vmem:[%s8759_s17 + $0xd98] sm:$0xf]  ;;  %v6933_v23 = vor.u32 %v8140_v0, %v6932_v9  ;;  %4528 = vmatpush.bf16.msrb.mxu0 %v6677_v18  ;;  %v4314_v18 = vpop.f32.mrf.mxu3 }
 0x36a   : > { %v8212_v13 = vld [vmem:[%s8759_s17 + $0xdb4] sm:$0xf0] }
 0x36b   : > { %v7476_v37 = vld [vmem:[%s8759_s17 + $0xf98] sm:$0xf]  ;;  %v7221_v28 = vor.u32 %v8212_v13, %v7220_v11  ;;  %4541 = vmatpush.bf16.msrb.mxu1 %v6933_v23 }
 0x36c   : > { %v8276_v16 = vld [vmem:[%s8759_s17 + $0xfb4] sm:$0xf0] }
 0x36d   : > { %v6644_v24 = vld [vmem:[%s8759_s17 + $0x918] sm:$0xf]  ;;  %v7477_v30 = vor.u32 %v8276_v16, %v7476_v37  ;;  %4553 = vmatpush.bf16.msrb.mxu2 %v7221_v28  ;;  %v4302_v28 = vadd.f32 %v4301_v17, %v4289_v21  ;;  %v5910_v17 = vld [vmem:[%s8759_s17 + $0x378] sm:$0xf0] }
 0x36e   : > { %v8068_v25 = vld [vmem:[%s8759_s17 + $0x934] sm:$0xf0] }
 0x36f   : > { %v6900_v31 = vld [vmem:[%s8759_s17 + $0xb18] sm:$0xf]  ;;  %v6645_v38 = vor.u32 %v8068_v25, %v6644_v24  ;;  %4566 = vmatpush.bf16.msrb.mxu3 %v7477_v30  ;;  %v9838_v5 = vadd.f32 %v4314_v18, %v4302_v28  ;;  %v7952_v18 = vld [vmem:[%s8759_s17 + $0x59c] sm:$0xf] }
 0x370   : > { %v8132_v32 = vld [vmem:[%s8759_s17 + $0xb34] sm:$0xf0] }
 0x371   : > { %v7188_v22 = vld [vmem:[%s8759_s17 + $0xd58] sm:$0xf]  ;;  %v6901_v39 = vor.u32 %v8132_v32, %v6900_v31  ;;  %4529 = vmatpush.bf16.msrb.mxu0 %v6645_v38  ;;  %v5718_v38 = vld [vmem:[%s8759_s17 + $0x1f8] sm:$0xf0] }
 0x372   : > { %v8204_v14 = vld [vmem:[%s8759_s17 + $0xd74] sm:$0xf0] }
 0x373   : > { %v7444_v34 = vld [vmem:[%s8759_s17 + $0xf58] sm:$0xf]  ;;  %v7189_v42 = vor.u32 %v8204_v14, %v7188_v22  ;;  %4542 = vmatpush.bf16.msrb.mxu1 %v6901_v39  ;;  %v7896_v39 = vld [vmem:[%s8759_s17 + $0x3dc] sm:$0xf] }
 0x374   : > { %v8268_v35 = vld [vmem:[%s8759_s17 + $0xf74] sm:$0xf0] }
 0x375   : > { %v6612_v40 = vld [vmem:[%s8759_s17 + $0x8d8] sm:$0xf]  ;;  %v7445_v43 = vor.u32 %v8268_v35, %v7444_v34  ;;  %4554 = vmatpush.bf16.msrb.mxu2 %v7189_v42 }
 0x376   : > { %v8060_v41 = vld [vmem:[%s8759_s17 + $0x8f4] sm:$0xf0] }
 0x377   : > { %v6868_v44 = vld [vmem:[%s8759_s17 + $0xad8] sm:$0xf]  ;;  %v6613_v54 = vor.u32 %v8060_v41, %v6612_v40  ;;  %4567 = vmatpush.bf16.msrb.mxu3 %v7445_v43  ;;  %v5974_v40 = vld [vmem:[%s8759_s17 + $0x3f8] sm:$0xf0] }
 0x378   : > { %v8124_v45 = vld [vmem:[%s8759_s17 + $0xaf4] sm:$0xf0] }
 0x379   : > { %v7156_v46 = vld [vmem:[%s8759_s17 + $0xd18] sm:$0xf]  ;;  %v6869_v55 = vor.u32 %v8124_v45, %v6868_v44  ;;  %4530 = vmatpush.bf16.msrb.mxu0 %v6613_v54  ;;  %v7888_v54 = vld [vmem:[%s8759_s17 + $0x39c] sm:$0xf] }
 0x37a   : > { %v8196_v47 = vld [vmem:[%s8759_s17 + $0xd34] sm:$0xf0] }
 0x37b   : > { %v7412_v52 = vld [vmem:[%s8759_s17 + $0xf18] sm:$0xf]  ;;  %v7157_v58 = vor.u32 %v8196_v47, %v7156_v46  ;;  %4543 = vmatpush.bf16.msrb.mxu1 %v6869_v55  ;;  %v5721_v46 = vor.u32 %v7832_v36, %v5718_v38  ;;  %v5977_v47 = vor.u32 %v7896_v39, %v5974_v40  ;;  %v4327_v36 = vpop.f32.mrf.mxu0  ;;  %v4340_v38 = vpop.f32.mrf.mxu1  ;;  %v6166_v39 = vld [vmem:[%s8759_s17 + $0x578] sm:$0xf0] }
 0x37c   : > { %v8260_v53 = vld [vmem:[%s8759_s17 + $0xf34] sm:$0xf0]  ;;  %v8008_v40 = vld [vmem:[%s8759_s17 + $0x75c] sm:$0xf] }
 0x37d   : > { %v6580_v56 = vld [vmem:[%s8759_s17 + $0x898] sm:$0xf]  ;;  %v7413_v59 = vor.u32 %v8260_v53, %v7412_v52  ;;  %4555 = vmatpush.bf16.msrb.mxu2 %v7157_v58  ;;  %v7824_v52 = vld [vmem:[%s8759_s17 + $0x19c] sm:$0xf]  ;;  %v4316_v58 = vpop.f32.mrf.mxu3 }
 0x37e   : > { %v8052_v57 = vld [vmem:[%s8759_s17 + $0x8b4] sm:$0xf0]  ;;  %v5686_v53 = vld [vmem:[%s8759_s17 + $0x1b8] sm:$0xf0] }
 0x37f   : > { %v6836_v60 = vld [vmem:[%s8759_s17 + $0xa98] sm:$0xf]  ;;  %v6581_v6 = vor.u32 %v8052_v57, %v6580_v56  ;;  %4568 = vmatpush.bf16.msrb.mxu3 %v7413_v59  ;;  %v4303_v57 = vpop.f32.mrf.mxu2  ;;  %v5942_v59 = vld [vmem:[%s8759_s17 + $0x3b8] sm:$0xf0] }
 0x380   : > { %v8116_v61 = vld [vmem:[%s8759_s17 + $0xab4] sm:$0xf0]  ;;  %v6390_v57 = vld [vmem:[%s8759_s17 + $0x738] sm:$0xf0] }
 0x381   : > { %v7124_v62 = vld [vmem:[%s8759_s17 + $0xcd8] sm:$0xf]  ;;  %v6837_v7 = vor.u32 %v8116_v61, %v6836_v60  ;;  %4531 = vmatpush.bf16.msrb.mxu0 %v6581_v6  ;;  %v5689_v6 = vor.u32 %v7824_v52, %v5686_v53  ;;  %v7864_v53 = vld [vmem:[%s8759_s17 + $0x2dc] sm:$0xf] }
 0x382   : > { %v8188_v2 = vld [vmem:[%s8759_s17 + $0xcf4] sm:$0xf0] }
 0x383   : > { %v7380_v3 = vld [vmem:[%s8759_s17 + $0xed8] sm:$0xf]  ;;  %v7125_v0 = vor.u32 %v8188_v2, %v7124_v62  ;;  %4544 = vmatpush.bf16.msrb.mxu1 %v6837_v7  ;;  %v6230_v2 = vld [vmem:[%s8759_s17 + $0x5f8] sm:$0xf0]  ;;  %v5945_v7 = vor.u32 %v7888_v54, %v5942_v59 }
 0x384   : > { %v8252_v4 = vld [vmem:[%s8759_s17 + $0xef4] sm:$0xf0]  ;;  %v5846_v54 = vld [vmem:[%s8759_s17 + $0x2f8] sm:$0xf0] }
 0x385   : > { %v6548_v8 = vld [vmem:[%s8759_s17 + $0x858] sm:$0xf]  ;;  %v7381_v11 = vor.u32 %v8252_v4, %v7380_v3  ;;  %4556 = vmatpush.bf16.msrb.mxu2 %v7125_v0  ;;  %v8024_v3 = vld [vmem:[%s8759_s17 + $0x7dc] sm:$0xf]  ;;  %v5849_v59 = vor.u32 %v7864_v53, %v5846_v54 }
 0x386   : > { %v8044_v9 = vld [vmem:[%s8759_s17 + $0x874] sm:$0xf0]  ;;  %v6486_v4 = vld [vmem:[%s8759_s17 + $0x7f8] sm:$0xf0] }
 0x387   : > { %v6804_v13 = vld [vmem:[%s8759_s17 + $0xa58] sm:$0xf]  ;;  %v6549_v30 = vor.u32 %v8044_v9, %v6548_v8  ;;  %4569 = vmatpush.bf16.msrb.mxu3 %v7381_v11  ;;  %v7816_v0 = vld [vmem:[%s8759_s17 + $0x15c] sm:$0xf] }
 0x388   : > { %v8108_v37 = vld [vmem:[%s8759_s17 + $0xa74] sm:$0xf0]  ;;  %v5654_v11 = vld [vmem:[%s8759_s17 + $0x178] sm:$0xf0] }
 0x389   : > { %v7092_v16 = vld [vmem:[%s8759_s17 + $0xc98] sm:$0xf]  ;;  %v6805_v31 = vor.u32 %v8108_v37, %v6804_v13  ;;  %4532 = vmatpush.bf16.msrb.mxu0 %v6549_v30  ;;  %v6233_v13 = vor.u32 %v7960_v1, %v6230_v2  ;;  %v6489_v37 = vor.u32 %v8024_v3, %v6486_v4  ;;  %v5657_v28 = vor.u32 %v7816_v0, %v5654_v11  ;;  %v7856_v1 = vld [vmem:[%s8759_s17 + $0x29c] sm:$0xf]  ;;  %v4329_v4 = vpop.f32.mrf.mxu0 }
 0x38a   : > { %v8180_v23 = vld [vmem:[%s8759_s17 + $0xcb4] sm:$0xf0]  ;;  %v5814_v2 = vld [vmem:[%s8759_s17 + $0x2b8] sm:$0xf0] }
 0x38b   : > { %v7348_v24 = vld [vmem:[%s8759_s17 + $0xe98] sm:$0xf]  ;;  %v7093_v14 = vor.u32 %v8180_v23, %v7092_v16  ;;  %4545 = vmatpush.bf16.msrb.mxu1 %v6805_v31  ;;  %v7880_v16 = vld [vmem:[%s8759_s17 + $0x35c] sm:$0xf]  ;;  %v5817_v11 = vor.u32 %v7856_v1, %v5814_v2 }
 0x38c   : > { %v8244_v25 = vld [vmem:[%s8759_s17 + $0xeb4] sm:$0xf0]  ;;  %v6198_v23 = vld [vmem:[%s8759_s17 + $0x5b8] sm:$0xf0]  ;;  %v5913_v30 = vor.u32 %v7880_v16, %v5910_v17 }
 0x38d   : > { %v6516_v32 = vld [vmem:[%s8759_s17 + $0x818] sm:$0xf]  ;;  %v7349_v34 = vor.u32 %v8244_v25, %v7348_v24  ;;  %4557 = vmatpush.bf16.msrb.mxu2 %v7093_v14  ;;  %v8016_v24 = vld [vmem:[%s8759_s17 + $0x79c] sm:$0xf] }
 0x38e   : > { %v8036_v22 = vld [vmem:[%s8759_s17 + $0x834] sm:$0xf0]  ;;  %v6454_v25 = vld [vmem:[%s8759_s17 + $0x7b8] sm:$0xf0] }
 0x38f   : > { %v6772_v33 = vld [vmem:[%s8759_s17 + $0xa18] sm:$0xf]  ;;  %v6517_v44 = vor.u32 %v8036_v22, %v6516_v32  ;;  %4570 = vmatpush.bf16.msrb.mxu3 %v7349_v34  ;;  %v7808_v31 = vld [vmem:[%s8759_s17 + $0x11c] sm:$0xf]  ;;  %v6201_v22 = vor.u32 %v7952_v18, %v6198_v23 }
 0x390   : > { %v8100_v35 = vld [vmem:[%s8759_s17 + $0xa34] sm:$0xf0]  ;;  %v5622_v32 = vld [vmem:[%s8759_s17 + $0x138] sm:$0xf0] }
 0x391   : > { %v7060_v41 = vld [vmem:[%s8759_s17 + $0xc58] sm:$0xf]  ;;  %v6773_v45 = vor.u32 %v8100_v35, %v6772_v33  ;;  %4533 = vmatpush.bf16.msrb.mxu0 %v6517_v44  ;;  %v6457_v33 = vor.u32 %v8016_v24, %v6454_v25  ;;  %v7872_v14 = vld [vmem:[%s8759_s17 + $0x31c] sm:$0xf]  ;;  %v4353_v25 = vpop.f32.mrf.mxu2 }
 0x392   : > { %v8172_v21 = vld [vmem:[%s8759_s17 + $0xc74] sm:$0xf0]  ;;  %v5878_v34 = vld [vmem:[%s8759_s17 + $0x338] sm:$0xf0] }
 0x393   : > { %v7316_v42 = vld [vmem:[%s8759_s17 + $0xe58] sm:$0xf]  ;;  %v7061_v55 = vor.u32 %v8172_v21, %v7060_v41  ;;  %4546 = vmatpush.bf16.msrb.mxu1 %v6773_v45  ;;  %v7944_v35 = vld [vmem:[%s8759_s17 + $0x55c] sm:$0xf]  ;;  %v4328_v21 = vadd.f32 %v4327_v36, %v9838_v5 }
 0x394   : > { %v8236_v43 = vld [vmem:[%s8759_s17 + $0xe74] sm:$0xf0]  ;;  %4534 = vmatmul.bf16.vlgmr.msrb.gmra.mxu0 %v9025_v26  ;;  %v6422_v41 = vld [vmem:[%s8759_s17 + $0x778] sm:$0xf0] }
 0x395   : > { %v7317_v56 = vor.u32 %v8236_v43, %v7316_v42  ;;  %v7028_v60 = vld [vmem:[%s8759_s17 + $0xc18] sm:$0xf]  ;;  %4578 = vmatpush.bf16.msra.mxu0 %v5721_v46  ;;  %4558 = vmatpush.bf16.msrb.mxu2 %v7061_v55  ;;  %v5625_v42 = vor.u32 %v7808_v31, %v5622_v32  ;;  %v5881_v43 = vor.u32 %v7872_v14, %v5878_v34  ;;  %v7800_v44 = vld [vmem:[%s8759_s17 + $0xdc] sm:$0xf] }
 0x396   : > { %v8164_v61 = vld [vmem:[%s8759_s17 + $0xc34] sm:$0xf0]  ;;  %4547 = vmatmul.bf16.vlgmr.msrb.gmra.mxu1 %v9027_v27  ;;  %v5590_v45 = vld [vmem:[%s8759_s17 + $0xf8] sm:$0xf0]  ;;  %v4341_v46 = vadd.f32 %v4340_v38, %v4328_v21  ;;  %v6425_v52 = vor.u32 %v8008_v40, %v6422_v41 }
 0x397   : > { %v7284_v62 = vld [vmem:[%s8759_s17 + $0xe18] sm:$0xf]  ;;  %4591 = vmatpush.bf16.msra.mxu1 %v5977_v47  ;;  %4571 = vmatpush.bf16.msrb.mxu3 %v7317_v56  ;;  %v7029_v8 = vor.u32 %v8164_v61, %v7028_v60  ;;  %v6169_v47 = vor.u32 %v7944_v35, %v6166_v39  ;;  %v7936_v5 = vld [vmem:[%s8759_s17 + $0x51c] sm:$0xf]  ;;  %v5593_v58 = vor.u32 %v7800_v44, %v5590_v45 }
 0x398   : > { %v8228_v63 = vld [vmem:[%s8759_s17 + $0xe34] sm:$0xf0]  ;;  %v6134_v55 = vld [vmem:[%s8759_s17 + $0x538] sm:$0xf0] }
 0x399   : > { %v7285_v9 = vor.u32 %v8228_v63, %v7284_v62  ;;  %4579 = vmatpush.bf16.msra.mxu0 %v5689_v6  ;;  %4559 = vmatpush.bf16.msrb.mxu2 %v7029_v8  ;;  %v8000_v56 = vld [vmem:[%s8759_s17 + $0x71c] sm:$0xf]  ;;  %v6137_v62 = vor.u32 %v7936_v5, %v6134_v55  ;;  %v4342_v6 = vpop.f32.mrf.mxu1 }
 0x39a   : > { %v7792_v60 = vld [vmem:[%s8759_s17 + $0x9c] sm:$0xf]  ;;  %v6393_v63 = vor.u32 %v8000_v56, %v6390_v57 }
 0x39b   : > { %4592 = vmatpush.bf16.msra.mxu1 %v5945_v7  ;;  %4572 = vmatpush.bf16.msrb.mxu3 %v7285_v9  ;;  %v5558_v61 = vld [vmem:[%s8759_s17 + $0xb8] sm:$0xf0] }
 0x39c   : > { %4560 = vmatmul.bf16.vlgmr.msrb.gmra.mxu2 %v9043_v50  ;;  %v7928_v3 = vld [vmem:[%s8759_s17 + $0x4dc] sm:$0xf]  ;;  %v5561_v0 = vor.u32 %v7792_v60, %v5558_v61  ;;  %v4355_v61 = vpop.f32.mrf.mxu2 }
 0x39d   : > { %4604 = vmatpush.bf16.msra.mxu2 %v6233_v13  ;;  %4580 = vmatpush.bf16.msra.mxu0 %v5657_v28  ;;  %v6102_v7 = vld [vmem:[%s8759_s17 + $0x4f8] sm:$0xf0]  ;;  %v4366_v28 = vpop.f32.mrf.mxu3 }
 0x39e   : > { %4573 = vmatmul.bf16.vlgmr.msrb.gmra.mxu3 %v9045_v51  ;;  %v7992_v8 = vld [vmem:[%s8759_s17 + $0x6dc] sm:$0xf]  ;;  %v6105_v16 = vor.u32 %v7928_v3, %v6102_v7 }
 0x39f   : > { %4617 = vmatpush.bf16.msra.mxu3 %v6489_v37  ;;  %4593 = vmatpush.bf16.msra.mxu1 %v5913_v30  ;;  %v6358_v9 = vld [vmem:[%s8759_s17 + $0x6f8] sm:$0xf0] }
 0x3a0   : > { %v7784_v13 = vld [vmem:[%s8759_s17 + $0x5c] sm:$0xf]  ;;  %v6361_v17 = vor.u32 %v7992_v8, %v6358_v9 }
 0x3a1   : > { %4605 = vmatpush.bf16.msra.mxu2 %v6201_v22  ;;  %4581 = vmatpush.bf16.msra.mxu0 %v5625_v42  ;;  %v5526_v37 = vld [vmem:[%s8759_s17 + $0x78] sm:$0xf0]  ;;  %v4354_v22 = vadd.f32 %v4353_v25, %v4341_v46 }
 0x3a2   : > { %v7848_v18 = vld [vmem:[%s8759_s17 + $0x25c] sm:$0xf] }
 0x3a3   : > { %4618 = vmatpush.bf16.msra.mxu3 %v6457_v33  ;;  %4594 = vmatpush.bf16.msra.mxu1 %v5881_v43  ;;  %v5782_v23 = vld [vmem:[%s8759_s17 + $0x278] sm:$0xf0]  ;;  %v5529_v33 = vor.u32 %v7784_v13, %v5526_v37  ;;  %v9909_v38 = vadd.f32 %v4366_v28, %v4354_v22  ;;  %v9943_v22 = vld [vmem:[%s9285_s15] sm:$0xff] }
 0x3a4   : > { %v7920_v24 = vld [vmem:[%s8759_s17 + $0x49c] sm:$0xf]  ;;  %v5785_v14 = vor.u32 %v7848_v18, %v5782_v23 }
 0x3a5   : > { %4606 = vmatpush.bf16.msra.mxu2 %v6169_v47  ;;  %4582 = vmatpush.bf16.msra.mxu0 %v5593_v58  ;;  %v6070_v30 = vld [vmem:[%s8759_s17 + $0x4b8] sm:$0xf0] }
 0x3a6   : > { %v7984_v31 = vld [vmem:[%s8759_s17 + $0x69c] sm:$0xf]  ;;  %v6073_v39 = vor.u32 %v7920_v24, %v6070_v30 }
 0x3a7   : > { %4619 = vmatpush.bf16.msra.mxu3 %v6425_v52  ;;  %4595 = vmatpush.bf16.msra.mxu1 %v5849_v59  ;;  %v6326_v32 = vld [vmem:[%s8759_s17 + $0x6b8] sm:$0xf0] }
 0x3a8   : > { %v7776_v34 = vld [vmem:[%s8759_s17 + $0x1c] sm:$0xf]  ;;  %v6329_v40 = vor.u32 %v7984_v31, %v6326_v32 }
 0x3a9   : > { %4607 = vmatpush.bf16.msra.mxu2 %v6137_v62  ;;  %4583 = vmatpush.bf16.msra.mxu0 %v5561_v0  ;;  %v5494_v35 = vld [vmem:[%s8759_s17 + $0x38] sm:$0xf0]  ;;  %v4368_v62 = vpop.f32.mrf.mxu3 }
 0x3aa   : > { %v7840_v36 = vld [vmem:[%s8759_s17 + $0x21c] sm:$0xf]  ;;  %v5497_v53 = vor.u32 %v7776_v34, %v5494_v35 }
 0x3ab   : > { %4620 = vmatpush.bf16.msra.mxu3 %v6393_v63  ;;  %4596 = vmatpush.bf16.msra.mxu1 %v5817_v11  ;;  %v5750_v41 = vld [vmem:[%s8759_s17 + $0x238] sm:$0xf0] }
 0x3ac   : > { %v8088_v21 = vld [vmem:[%s8759_s17 + $0x9dc] sm:$0xf]  ;;  %v5753_v54 = vor.u32 %v7840_v36, %v5750_v41 }
 0x3ad   : > { %4608 = vmatpush.bf16.msra.mxu2 %v6105_v16  ;;  %v6742_v42 = vld [vmem:[%s8759_s17 + $0x9f8] sm:$0xf0]  ;;  %4584 = vmatpush.bf16.msra.mxu0 %v5529_v33 }
 0x3ae   : > { %v8152_v43 = vld [vmem:[%s8759_s17 + $0xbdc] sm:$0xf]  ;;  %v6745_v5 = vor.u32 %v8088_v21, %v6742_v42  ;;  %v4379_v21 = vpop.f32.mrf.mxu0  ;;  %v4392_v42 = vpop.f32.mrf.mxu1 }
 0x3af   : > { %4621 = vmatpush.bf16.msra.mxu3 %v6361_v17  ;;  %v6998_v44 = vld [vmem:[%s8759_s17 + $0xbf8] sm:$0xf0]  ;;  %4597 = vmatpush.bf16.msra.mxu1 %v5785_v14 }
 0x3b0   : > { %v7912_v45 = vld [vmem:[%s8759_s17 + $0x45c] sm:$0xf]  ;;  %v7001_v55 = vor.u32 %v8152_v43, %v6998_v44 }
 0x3b1   : > { %v6038_v46 = vld [vmem:[%s8759_s17 + $0x478] sm:$0xf0]  ;;  %4609 = vmatpush.bf16.msra.mxu2 %v6073_v39  ;;  %4585 = vmatpush.bf16.msra.mxu0 %v5497_v53 }
 0x3b2   : > { %v7976_v47 = vld [vmem:[%s8759_s17 + $0x65c] sm:$0xf]  ;;  %v6041_v59 = vor.u32 %v7912_v45, %v6038_v46 }
 0x3b3   : > { %v6294_v52 = vld [vmem:[%s8759_s17 + $0x678] sm:$0xf0]  ;;  %4622 = vmatpush.bf16.msra.mxu3 %v6329_v40  ;;  %4598 = vmatpush.bf16.msra.mxu1 %v5753_v54 }
 0x3b4   : > { %v8080_v56 = vld [vmem:[%s8759_s17 + $0x99c] sm:$0xf]  ;;  %v6297_v60 = vor.u32 %v7976_v47, %v6294_v52  ;;  %4586 = vmatmul.bf16.vlgmr.msra.gmra.mxu0 %v8978_v19  ;;  %v1279_v19 = vperm.slane %v9943_v22, 5 }
 0x3b5   : > { %v6710_v57 = vld [vmem:[%s8759_s17 + $0x9b8] sm:$0xf0]  ;;  %4630 = vmatpush.bf16.msrb.mxu0 %v6745_v5  ;;  %4610 = vmatpush.bf16.msra.mxu2 %v6041_v59 }
 0x3b6   : > { %v8144_v58 = vld [vmem:[%s8759_s17 + $0xb9c] sm:$0xf]  ;;  %v6713_v0 = vor.u32 %v8080_v56, %v6710_v57  ;;  %4599 = vmatmul.bf16.vlgmr.msra.gmra.mxu1 %v8980_v20  ;;  %v4380_v46 = vadd.f32 %v4379_v21, %v1279_v19 }
 0x3b7   : > { %v6966_v63 = vld [vmem:[%s8759_s17 + $0xbb8] sm:$0xf0]  ;;  %4643 = vmatpush.bf16.msrb.mxu1 %v7001_v55  ;;  %4623 = vmatpush.bf16.msra.mxu3 %v6297_v60 }
 0x3b8   : > { %v7904_v1 = vld [vmem:[%s8759_s17 + $0x41c] sm:$0xf]  ;;  %v6969_v11 = vor.u32 %v8144_v58, %v6966_v63 }
 0x3b9   : > { %v6006_v2 = vld [vmem:[%s8759_s17 + $0x438] sm:$0xf0]  ;;  %4631 = vmatpush.bf16.msrb.mxu0 %v6713_v0 }
 0x3ba   : > { %v7968_v3 = vld [vmem:[%s8759_s17 + $0x61c] sm:$0xf]  ;;  %v6009_v13 = vor.u32 %v7904_v1, %v6006_v2 }
 0x3bb   : > { %v6262_v4 = vld [vmem:[%s8759_s17 + $0x638] sm:$0xf0]  ;;  %4644 = vmatpush.bf16.msrb.mxu1 %v6969_v11 }
 0x3bc   : > { %v8216_v6 = vld [vmem:[%s8759_s17 + $0xddc] sm:$0xf]  ;;  %v6265_v37 = vor.u32 %v7968_v3, %v6262_v4  ;;  %4611 = vmatpush.bf16.msra.mxu2 %v6009_v13 }
 0x3bd   : > { %v7254_v7 = vld [vmem:[%s8759_s17 + $0xdf8] sm:$0xf0] }
 0x3be   : > { %v8280_v8 = vld [vmem:[%s8759_s17 + $0xfdc] sm:$0xf]  ;;  %v7257_v18 = vor.u32 %v8216_v6, %v7254_v7  ;;  %4624 = vmatpush.bf16.msra.mxu3 %v6265_v37 }
 0x3bf   : > { %v7510_v9 = vld [vmem:[%s8759_s17 + $0xff8] sm:$0xf0]  ;;  %4612 = vmatmul.bf16.vlgmr.msra.gmra.mxu2 %v8998_v48  ;;  %v9959_v48 = vadd.f32 %v4392_v42, %v4380_v46 }
 0x3c0   : > { %v8072_v16 = vld [vmem:[%s8759_s17 + $0x95c] sm:$0xf]  ;;  %v7513_v23 = vor.u32 %v8280_v8, %v7510_v9  ;;  %4656 = vmatpush.bf16.msrb.mxu2 %v7257_v18  ;;  %v4381_v8 = vpop.f32.mrf.mxu0  ;;  %v4394_v9 = vpop.f32.mrf.mxu1 }
 0x3c1   : > { %v6678_v17 = vld [vmem:[%s8759_s17 + $0x978] sm:$0xf0]  ;;  %4625 = vmatmul.bf16.vlgmr.msra.gmra.mxu3 %v9000_v49  ;;  %v8289_v8 = vld [vmem:[%s10007_s30 + $0x20] sm:$0xff] }
 0x3c2   : > { %v8136_v24 = vld [vmem:[%s8759_s17 + $0xb5c] sm:$0xf]  ;;  %v6681_v20 = vor.u32 %v8072_v16, %v6678_v17  ;;  %4669 = vmatpush.bf16.msrb.mxu3 %v7513_v23  ;;  %v8297_v9 = vld [vmem:[%s10007_s30 + $0x60] sm:$0xff] }
 0x3c3   : > { %v6934_v25 = vld [vmem:[%s8759_s17 + $0xb78] sm:$0xf0] }
 0x3c4   : > { %v8208_v28 = vld [vmem:[%s8759_s17 + $0xd9c] sm:$0xf]  ;;  %v6937_v33 = vor.u32 %v8136_v24, %v6934_v25  ;;  %4632 = vmatpush.bf16.msrb.mxu0 %v6681_v20 }
 0x3c5   : > { %v7222_v30 = vld [vmem:[%s8759_s17 + $0xdb8] sm:$0xf0] }
 0x3c6   : > { %v8272_v31 = vld [vmem:[%s8759_s17 + $0xf9c] sm:$0xf]  ;;  %v7225_v35 = vor.u32 %v8208_v28, %v7222_v30  ;;  %4645 = vmatpush.bf16.msrb.mxu1 %v6937_v33 }
 0x3c7   : > { %v7478_v32 = vld [vmem:[%s8759_s17 + $0xfb8] sm:$0xf0] }
 0x3c8   : > { %v8064_v14 = vld [vmem:[%s8759_s17 + $0x91c] sm:$0xf]  ;;  %v7481_v36 = vor.u32 %v8272_v31, %v7478_v32  ;;  %4657 = vmatpush.bf16.msrb.mxu2 %v7225_v35  ;;  %v9992_v31 = vpop.f32.mrf.mxu2  ;;  %v9994_v32 = vpop.f32.mrf.mxu3 }
 0x3c9   : > { %v6646_v34 = vld [vmem:[%s8759_s17 + $0x938] sm:$0xf0] }
 0x3ca   : > { %v8128_v39 = vld [vmem:[%s8759_s17 + $0xb1c] sm:$0xf]  ;;  %v6649_v47 = vor.u32 %v8064_v14, %v6646_v34  ;;  %4670 = vmatpush.bf16.msrb.mxu3 %v7481_v36 }
 0x3cb   : > { %v6902_v40 = vld [vmem:[%s8759_s17 + $0xb38] sm:$0xf0] }
 0x3cc   : > { %v8200_v41 = vld [vmem:[%s8759_s17 + $0xd5c] sm:$0xf]  ;;  %v6905_v52 = vor.u32 %v8128_v39, %v6902_v40  ;;  %4633 = vmatpush.bf16.msrb.mxu0 %v6649_v47 }
 0x3cd   : > { %v7190_v43 = vld [vmem:[%s8759_s17 + $0xd78] sm:$0xf0] }
 0x3ce   : > { %v8264_v44 = vld [vmem:[%s8759_s17 + $0xf5c] sm:$0xf]  ;;  %v7193_v49 = vor.u32 %v8200_v41, %v7190_v43  ;;  %4646 = vmatpush.bf16.msrb.mxu1 %v6905_v52 }
 0x3cf   : > { %v7446_v45 = vld [vmem:[%s8759_s17 + $0xf78] sm:$0xf0] }
 0x3d0   : > { %v8056_v53 = vld [vmem:[%s8759_s17 + $0x8dc] sm:$0xf]  ;;  %v7449_v5 = vor.u32 %v8264_v44, %v7446_v45  ;;  %4658 = vmatpush.bf16.msrb.mxu2 %v7193_v49 }
 0x3d1   : > { %v6614_v54 = vld [vmem:[%s8759_s17 + $0x8f8] sm:$0xf0] }
 0x3d2   : > { %v8120_v55 = vld [vmem:[%s8759_s17 + $0xadc] sm:$0xf]  ;;  %v6617_v61 = vor.u32 %v8056_v53, %v6614_v54  ;;  %4671 = vmatpush.bf16.msrb.mxu3 %v7449_v5  ;;  %v4407_v5 = vpop.f32.mrf.mxu2 }
 0x3d3   : > { %v6870_v56 = vld [vmem:[%s8759_s17 + $0xaf8] sm:$0xf0]  ;;  %v8322_v5 = vld [vmem:[%s10007_s30 + $0x128] sm:$0xff] }
 0x3d4   : > { %v8192_v57 = vld [vmem:[%s8759_s17 + $0xd1c] sm:$0xf]  ;;  %v6873_v62 = vor.u32 %v8120_v55, %v6870_v56  ;;  %4634 = vmatpush.bf16.msrb.mxu0 %v6617_v61  ;;  %v4420_v55 = vpop.f32.mrf.mxu3  ;;  %v8299_v61 = vld [vmem:[%s10007_s30 + $0x70] sm:$0xff] }
 0x3d5   : > { %v7158_v58 = vld [vmem:[%s8759_s17 + $0xd38] sm:$0xf0]  ;;  %v8330_v55 = vld [vmem:[%s10007_s30 + $0x168] sm:$0xff] }
 0x3d6   : > { %v8256_v59 = vld [vmem:[%s8759_s17 + $0xf1c] sm:$0xf]  ;;  %v7161_v2 = vor.u32 %v8192_v57, %v7158_v58  ;;  %4647 = vmatpush.bf16.msrb.mxu1 %v6873_v62 }
 0x3d7   : > { %v7414_v60 = vld [vmem:[%s8759_s17 + $0xf38] sm:$0xf0] }
 0x3d8   : > { %v8048_v63 = vld [vmem:[%s8759_s17 + $0x89c] sm:$0xf]  ;;  %v7417_v3 = vor.u32 %v8256_v59, %v7414_v60  ;;  %4659 = vmatpush.bf16.msrb.mxu2 %v7161_v2  ;;  %v8291_v60 = vld [vmem:[%s10007_s30 + $0x30] sm:$0xff] }
 0x3d9   : > { %v6582_v1 = vld [vmem:[%s8759_s17 + $0x8b8] sm:$0xf0] }
 0x3da   : > { %v8112_v4 = vld [vmem:[%s8759_s17 + $0xa9c] sm:$0xf]  ;;  %v6585_v37 = vor.u32 %v8048_v63, %v6582_v1  ;;  %4672 = vmatpush.bf16.msrb.mxu3 %v7417_v3  ;;  %v8290_v3 = vld [vmem:[%s10007_s30 + $0x28] sm:$0xff] }
 0x3db   : > { %v6838_v6 = vld [vmem:[%s8759_s17 + $0xab8] sm:$0xf0] }
 0x3dc   : > { %v8184_v7 = vld [vmem:[%s8759_s17 + $0xcdc] sm:$0xf]  ;;  %v6841_v16 = vor.u32 %v8112_v4, %v6838_v6  ;;  %4635 = vmatpush.bf16.msrb.mxu0 %v6585_v37  ;;  %v8298_v4 = vld [vmem:[%s10007_s30 + $0x68] sm:$0xff]  ;;  %v8307_v6 = vld [vmem:[%s10007_s30 + $0xb0] sm:$0xff] }
 0x3dd   : > { %v7126_v0 = vld [vmem:[%s8759_s17 + $0xcf8] sm:$0xf0]  ;;  %v8313_v37 = vld [vmem:[%s10007_s30 + $0xe0] sm:$0xff] }
 0x3de   : > { %v8248_v11 = vld [vmem:[%s8759_s17 + $0xedc] sm:$0xf]  ;;  %v7129_v23 = vor.u32 %v8184_v7, %v7126_v0  ;;  %4648 = vmatpush.bf16.msrb.mxu1 %v6841_v16  ;;  %v8315_v7 = vld [vmem:[%s10007_s30 + $0xf0] sm:$0xff]  ;;  %v8306_v0 = vld [vmem:[%s10007_s30 + $0xa8] sm:$0xff] }
 0x3df   : > { %v7382_v13 = vld [vmem:[%s8759_s17 + $0xef8] sm:$0xf0] }
 0x3e0   : > { %v8040_v17 = vld [vmem:[%s8759_s17 + $0x85c] sm:$0xf]  ;;  %v7385_v24 = vor.u32 %v8248_v11, %v7382_v13  ;;  %4660 = vmatpush.bf16.msrb.mxu2 %v7129_v23  ;;  %v8314_v11 = vld [vmem:[%s10007_s30 + $0xe8] sm:$0xff]  ;;  %v8295_v23 = vld [vmem:[%s10007_s30 + $0x50] sm:$0xff] }
 0x3e1   : > { %v6550_v18 = vld [vmem:[%s8759_s17 + $0x878] sm:$0xf0] }
 0x3e2   : > { %v8104_v25 = vld [vmem:[%s8759_s17 + $0xa5c] sm:$0xf]  ;;  %v6553_v14 = vor.u32 %v8040_v17, %v6550_v18  ;;  %4673 = vmatpush.bf16.msrb.mxu3 %v7385_v24  ;;  %v8287_v18 = vld [vmem:[%s10007_s30 + $0x10] sm:$0xff] }
 0x3e3   : > { %v6806_v28 = vld [vmem:[%s8759_s17 + $0xa78] sm:$0xf0] }
 0x3e4   : > { %v8176_v30 = vld [vmem:[%s8759_s17 + $0xc9c] sm:$0xf]  ;;  %v6809_v34 = vor.u32 %v8104_v25, %v6806_v28  ;;  %4636 = vmatpush.bf16.msrb.mxu0 %v6553_v14  ;;  %v10047_v28 = vpop.f32.mrf.mxu2  ;;  %v8311_v14 = vld [vmem:[%s10007_s30 + $0xd0] sm:$0xff] }
 0x3e5   : > { %v7094_v19 = vld [vmem:[%s8759_s17 + $0xcb8] sm:$0xf0] }
 0x3e6   : > { %v8240_v20 = vld [vmem:[%s8759_s17 + $0xe9c] sm:$0xf]  ;;  %v7097_v36 = vor.u32 %v8176_v30, %v7094_v19  ;;  %4649 = vmatpush.bf16.msrb.mxu1 %v6809_v34  ;;  %v10049_v30 = vpop.f32.mrf.mxu3  ;;  %v8286_v19 = vld [vmem:[%s10007_s30 + $0x8] sm:$0xff]  ;;  %v8285_v34 = vld [vmem:[%s10007_s30] sm:$0xff] }
 0x3e7   : > { %v7350_v33 = vld [vmem:[%s8759_s17 + $0xeb8] sm:$0xf0] }
 0x3e8   : > { %v8032_v35 = vld [vmem:[%s8759_s17 + $0x81c] sm:$0xf]  ;;  %v7353_v39 = vor.u32 %v8240_v20, %v7350_v33  ;;  %4661 = vmatpush.bf16.msrb.mxu2 %v7097_v36  ;;  %v8294_v20 = vld [vmem:[%s10007_s30 + $0x48] sm:$0xff]  ;;  %v8303_v33 = vld [vmem:[%s10007_s30 + $0x90] sm:$0xff]  ;;  %v4682_v36 = vmax.f32 %v9375_v10, 0.0 }
 0x3e9   : > { %v6518_v40 = vld [vmem:[%s8759_s17 + $0x838] sm:$0xf0]  ;;  %v8323_v10 = vld [vmem:[%s10007_s30 + $0x130] sm:$0xff] }
 0x3ea   : > { %v8096_v41 = vld [vmem:[%s8759_s17 + $0xa1c] sm:$0xf]  ;;  %v6521_v46 = vor.u32 %v8032_v35, %v6518_v40  ;;  %4674 = vmatpush.bf16.msrb.mxu3 %v7353_v39  ;;  %v8293_v35 = vld [vmem:[%s10007_s30 + $0x40] sm:$0xff]  ;;  %v4683_v39 = vmax.f32 %v9480_v12, 0.0  ;;  %v8331_v12 = vld [vmem:[%s10007_s30 + $0x170] sm:$0xff] }
 0x3eb   : > { %v6774_v21 = vld [vmem:[%s8759_s17 + $0xa38] sm:$0xf0] }
 0x3ec   : > { %v8168_v42 = vld [vmem:[%s8759_s17 + $0xc5c] sm:$0xf]  ;;  %v6777_v47 = vor.u32 %v8096_v41, %v6774_v21  ;;  %4637 = vmatpush.bf16.msrb.mxu0 %v6521_v46  ;;  %v8302_v21 = vld [vmem:[%s10007_s30 + $0x88] sm:$0xff]  ;;  %v4691_v46 = vpack.c.bf16 %v4683_v39, %v4683_v39 }
 0x3ed   : > { %v7062_v43 = vld [vmem:[%s8759_s17 + $0xc78] sm:$0xf0] }
 0x3ee   : > { %v8232_v44 = vld [vmem:[%s8759_s17 + $0xe5c] sm:$0xf]  ;;  %v7065_v54 = vor.u32 %v8168_v42, %v7062_v43  ;;  %4650 = vmatpush.bf16.msrb.mxu1 %v6777_v47  ;;  %v8310_v42 = vld [vmem:[%s10007_s30 + $0xc8] sm:$0xff]  ;;  %v4459_v43 = vpop.f32.mrf.mxu2  ;;  %v8301_v47 = vld [vmem:[%s10007_s30 + $0x80] sm:$0xff] }
 0x3ef   : > { %v7318_v45 = vld [vmem:[%s8759_s17 + $0xe78] sm:$0xf0]  ;;  %4638 = vmatmul.bf16.vlgmr.msrb.gmra.mxu0 %v9025_v26  ;;  %v10029_v26 = vpop.f32.mrf.mxu0 }
 0x3f0   : > { %v8292_v52 = vld [vmem:[%s10007_s30 + $0x38] sm:$0xff]  ;;  %v7321_v49 = vor.u32 %v8232_v44, %v7318_v45  ;;  %4662 = vmatpush.bf16.msrb.mxu2 %v7065_v54  ;;  %v4472_v44 = vpop.f32.mrf.mxu3  ;;  %v4690_v45 = vpack.c.bf16 %v4682_v36, %v4682_v36  ;;  %v4685_v54 = vmax.f32 %v9767_v29, 0.0 }
 0x3f1   : > { %v8300_v53 = vld [vmem:[%s10007_s30 + $0x78] sm:$0xff]  ;;  %5210 = vmatpush.bf16.msra.mxu0 %v8292_v52  ;;  %4651 = vmatmul.bf16.vlgmr.msrb.gmra.mxu1 %v9027_v27  ;;  %v10031_v27 = vpop.f32.mrf.mxu1  ;;  %v8309_v52 = vld [vmem:[%s10007_s30 + $0xc0] sm:$0xff] }
 0x3f2   : > { %v8160_v56 = vld [vmem:[%s8759_s17 + $0xc1c] sm:$0xf]  ;;  %5223 = vmatpush.bf16.msra.mxu1 %v8300_v53  ;;  %4675 = vmatpush.bf16.msrb.mxu3 %v7321_v49  ;;  %v4684_v53 = vmax.f32 %v9622_v15, 0.0  ;;  %v8339_v15 = vld [vmem:[%s10007_s30 + $0x1b0] sm:$0xff] }
 0x3f3   : > { %v7030_v57 = vld [vmem:[%s8759_s17 + $0xc38] sm:$0xf0] }
 0x3f4   : > { %v8224_v58 = vld [vmem:[%s8759_s17 + $0xe1c] sm:$0xf]  ;;  %v7033_v62 = vor.u32 %v8160_v56, %v7030_v57  ;;  %v4692_v56 = vpack.c.bf16 %v4684_v53, %v4684_v53  ;;  %v4693_v57 = vpack.c.bf16 %v4685_v54, %v4685_v54  ;;  %v8346_v53 = vld [vmem:[%s10007_s30 + $0x1e8] sm:$0xff] }
 0x3f5   : > { %v7286_v59 = vld [vmem:[%s8759_s17 + $0xe38] sm:$0xf0]  ;;  %5211 = vmatpush.bf16.msra.mxu0 %v8291_v60  ;;  %v8321_v60 = vld [vmem:[%s10007_s30 + $0x120] sm:$0xff]  ;;  %s5449_s17 = sshll.u32 %s10153_s25, 1 }
 0x3f6   : > { %v7289_v63 = vor.u32 %v8224_v58, %v7286_v59  ;;  %v8308_v1 = vld [vmem:[%s10007_s30 + $0xb8] sm:$0xff]  ;;  %5224 = vmatpush.bf16.msra.mxu1 %v8299_v61  ;;  %4663 = vmatpush.bf16.msrb.mxu2 %v7033_v62  ;;  %v4406_v58 = vadd.f32 %v9992_v31, %v9959_v48  ;;  %v8329_v61 = vld [vmem:[%s10007_s30 + $0x160] sm:$0xff]  ;;  %s358_s11 = scalar_lea.vmem %s10131_s6, %s5449_s17 }
 0x3f7   : > { %v8316_v2 = vld [vmem:[%s10007_s30 + $0xf8] sm:$0xff]  ;;  %v4433_v16 = vpop.f32.mrf.mxu0 }
 0x3f8   : > { %4676 = vmatpush.bf16.msrb.mxu3 %v7289_v63  ;;  %v8288_v13 = vld [vmem:[%s10007_s30 + $0x18] sm:$0xff]  ;;  %v4419_v62 = vadd.f32 %v9994_v32, %v4406_v58  ;;  %v8338_v63 = vld [vmem:[%s10007_s30 + $0x1a8] sm:$0xff]  ;;  %v8319_v32 = vld [vmem:[%s10007_s30 + $0x110] sm:$0xff]  ;;  %v4686_v16 = vmax.f32 %v9909_v38, 0.0 }
 0x3f9   : > { %4664 = vmatmul.bf16.vlgmr.msrb.gmra.mxu2 %v9043_v50  ;;  %5212 = vmatpush.bf16.msra.mxu0 %v8290_v3  ;;  %v8296_v50 = vld [vmem:[%s10007_s30 + $0x58] sm:$0xff]  ;;  %v4446_v17 = vpop.f32.mrf.mxu1 }
 0x3fa   : > { %5236 = vmatpush.bf16.msra.mxu2 %v8308_v1  ;;  %5225 = vmatpush.bf16.msra.mxu1 %v8298_v4  ;;  %v8304_v24 = vld [vmem:[%s10007_s30 + $0x98] sm:$0xff]  ;;  %v4432_v48 = vadd.f32 %v10029_v26, %v4419_v62 }
 0x3fb   : > { %4677 = vmatmul.bf16.vlgmr.msrb.gmra.mxu3 %v9045_v51  ;;  %v8305_v51 = vld [vmem:[%s10007_s30 + $0xa0] sm:$0xff]  ;;  %v8312_v25 = vld [vmem:[%s10007_s30 + $0xd8] sm:$0xff] }
 0x3fc   : > { %5249 = vmatpush.bf16.msra.mxu3 %v8316_v2  ;;  %v8324_v40 = vld [vmem:[%s10007_s30 + $0x138] sm:$0xff]  ;;  %v8337_v2 = vld [vmem:[%s10007_s30 + $0x1a0] sm:$0xff] }
 0x3fd   : > { %5213 = vmatpush.bf16.msra.mxu0 %v8289_v8  ;;  %v8332_v41 = vld [vmem:[%s10007_s30 + $0x178] sm:$0xff] }
 0x3fe   : > { %5237 = vmatpush.bf16.msra.mxu2 %v8307_v6  ;;  %5226 = vmatpush.bf16.msra.mxu1 %v8297_v9  ;;  %v8340_v49 = vld [vmem:[%s10007_s30 + $0x1b8] sm:$0xff]  ;;  %v4445_v6 = vadd.f32 %v10031_v27, %v4432_v48  ;;  %v4509_v9 = vpop.f32.mrf.mxu2 }
 0x3ff   : > { %v4483_v29 = vpop.f32.mrf.mxu0  ;;  %v8320_v31 = vld [vmem:[%s10007_s30 + $0x118] sm:$0xff] }
 0x400   : > { %5250 = vmatpush.bf16.msra.mxu3 %v8315_v7  ;;  %v8328_v1 = vld [vmem:[%s10007_s30 + $0x158] sm:$0xff]  ;;  %v8327_v7 = vld [vmem:[%s10007_s30 + $0x150] sm:$0xff]  ;;  %v4458_v26 = vadd.f32 %v10047_v28, %v4445_v6  ;;  %v4694_v28 = vpack.c.bf16 %v4686_v16, %v4686_v16 }
 0x401   : > { %5214 = vmatpush.bf16.msra.mxu0 %v8288_v13  ;;  %v4496_v59 = vpop.f32.mrf.mxu1  ;;  %v8336_v8 = vld [vmem:[%s10007_s30 + $0x198] sm:$0xff]  ;;  %v8326_v13 = vld [vmem:[%s10007_s30 + $0x148] sm:$0xff] }
 0x402   : > { %5238 = vmatpush.bf16.msra.mxu2 %v8306_v0  ;;  %5227 = vmatpush.bf16.msra.mxu1 %v8296_v50  ;;  %v4522_v0 = vpop.f32.mrf.mxu3  ;;  %v4471_v27 = vadd.f32 %v10049_v30, %v4458_v26  ;;  %v8335_v50 = vld [vmem:[%s10007_s30 + $0x190] sm:$0xff]  ;;  %v8348_v44 = vld [vmem:[%s10007_s30 + $0x1f8] sm:$0xff] }
 0x404   : > { %5251 = vmatpush.bf16.msra.mxu3 %v8314_v11  ;;  %v8318_v11 = vld [vmem:[%s10007_s30 + $0x108] sm:$0xff]  ;;  %v4687_v17 = vmax.f32 %v4471_v27, 0.0 }
 0x405   : > { %5215 = vmatpush.bf16.msra.mxu0 %v8287_v18  ;;  %v8334_v18 = vld [vmem:[%s10007_s30 + $0x188] sm:$0xff] }
 0x406   : > { %5239 = vmatpush.bf16.msra.mxu2 %v8305_v51  ;;  %5228 = vmatpush.bf16.msra.mxu1 %v8295_v23  ;;  %v8317_v51 = vld [vmem:[%s10007_s30 + $0x100] sm:$0xff]  ;;  %v4511_v23 = vpop.f32.mrf.mxu2  ;;  %v4695_v30 = vpack.c.bf16 %v4687_v17, %v4687_v17 }
 0x407   : > { %v4485_v3 = vpop.f32.mrf.mxu0 }
 0x408   : > { %5252 = vmatpush.bf16.msra.mxu3 %v8313_v37  ;;  %v8325_v37 = vld [vmem:[%s10007_s30 + $0x140] sm:$0xff] }
 0x409   : > { %5216 = vmatpush.bf16.msra.mxu0 %v8286_v19  ;;  %v4498_v4 = vpop.f32.mrf.mxu1  ;;  %v8333_v19 = vld [vmem:[%s10007_s30 + $0x180] sm:$0xff] }
 0x40a   : > { %5240 = vmatpush.bf16.msra.mxu2 %v8304_v24  ;;  %5229 = vmatpush.bf16.msra.mxu1 %v8294_v20  ;;  %v4524_v24 = vpop.f32.mrf.mxu3 }
 0x40c   : > { %5253 = vmatpush.bf16.msra.mxu3 %v8312_v25  ;;  %v1280_v25 = vperm.slane %v9943_v22, 6 }
 0x40d   : > { %5217 = vmatpush.bf16.msra.mxu0 %v8285_v34 }
 0x40e   : > { %5241 = vmatpush.bf16.msra.mxu2 %v8303_v33  ;;  %5230 = vmatpush.bf16.msra.mxu1 %v8293_v35  ;;  %v4484_v20 = vadd.f32 %v4483_v29, %v1280_v25 }
 0x410   : > { %5254 = vmatpush.bf16.msra.mxu3 %v8311_v14  ;;  %5218 = vmatmul.bf16.vlgmr.msra.gmra.mxu0 %v4690_v45  ;;  %v4497_v33 = vadd.f32 %v4496_v59, %v4484_v20  ;;  %v8342_v59 = vld [vmem:[%s10007_s30 + $0x1c8] sm:$0xff] }
 0x411   : > { %5262 = vmatpush.bf16.msrb.mxu0 %v8324_v40  ;;  %5231 = vmatmul.bf16.vlgmr.msra.gmra.mxu1 %v4691_v46  ;;  %v4535_v38 = vpop.f32.mrf.mxu0 }
 0x412   : > { %5275 = vmatpush.bf16.msrb.mxu1 %v8332_v41  ;;  %5242 = vmatpush.bf16.msra.mxu2 %v8302_v21  ;;  %v4510_v34 = vadd.f32 %v4509_v9, %v4497_v33 }
 0x413   : > { %v4548_v14 = vpop.f32.mrf.mxu1 }
 0x414   : > { %5255 = vmatpush.bf16.msra.mxu3 %v8310_v42  ;;  %v4523_v35 = vadd.f32 %v4522_v0, %v4510_v34 }
 0x415   : > { %5263 = vmatpush.bf16.msrb.mxu0 %v8323_v10  ;;  %v8347_v10 = vld [vmem:[%s10007_s30 + $0x1f0] sm:$0xff] }
 0x416   : > { %5276 = vmatpush.bf16.msrb.mxu1 %v8331_v12  ;;  %5243 = vmatpush.bf16.msra.mxu2 %v8301_v47  ;;  %v4536_v36 = vadd.f32 %v4535_v38, %v4523_v35 }
 0x418   : > { %5256 = vmatpush.bf16.msra.mxu3 %v8309_v52  ;;  %v4549_v41 = vadd.f32 %v4548_v14, %v4536_v36 }
 0x419   : > { %5244 = vmatmul.bf16.vlgmr.msra.gmra.mxu2 %v4692_v56  ;;  %5264 = vmatpush.bf16.msrb.mxu0 %v8322_v5  ;;  %v4537_v39 = vpop.f32.mrf.mxu0  ;;  %v8345_v5 = vld [vmem:[%s10007_s30 + $0x1e0] sm:$0xff]  ;;  %v8343_v56 = vld [vmem:[%s10007_s30 + $0x1d0] sm:$0xff] }
 0x41a   : > { %5288 = vmatpush.bf16.msrb.mxu2 %v8340_v49  ;;  %5277 = vmatpush.bf16.msrb.mxu1 %v8330_v55  ;;  %v8344_v55 = vld [vmem:[%s10007_s30 + $0x1d8] sm:$0xff] }
 0x41b   : > { %5257 = vmatmul.bf16.vlgmr.msra.gmra.mxu3 %v4693_v57  ;;  %v4550_v40 = vpop.f32.mrf.mxu1 }
 0x41c   : > { %5301 = vmatpush.bf16.msrb.mxu3 %v8348_v44 }
 0x41d   : > { %5265 = vmatpush.bf16.msrb.mxu0 %v8321_v60  ;;  %v8341_v60 = vld [vmem:[%s10007_s30 + $0x1c0] sm:$0xff] }
 0x41e   : > { %5289 = vmatpush.bf16.msrb.mxu2 %v8339_v15  ;;  %5278 = vmatpush.bf16.msrb.mxu1 %v8329_v61 }
 0x41f   : > { %v4561_v21 = vpop.f32.mrf.mxu2 }
 0x420   : > { %v4562_v43 = vadd.f32 %v4561_v21, %v4549_v41  ;;  %5302 = vmatpush.bf16.msrb.mxu3 %v8347_v10 }
 0x421   : > { %5266 = vmatpush.bf16.msrb.mxu0 %v8320_v31  ;;  %v4574_v42 = vpop.f32.mrf.mxu3 }
 0x422   : > { %5290 = vmatpush.bf16.msrb.mxu2 %v8338_v63  ;;  %5279 = vmatpush.bf16.msrb.mxu1 %v8328_v1  ;;  %v4575_v45 = vadd.f32 %v4574_v42, %v4562_v43  ;;  %v1281_v63 = vperm.slane %v9943_v22, 7 }
 0x424   : > { %v4688_v46 = vmax.f32 %v4575_v45, 0.0  ;;  %5303 = vmatpush.bf16.msrb.mxu3 %v8346_v53 }
 0x425   : > { %5267 = vmatpush.bf16.msrb.mxu0 %v8319_v32 }
 0x426   : > { %5291 = vmatpush.bf16.msrb.mxu2 %v8337_v2  ;;  %5280 = vmatpush.bf16.msrb.mxu1 %v8327_v7  ;;  %v4696_v12 = vpack.c.bf16 %v4688_v46, %v4688_v46 }
 0x427   : > { %v4563_v47 = vpop.f32.mrf.mxu2 }
 0x428   : > { %5304 = vmatpush.bf16.msrb.mxu3 %v8345_v5 }
 0x429   : > { %5268 = vmatpush.bf16.msrb.mxu0 %v8318_v11  ;;  %v4576_v52 = vpop.f32.mrf.mxu3 }
 0x42a   : > { %5292 = vmatpush.bf16.msrb.mxu2 %v8336_v8  ;;  %5281 = vmatpush.bf16.msrb.mxu1 %v8326_v13 }
 0x42c   : > { %5305 = vmatpush.bf16.msrb.mxu3 %v8344_v55 }
 0x42d   : > { %5269 = vmatpush.bf16.msrb.mxu0 %v8317_v51 }
 0x42e   : > { %5293 = vmatpush.bf16.msrb.mxu2 %v8335_v50  ;;  %5282 = vmatpush.bf16.msrb.mxu1 %v8325_v37 }
 0x430   : > { %5270 = vmatmul.bf16.vlgmr.msrb.gmra.mxu0 %v4694_v28  ;;  %5306 = vmatpush.bf16.msrb.mxu3 %v8343_v56 }
 0x431   : > { %5283 = vmatmul.bf16.vlgmr.msrb.gmra.mxu1 %v4695_v30  ;;  %v4587_v54 = vpop.f32.mrf.mxu0 }
 0x432   : > { %5294 = vmatpush.bf16.msrb.mxu2 %v8334_v18  ;;  %v4588_v48 = vadd.f32 %v4587_v54, %v1281_v63 }
 0x433   : > { %v4600_v49 = vpop.f32.mrf.mxu1 }
 0x434   : > { %5307 = vmatpush.bf16.msrb.mxu3 %v8342_v59  ;;  %v4601_v31 = vadd.f32 %v4600_v49, %v4588_v48 }
 0x436   : > { %5295 = vmatpush.bf16.msrb.mxu2 %v8333_v19 }
 0x438   : > { %5308 = vmatpush.bf16.msrb.mxu3 %v8341_v60 }
 0x439   : > { %5296 = vmatmul.bf16.vlgmr.msrb.gmra.mxu2 %v4696_v12  ;;  %v4589_v57 = vpop.f32.mrf.mxu0 }
 0x43b   : > { %v4602_v58 = vpop.f32.mrf.mxu1 }
 0x442   : > { %v4613_v15 = vpop.f32.mrf.mxu2 }
 0x443   : > { %v4614_v3 = vadd.f32 %v4613_v15, %v4601_v31 }
 0x444   : > { %v4626_v29 = vpop.f32.mrf.mxu3 }
 0x445   : > { %v4627_v4 = vadd.f32 %v4626_v29, %v4614_v3 }
 0x44a   : > { %v4615_v61 = vpop.f32.mrf.mxu2 }
 0x44c   : > { %v4628_v62 = vpop.f32.mrf.mxu3 }
 0x46c   : > { %v4639_v1 = vpop.f32.mrf.mxu0 }
 0x46d   : > { %v4640_v6 = vadd.f32 %v4639_v1, %v4627_v4 }
 0x46e   : > { %v4652_v2 = vpop.f32.mrf.mxu1 }
 0x46f   : > { %v4653_v26 = vadd.f32 %v4652_v2, %v4640_v6 }
 0x474   : > { %v4641_v32 = vpop.f32.mrf.mxu0 }
 0x476   : > { %v4654_v7 = vpop.f32.mrf.mxu1 }
 0x47c   : > { %v4665_v8 = vpop.f32.mrf.mxu2 }
 0x47d   : > { %v4666_v0 = vadd.f32 %v4665_v8, %v4653_v26 }
 0x47e   : > { %v4678_v9 = vpop.f32.mrf.mxu3 }
 0x47f   : > { %v4679_v11 = vadd.f32 %v4678_v9, %v4666_v0 }
 0x481   : > { %v4689_v13 = vmax.f32 %v4679_v11, 0.0 }
 0x483   : > { %v4697_v27 = vpack.c.bf16 %v4689_v13, %v4689_v13 }
 0x484   : > { %v4667_v50 = vpop.f32.mrf.mxu2 }
 0x485   : > { %5309 = vmatmul.bf16.vlgmr.msrb.gmra.mxu3 %v4697_v27 }
 0x486   : > { %v4680_v51 = vpop.f32.mrf.mxu3 }
 0x48d   : > { %v5219_v22 = vpop.f32.mrf.mxu0 }
 0x48e   : > { %v5232_v37 = vpop.f32.mrf.mxu1 }
 0x48f   : > { %v5233_v16 = vadd.f32 %v5232_v37, %v5219_v22 }
 0x495   : > { %v5221_v17 = vpop.f32.mrf.mxu0 }
 0x496   : > { %v5234_v18 = vpop.f32.mrf.mxu1 }
 0x49c   : > { %v5245_v23 = vpop.f32.mrf.mxu2 }
 0x49d   : > { %v5246_v25 = vadd.f32 %v5245_v23, %v5233_v16 }
 0x49e   : > { %v5258_v24 = vpop.f32.mrf.mxu3 }
 0x49f   : > { %v5259_v28 = vadd.f32 %v5258_v24, %v5246_v25 }
 0x4a4   : > { %v5247_v30 = vpop.f32.mrf.mxu2 }
 0x4a6   : > { %v5260_v19 = vpop.f32.mrf.mxu3 }
 0x4ad   : > { %v5271_v20 = vpop.f32.mrf.mxu0 }
 0x4ae   : > { %v5284_v33 = vpop.f32.mrf.mxu1  ;;  %v5272_v38 = vadd.f32 %v5271_v20, %v5259_v28 }
 0x4b0   : > { %v5285_v14 = vadd.f32 %v5284_v33, %v5272_v38 }
 0x4b5   : > { %v5273_v34 = vpop.f32.mrf.mxu0 }
 0x4b6   : > { %v5286_v35 = vpop.f32.mrf.mxu1 }
 0x4bc   : > { %v5297_v36 = vpop.f32.mrf.mxu2 }
 0x4bd   : > { %v5298_v40 = vadd.f32 %v5297_v36, %v5285_v14 }
 0x4c4   : > { %v5299_v39 = vpop.f32.mrf.mxu2 }
 0x508   : > { %v5310_v41 = vpop.f32.mrf.mxu3 }
 0x509   : > { %v5311_v21 = vadd.f32 %v5310_v41, %v5298_v40 }
 0x50b   : > { %5315 = vst.msk [vmem:[%s358_s11] sm:$0x3] %vm5314_vm4, %v5311_v21 }
 0x510   : > { %v5312_v42 = vpop.f32.mrf.mxu3 }
 0x511 PF: > { %s10145_s13 = sld [smem:[#allocation11_spill]]  ;;  %p15_p9 = scmp.ge.s32.totalorder %s8649_s26, 4  }
 0x512   : > { %s10146_s21 = smov %s8576_s22  ;;  %s10147_s22 = smov %s8580_s23 }
 0x513   : > { %s10149_s24 = smov %s8649_s26  ;;  %17 = sbr.rel (!%p15_p9) target bundleno = 7 (0x7), region = 107 }
 0x517   : > { %s10148_s23 = smov %s10145_s13 }
 0x518   :  { %5335 = vsyncpa [#allocation3], 1 }
 0x519   :  { %5337 = vsyncpa [#allocation3 + $0x1], 1 }
 0x51a   :  { %5338 = vsyncpa [#allocation5], 1 }

</bundles_post_ra>
